<compile_context>
chip_gen: v5e
topology: v5e:2x2
jax: 0.10.0
libtpu: 0.0.40
codegen_flags: <defaults>
</compile_context>

<pallas_src>
import functools

import jax
import jax.numpy as jnp
from jax.experimental import pallas as pl
from jax.experimental.pallas import tpu as pltpu


# ----------------------------------------------------------------------------
# Fused kernel: one grid step = TB batch elements.
#   ids_ref     : VMEM (KMAX, TB*S, 1) int32   pre-shifted token ids (tap k)
#   emb_tab_ref : VMEM (VP, D)         bf16    zero-padded embedding table
#   wall_ref    : VMEM (KMAX*D, n*FP)  bf16    all conv weights, K/N packed
#   cbias_ref   : VMEM (1, n*FP)       f32     conv biases (padded)
#   fcw_ref     : VMEM (n*FP, CP)      bf16    FC weight (padded)
#   fcb_ref     : VMEM (1, CP)         f32     FC bias (padded)
#   out_ref     : VMEM (TB, CP)        f32     padded logits for this block
# ----------------------------------------------------------------------------
def make_textcnn_kernel(filter_sizes, tb, seq_len, f_pad):
    kmax = max(filter_sizes)

    def kernel(ids_ref, emb_tab_ref, wall_ref, cbias_ref, fcw_ref, fcb_ref,
               out_ref):
        ts = tb * seq_len                                  # MXU M dim (=128)
        vp = emb_tab_ref.shape[0]
        tab = emb_tab_ref[...]                             # (VP, D) bf16

        # ---- Embedding gather via one-hot matmul, one block per tap --------
        iota_v = jax.lax.broadcasted_iota(jnp.int32, (ts, vp), 1)
        emb_blocks = []
        for k in range(kmax):
            ids_k = ids_ref[k]                             # (TS, 1) int32
            onehot = jnp.where(ids_k == iota_v, 1.0, 0.0).astype(jnp.bfloat16)
            ek = jnp.dot(onehot, tab,
                         preferred_element_type=jnp.float32)  # (TS, D) = rows
            emb_blocks.append(ek.astype(jnp.bfloat16))
        lhs = jnp.concatenate(emb_blocks, axis=1)          # (TS, KMAX*D) bf16

        # ---- All convs as ONE matmul: M=TS, K=KMAX*D, N=n*FP ----------------
        acc = jnp.dot(lhs, wall_ref[...],
                      preferred_element_type=jnp.float32)  # (TS, n*FP) f32
        acc = jnp.maximum(acc + cbias_ref[...], 0.0)       # bias + ReLU (f32)

        # ---- Per-conv validity mask + max-over-time -------------------------
        npf = acc.shape[-1]
        acc3 = acc.reshape(tb, seq_len, npf)               # tile-aligned split
        pos = jax.lax.broadcasted_iota(jnp.int32, (tb, seq_len, f_pad), 1)
        pooled = []
        for i, s in enumerate(filter_sizes):
            valid_len = seq_len - s + 1
            blk = acc3[:, :, i * f_pad:(i + 1) * f_pad]    # lane slice (free)
            blk = jnp.where(pos < valid_len, blk, 0.0)     # post-ReLU >= 0
            pooled.append(jnp.max(blk, axis=1))            # (TB, FP)
        feat = jnp.concatenate(pooled, axis=1)             # (TB, n*FP) f32

        # ---- FC --------------------------------------------------------------
        logits = jnp.dot(feat.astype(jnp.bfloat16), fcw_ref[...],
                         preferred_element_type=jnp.float32) + fcb_ref[...]
        out_ref[...] = logits                              # full (8,128) store

    return kernel


def textcnn_fused(ids_shift, emb_tab, w_all, cbias, fc_w, fc_b, *,
                  filter_sizes, tb, seq_len):
    kmax, ts_all, _ = ids_shift.shape
    b_pad = ts_all // seq_len
    n = len(filter_sizes)
    f_pad = fc_w.shape[0] // n
    cp = fc_w.shape[1]
    kernel = make_textcnn_kernel(filter_sizes, tb, seq_len, f_pad)

    grid_spec = pltpu.PrefetchScalarGridSpec(
        num_scalar_prefetch=0,
        grid=(b_pad // tb,),
        in_specs=[
            pl.BlockSpec((kmax, tb * seq_len, 1), lambda g: (0, g, 0)),
            pl.BlockSpec(tuple(emb_tab.shape), lambda g: (0, 0)),
            pl.BlockSpec(tuple(w_all.shape), lambda g: (0, 0)),
            pl.BlockSpec(tuple(cbias.shape), lambda g: (0, 0)),
            pl.BlockSpec(tuple(fc_w.shape), lambda g: (0, 0)),
            pl.BlockSpec(tuple(fc_b.shape), lambda g: (0, 0)),
        ],
        out_specs=pl.BlockSpec((tb, cp), lambda g: (g, 0)),
    )
    return pl.pallas_call(
        kernel,
        out_shape=jax.ShapeDtypeStruct((b_pad, cp), jnp.float32),
        grid_spec=grid_spec,
        compiler_params=pltpu.CompilerParams(
            dimension_semantics=("parallel",)),
    )(ids_shift, emb_tab, w_all, cbias, fc_w, fc_b)


# ----------------------------------------------------------------------------
# Parameter init (PyTorch layouts) and kernel-layout packing.
# ----------------------------------------------------------------------------
def init_textcnn_params(key, vocab_size, class_num, filter_num, filter_sizes,
                        embedding_dim):
    n = len(filter_sizes)
    keys = jax.random.split(key, 2 * n + 3)
    emb = 0.02 * jax.random.normal(keys[0], (vocab_size, embedding_dim),
                                   jnp.float32)
    conv_ws, conv_bs = [], []
    for i, s in enumerate(filter_sizes):
        w = 0.02 * jax.random.normal(
            keys[1 + 2 * i], (filter_num, 1, s, embedding_dim), jnp.float32)
        bv = 0.01 * jax.random.normal(keys[2 + 2 * i], (filter_num,),
                                      jnp.float32)
        conv_ws.append(w)
        conv_bs.append(bv)
    fc_w = 0.02 * jax.random.normal(
        keys[-2], (class_num, n * filter_num), jnp.float32)
    fc_b = 0.01 * jax.random.normal(keys[-1], (class_num,), jnp.float32)
    return dict(embedding=emb, conv_ws=conv_ws, conv_bs=conv_bs,
                fc_w=fc_w, fc_b=fc_b)


def pack_params_for_kernel(params, filter_sizes, f_pad=128, v_pad=128,
                           c_pad=128):
    emb = params["embedding"]                              # (V, D) f32
    V, D = emb.shape
    vp = ((V + v_pad - 1) // v_pad) * v_pad
    emb_tab = jnp.zeros((vp, D), jnp.float32).at[:V].set(emb)

    n = len(filter_sizes)
    kmax = max(filter_sizes)
    F = params["conv_bs"][0].shape[0]

    w_all = jnp.zeros((kmax * D, n * f_pad), jnp.float32)
    cbias = jnp.zeros((1, n * f_pad), jnp.float32)
    for i, (s, w, bv) in enumerate(zip(filter_sizes, params["conv_ws"],
                                       params["conv_bs"])):
        for k in range(s):                                 # w: (F, 1, s, D)
            w_all = w_all.at[k * D:(k + 1) * D,
                             i * f_pad:i * f_pad + F].set(w[:, 0, k, :].T)
        cbias = cbias.at[0, i * f_pad:i * f_pad + F].set(bv)

    fc_w = params["fc_w"]                                  # (C, n*F)
    fc_b = params["fc_b"]                                  # (C,)
    C = fc_w.shape[0]
    fcw = jnp.zeros((n * f_pad, c_pad), jnp.float32)
    for i in range(n):
        fcw = fcw.at[i * f_pad:i * f_pad + F, :C].set(
            fc_w[:, i * F:(i + 1) * F].T)
    fcb = jnp.zeros((1, c_pad), jnp.float32).at[0, :C].set(fc_b)

    return dict(emb_tab=emb_tab.astype(jnp.bfloat16),
                w_all=w_all.astype(jnp.bfloat16),
                cbias=cbias,
                fc_w=fcw.astype(jnp.bfloat16),
                fc_b=fcb)


@functools.partial(jax.jit, static_argnames=("class_num", "filter_sizes", "tb"))
def textcnn_forward(kparams, token_ids, class_num, filter_sizes=(3, 4, 5),
                    tb=8):
    B, S = token_ids.shape
    kmax = max(filter_sizes)
    b_pad = ((B + tb - 1) // tb) * tb
    ids = jnp.pad(token_ids.astype(jnp.int32), ((0, b_pad - B), (0, 0)))
    # Pre-shift ids per tap (host side): ids_shift[k, b*S + l] = token(b, l+k)
    # (0 beyond the sequence end; those positions are masked in-kernel).
    ids_ext = jnp.pad(ids, ((0, 0), (0, kmax - 1)))
    ids_shift = jnp.stack([ids_ext[:, k:k + S] for k in range(kmax)], axis=0)
    ids_shift = ids_shift.reshape(kmax, b_pad * S, 1)

    logits_pad = textcnn_fused(
        ids_shift, kparams["emb_tab"], kparams["w_all"], kparams["cbias"],
        kparams["fc_w"], kparams["fc_b"],
        filter_sizes=filter_sizes, tb=tb, seq_len=S)
    # Dropout is identity at inference time.
    # TODO(synk): training-mode dropout (pltpu.prng_random_bits mask) omitted.
    return logits_pad[:B, :class_num]


# ----------------------------------------------------------------------------
# Pure-JAX f32 reference (mirrors the PyTorch module exactly).
# ----------------------------------------------------------------------------
def textcnn_reference(params, token_ids):
    emb = jnp.take(params["embedding"], token_ids, axis=0)      # (B, S, D)
    B, S, D = emb.shape
    pooled = []
    for w, bv in zip(params["conv_ws"], params["conv_bs"]):
        s = w.shape[2]
        L = S - s + 1
        patches = jnp.stack([emb[:, k:k + L, :] for k in range(s)], axis=2)
        scores = jnp.einsum("blkd,fkd->blf", patches, w[:, 0]) + bv
        pooled.append(jnp.max(jnp.maximum(scores, 0.0), axis=1))  # (B, F)
    feat = jnp.concatenate(pooled, axis=1)
    return feat @ params["fc_w"].T + params["fc_b"]


if __name__ == "__main__":
    VOCAB = 50
    CLASSES = 4
    FILTER_NUM = 100
    FILTER_SIZES = (3, 4, 5)
    EMB_DIM = 128
    BATCH = 16          # 2 grid steps of TB=8 -> both v7x TensorCores busy
    SEQ = 16

    key = jax.random.PRNGKey(0)
    k_params, k_ids = jax.random.split(key)
    params = init_textcnn_params(
        k_params, VOCAB, CLASSES, FILTER_NUM, FILTER_SIZES, EMB_DIM)
    kparams = pack_params_for_kernel(params, FILTER_SIZES)
    token_ids = jax.random.randint(k_ids, (BATCH, SEQ), 0, VOCAB, jnp.int32)

    logits = textcnn_forward(kparams, token_ids, CLASSES,
                             filter_sizes=FILTER_SIZES, tb=8)
    jax.block_until_ready(logits)
    assert logits.shape == (BATCH, CLASSES)

    ref = textcnn_reference(params, token_ids)
    assert jnp.allclose(logits, ref, atol=5e-3, rtol=5e-2), (logits, ref)
    print("KERNEL_OK")
</pallas_src>

<mosaic_0001>
module attributes {stable_mosaic.version = 11 : i64} {
  func.func @kernel(%arg0: i32, %arg1: memref<5x128x1xi32, #tpu.memory_space<vmem>>, %arg2: memref<128x128xbf16, #tpu.memory_space<vmem>>, %arg3: memref<640x384xbf16, #tpu.memory_space<vmem>>, %arg4: memref<1x384xf32, #tpu.memory_space<vmem>>, %arg5: memref<384x128xbf16, #tpu.memory_space<vmem>>, %arg6: memref<1x128xf32, #tpu.memory_space<vmem>>, %arg7: memref<8x128xf32, #tpu.memory_space<vmem>>) attributes {dimension_semantics = [#tpu.dimension_semantics<parallel>], iteration_bounds = array<i64: 2>, scalar_prefetch = 0 : i64, scratch_operands = 0 : i64, tpu.core_type = #tpu.core_type<tc>, window_params = [{transform_indices = @transform_0, window_bounds = array<i64: 5, 128, 1>}, {pipeline_mode = #tpu.pipeline_mode<synchronous>, transform_indices = @transform_1, window_bounds = array<i64: 128, 128>}, {pipeline_mode = #tpu.pipeline_mode<synchronous>, transform_indices = @transform_2, window_bounds = array<i64: 640, 384>}, {pipeline_mode = #tpu.pipeline_mode<synchronous>, transform_indices = @transform_3, window_bounds = array<i64: 1, 384>}, {pipeline_mode = #tpu.pipeline_mode<synchronous>, transform_indices = @transform_4, window_bounds = array<i64: 384, 128>}, {pipeline_mode = #tpu.pipeline_mode<synchronous>, transform_indices = @transform_5, window_bounds = array<i64: 1, 128>}, {transform_indices = @transform_6, window_bounds = array<i64: 8, 128>}]} {
    %c0 = arith.constant 0 : index
    %c0_0 = arith.constant 0 : index
    %0 = vector.load %arg2[%c0, %c0_0] : memref<128x128xbf16, #tpu.memory_space<vmem>>, vector<128x128xbf16>
    %1 = tpu.iota {dimensions = array<i32: 1>} : vector<128x128xi32>
    %c0_1 = arith.constant 0 : index
    %c0_2 = arith.constant 0 : index
    %c0_3 = arith.constant 0 : index
    %2 = vector.load %arg1[%c0_1, %c0_2, %c0_3] : memref<5x128x1xi32, #tpu.memory_space<vmem>>, vector<1x128x1xi32>
    %3 = vector.shape_cast %2 : vector<1x128x1xi32> to vector<128x1xi32>
    %4 = vector.broadcast %3 : vector<128x1xi32> to vector<128x128xi32>
    %5 = arith.cmpi eq, %4, %1 : vector<128x128xi32>
    %cst = arith.constant 1.000000e+00 : f32
    %cst_4 = arith.constant 0.000000e+00 : f32
    %6 = vector.broadcast %cst : f32 to vector<128x128xf32>
    %7 = vector.broadcast %cst_4 : f32 to vector<128x128xf32>
    %8 = arith.select %5, %6, %7 : vector<128x128xi1>, vector<128x128xf32>
    %9 = arith.truncf %8 : vector<128x128xf32> to vector<128x128xbf16>
    %cst_5 = arith.constant dense<0.000000e+00> : vector<128x128xf32>
    %10 = tpu.matmul %9, %0, %cst_5 {dimension_numbers = #tpu.dot_dimension_numbers<[1], [0], [0], [1], [0, 0, 1, 1], [], []>} : vector<128x128xbf16>, vector<128x128xbf16>, vector<128x128xf32> -> vector<128x128xf32>
    %11 = arith.truncf %10 : vector<128x128xf32> to vector<128x128xbf16>
    %c1 = arith.constant 1 : index
    %c0_6 = arith.constant 0 : index
    %c0_7 = arith.constant 0 : index
    %12 = vector.load %arg1[%c1, %c0_6, %c0_7] : memref<5x128x1xi32, #tpu.memory_space<vmem>>, vector<1x128x1xi32>
    %13 = vector.shape_cast %12 : vector<1x128x1xi32> to vector<128x1xi32>
    %14 = vector.broadcast %13 : vector<128x1xi32> to vector<128x128xi32>
    %15 = arith.cmpi eq, %14, %1 : vector<128x128xi32>
    %cst_8 = arith.constant 1.000000e+00 : f32
    %cst_9 = arith.constant 0.000000e+00 : f32
    %16 = vector.broadcast %cst_8 : f32 to vector<128x128xf32>
    %17 = vector.broadcast %cst_9 : f32 to vector<128x128xf32>
    %18 = arith.select %15, %16, %17 : vector<128x128xi1>, vector<128x128xf32>
    %19 = arith.truncf %18 : vector<128x128xf32> to vector<128x128xbf16>
    %cst_10 = arith.constant dense<0.000000e+00> : vector<128x128xf32>
    %20 = tpu.matmul %19, %0, %cst_10 {dimension_numbers = #tpu.dot_dimension_numbers<[1], [0], [0], [1], [0, 0, 1, 1], [], []>} : vector<128x128xbf16>, vector<128x128xbf16>, vector<128x128xf32> -> vector<128x128xf32>
    %21 = arith.truncf %20 : vector<128x128xf32> to vector<128x128xbf16>
    %c2 = arith.constant 2 : index
    %c0_11 = arith.constant 0 : index
    %c0_12 = arith.constant 0 : index
    %22 = vector.load %arg1[%c2, %c0_11, %c0_12] : memref<5x128x1xi32, #tpu.memory_space<vmem>>, vector<1x128x1xi32>
    %23 = vector.shape_cast %22 : vector<1x128x1xi32> to vector<128x1xi32>
    %24 = vector.broadcast %23 : vector<128x1xi32> to vector<128x128xi32>
    %25 = arith.cmpi eq, %24, %1 : vector<128x128xi32>
    %cst_13 = arith.constant 1.000000e+00 : f32
    %cst_14 = arith.constant 0.000000e+00 : f32
    %26 = vector.broadcast %cst_13 : f32 to vector<128x128xf32>
    %27 = vector.broadcast %cst_14 : f32 to vector<128x128xf32>
    %28 = arith.select %25, %26, %27 : vector<128x128xi1>, vector<128x128xf32>
    %29 = arith.truncf %28 : vector<128x128xf32> to vector<128x128xbf16>
    %cst_15 = arith.constant dense<0.000000e+00> : vector<128x128xf32>
    %30 = tpu.matmul %29, %0, %cst_15 {dimension_numbers = #tpu.dot_dimension_numbers<[1], [0], [0], [1], [0, 0, 1, 1], [], []>} : vector<128x128xbf16>, vector<128x128xbf16>, vector<128x128xf32> -> vector<128x128xf32>
    %31 = arith.truncf %30 : vector<128x128xf32> to vector<128x128xbf16>
    %c3 = arith.constant 3 : index
    %c0_16 = arith.constant 0 : index
    %c0_17 = arith.constant 0 : index
    %32 = vector.load %arg1[%c3, %c0_16, %c0_17] : memref<5x128x1xi32, #tpu.memory_space<vmem>>, vector<1x128x1xi32>
    %33 = vector.shape_cast %32 : vector<1x128x1xi32> to vector<128x1xi32>
    %34 = vector.broadcast %33 : vector<128x1xi32> to vector<128x128xi32>
    %35 = arith.cmpi eq, %34, %1 : vector<128x128xi32>
    %cst_18 = arith.constant 1.000000e+00 : f32
    %cst_19 = arith.constant 0.000000e+00 : f32
    %36 = vector.broadcast %cst_18 : f32 to vector<128x128xf32>
    %37 = vector.broadcast %cst_19 : f32 to vector<128x128xf32>
    %38 = arith.select %35, %36, %37 : vector<128x128xi1>, vector<128x128xf32>
    %39 = arith.truncf %38 : vector<128x128xf32> to vector<128x128xbf16>
    %cst_20 = arith.constant dense<0.000000e+00> : vector<128x128xf32>
    %40 = tpu.matmul %39, %0, %cst_20 {dimension_numbers = #tpu.dot_dimension_numbers<[1], [0], [0], [1], [0, 0, 1, 1], [], []>} : vector<128x128xbf16>, vector<128x128xbf16>, vector<128x128xf32> -> vector<128x128xf32>
    %41 = arith.truncf %40 : vector<128x128xf32> to vector<128x128xbf16>
    %c4 = arith.constant 4 : index
    %c0_21 = arith.constant 0 : index
    %c0_22 = arith.constant 0 : index
    %42 = vector.load %arg1[%c4, %c0_21, %c0_22] : memref<5x128x1xi32, #tpu.memory_space<vmem>>, vector<1x128x1xi32>
    %43 = vector.shape_cast %42 : vector<1x128x1xi32> to vector<128x1xi32>
    %44 = vector.broadcast %43 : vector<128x1xi32> to vector<128x128xi32>
    %45 = arith.cmpi eq, %44, %1 : vector<128x128xi32>
    %cst_23 = arith.constant 1.000000e+00 : f32
    %cst_24 = arith.constant 0.000000e+00 : f32
    %46 = vector.broadcast %cst_23 : f32 to vector<128x128xf32>
    %47 = vector.broadcast %cst_24 : f32 to vector<128x128xf32>
    %48 = arith.select %45, %46, %47 : vector<128x128xi1>, vector<128x128xf32>
    %49 = arith.truncf %48 : vector<128x128xf32> to vector<128x128xbf16>
    %cst_25 = arith.constant dense<0.000000e+00> : vector<128x128xf32>
    %50 = tpu.matmul %49, %0, %cst_25 {dimension_numbers = #tpu.dot_dimension_numbers<[1], [0], [0], [1], [0, 0, 1, 1], [], []>} : vector<128x128xbf16>, vector<128x128xbf16>, vector<128x128xf32> -> vector<128x128xf32>
    %51 = arith.truncf %50 : vector<128x128xf32> to vector<128x128xbf16>
    %52 = tpu.concatenate %11, %21, %31, %41, %51 in 1 : vector<128x128xbf16>, vector<128x128xbf16>, vector<128x128xbf16>, vector<128x128xbf16>, vector<128x128xbf16> -> vector<128x640xbf16>
    %c0_26 = arith.constant 0 : index
    %c0_27 = arith.constant 0 : index
    %53 = vector.load %arg3[%c0_26, %c0_27] : memref<640x384xbf16, #tpu.memory_space<vmem>>, vector<640x384xbf16>
    %cst_28 = arith.constant dense<0.000000e+00> : vector<128x384xf32>
    %54 = tpu.matmul %52, %53, %cst_28 {dimension_numbers = #tpu.dot_dimension_numbers<[1], [0], [0], [1], [0, 0, 1, 1], [], []>} : vector<128x640xbf16>, vector<640x384xbf16>, vector<128x384xf32> -> vector<128x384xf32>
    %c0_29 = arith.constant 0 : index
    %c0_30 = arith.constant 0 : index
    %55 = vector.load %arg4[%c0_29, %c0_30] : memref<1x384xf32, #tpu.memory_space<vmem>>, vector<1x384xf32>
    %56 = vector.broadcast %55 : vector<1x384xf32> to vector<128x384xf32>
    %57 = arith.addf %54, %56 : vector<128x384xf32>
    %cst_31 = arith.constant 0.000000e+00 : f32
    %58 = vector.broadcast %cst_31 : f32 to vector<128x384xf32>
    %59 = arith.maximumf %57, %58 : vector<128x384xf32>
    %60 = vector.shape_cast %59 : vector<128x384xf32> to vector<8x16x384xf32>
    %61 = tpu.iota {dimensions = array<i32: 1>} : vector<8x16x128xi32>
    %62 = vector.extract_strided_slice %60 {offsets = [0, 0, 0], sizes = [8, 16, 128], strides = [1, 1, 1]} : vector<8x16x384xf32> to vector<8x16x128xf32>
    %c14_i32 = arith.constant 14 : i32
    %63 = vector.broadcast %c14_i32 : i32 to vector<8x16x128xi32>
    %64 = arith.cmpi slt, %61, %63 : vector<8x16x128xi32>
    %cst_32 = arith.constant 0.000000e+00 : f32
    %65 = vector.broadcast %cst_32 : f32 to vector<8x16x128xf32>
    %66 = arith.select %64, %62, %65 : vector<8x16x128xi1>, vector<8x16x128xf32>
    %cst_33 = arith.constant dense<0xFF800000> : vector<8x128xf32>
    %67 = vector.multi_reduction <maximumf>, %66, %cst_33 [1] : vector<8x16x128xf32> to vector<8x128xf32>
    %68 = vector.extract_strided_slice %60 {offsets = [0, 0, 128], sizes = [8, 16, 128], strides = [1, 1, 1]} : vector<8x16x384xf32> to vector<8x16x128xf32>
    %c13_i32 = arith.constant 13 : i32
    %69 = vector.broadcast %c13_i32 : i32 to vector<8x16x128xi32>
    %70 = arith.cmpi slt, %61, %69 : vector<8x16x128xi32>
    %cst_34 = arith.constant 0.000000e+00 : f32
    %71 = vector.broadcast %cst_34 : f32 to vector<8x16x128xf32>
    %72 = arith.select %70, %68, %71 : vector<8x16x128xi1>, vector<8x16x128xf32>
    %cst_35 = arith.constant dense<0xFF800000> : vector<8x128xf32>
    %73 = vector.multi_reduction <maximumf>, %72, %cst_35 [1] : vector<8x16x128xf32> to vector<8x128xf32>
    %74 = vector.extract_strided_slice %60 {offsets = [0, 0, 256], sizes = [8, 16, 128], strides = [1, 1, 1]} : vector<8x16x384xf32> to vector<8x16x128xf32>
    %c12_i32 = arith.constant 12 : i32
    %75 = vector.broadcast %c12_i32 : i32 to vector<8x16x128xi32>
    %76 = arith.cmpi slt, %61, %75 : vector<8x16x128xi32>
    %cst_36 = arith.constant 0.000000e+00 : f32
    %77 = vector.broadcast %cst_36 : f32 to vector<8x16x128xf32>
    %78 = arith.select %76, %74, %77 : vector<8x16x128xi1>, vector<8x16x128xf32>
    %cst_37 = arith.constant dense<0xFF800000> : vector<8x128xf32>
    %79 = vector.multi_reduction <maximumf>, %78, %cst_37 [1] : vector<8x16x128xf32> to vector<8x128xf32>
    %80 = tpu.concatenate %67, %73, %79 in 1 : vector<8x128xf32>, vector<8x128xf32>, vector<8x128xf32> -> vector<8x384xf32>
    %81 = arith.truncf %80 : vector<8x384xf32> to vector<8x384xbf16>
    %c0_38 = arith.constant 0 : index
    %c0_39 = arith.constant 0 : index
    %82 = vector.load %arg5[%c0_38, %c0_39] : memref<384x128xbf16, #tpu.memory_space<vmem>>, vector<384x128xbf16>
    %cst_40 = arith.constant dense<0.000000e+00> : vector<8x128xf32>
    %83 = tpu.matmul %81, %82, %cst_40 {dimension_numbers = #tpu.dot_dimension_numbers<[1], [0], [0], [1], [0, 0, 1, 1], [], []>} : vector<8x384xbf16>, vector<384x128xbf16>, vector<8x128xf32> -> vector<8x128xf32>
    %c0_41 = arith.constant 0 : index
    %c0_42 = arith.constant 0 : index
    %84 = vector.load %arg6[%c0_41, %c0_42] : memref<1x128xf32, #tpu.memory_space<vmem>>, vector<1x128xf32>
    %85 = vector.broadcast %84 : vector<1x128xf32> to vector<8x128xf32>
    %86 = arith.addf %83, %85 : vector<8x128xf32>
    %c0_43 = arith.constant 0 : index
    %c0_44 = arith.constant 0 : index
    %87 = vector.load %arg7[%c0_43, %c0_44] : memref<8x128xf32, #tpu.memory_space<vmem>>, vector<8x128xf32>
    tpu.vector_store %arg7[%c0_43, %c0_44], %86 {strides = array<i32>} : memref<8x128xf32, #tpu.memory_space<vmem>>, vector<8x128xf32>,
    return
  }
  func.func @transform_0(%arg0: i32) -> (i32, i32, i32) {
    %c0_i32 = arith.constant 0 : i32
    %c0_i32_0 = arith.constant 0 : i32
    %c0_i32_1 = arith.constant 0 : i32
    return %c0_i32, %arg0, %c0_i32_0 : i32, i32, i32
  }
  func.func @transform_1(%arg0: i32) -> (i32, i32) {
    %c0_i32 = arith.constant 0 : i32
    %c0_i32_0 = arith.constant 0 : i32
    %c0_i32_1 = arith.constant 0 : i32
    return %c0_i32, %c0_i32_0 : i32, i32
  }
  func.func @transform_2(%arg0: i32) -> (i32, i32) {
    %c0_i32 = arith.constant 0 : i32
    %c0_i32_0 = arith.constant 0 : i32
    %c0_i32_1 = arith.constant 0 : i32
    return %c0_i32, %c0_i32_0 : i32, i32
  }
  func.func @transform_3(%arg0: i32) -> (i32, i32) {
    %c0_i32 = arith.constant 0 : i32
    %c0_i32_0 = arith.constant 0 : i32
    %c0_i32_1 = arith.constant 0 : i32
    return %c0_i32, %c0_i32_0 : i32, i32
  }
  func.func @transform_4(%arg0: i32) -> (i32, i32) {
    %c0_i32 = arith.constant 0 : i32
    %c0_i32_0 = arith.constant 0 : i32
    %c0_i32_1 = arith.constant 0 : i32
    return %c0_i32, %c0_i32_0 : i32, i32
  }
  func.func @transform_5(%arg0: i32) -> (i32, i32) {
    %c0_i32 = arith.constant 0 : i32
    %c0_i32_0 = arith.constant 0 : i32
    %c0_i32_1 = arith.constant 0 : i32
    return %c0_i32, %c0_i32_0 : i32, i32
  }
  func.func @transform_6(%arg0: i32) -> (i32, i32) {
    %c0_i32 = arith.constant 0 : i32
    %c0_i32_0 = arith.constant 0 : i32
    return %arg0, %c0_i32 : i32, i32
  }
}

</mosaic_0001>

<bundles_post_ra>
// kernel: textcnn_forward.1
= control target key start
LH: loop header
LB: loop body
LE: loop exit
PB: predicated region body
PF: predicated region fallthrough
CT: control target
= control target key end

     0   :  { %s4936_s21 = smov 0   ;;  %s4938_s22 = smov 0   ;;  %s6792_s0 = inlined_call_operand.vmem [shape: s32[5,256,1], index: 0, kind: input, shape index: {}]   ;;  %s6793_s1 = inlined_call_operand.vmem [shape: bf16[128,128], index: 1, kind: input, shape index: {}]   ;;  %s6794_s2 = inlined_call_operand.vmem [shape: bf16[640,384], index: 2, kind: input, shape index: {}]   ;;  %s6795_s3 = inlined_call_operand.vmem [shape: f32[1,384], index: 3, kind: input, shape index: {}]   ;;  %s6796_s4 = inlined_call_operand.vmem [shape: bf16[384,128], index: 4, kind: input, shape index: {}]   ;;  %s6797_s5 = inlined_call_operand.vmem [shape: f32[1,128], index: 5, kind: input, shape index: {}]   ;;  %s6798_s6 = inlined_call_operand.vmem [shape: f32[16,128], index: 6, kind: output, shape index: {}]  }
   0x1   :  { %s4940_s23 = smov 0  }
   0x2 LB: > { %s3927_s24 = sadd.s32 4294967295, %s4897_s23   ;;  %s4953_s25 = sadd.s32 1, %s4897_s23   ;;  %s4897_s23 = sphi %s4940_s23, %s6868_s23   ;;  %s4893_s22 = sphi %s4938_s22, %s6867_s22   ;;  %s4889_s21 = sphi %s4936_s21, %s6866_s21  }
   0x3   : > { %s20_s26 = ssub.s32 %s4897_s23, %s4953_s25  ;;  %s23_s27 = sadd.s32 1, %s4893_s22 }
   0x4   : > { %p21_p0 = scmp.eq.s32.totalorder %s20_s26, 0  ;;  %p30_p1 = scmp.ne.s32.totalorder %s4893_s22, %s4889_s21 }
   0x5   : > { %p31_p2 = scmp.eq.s32.totalorder %s4897_s23, 0  ;;  %p3930_p4 = scmp.ge.s32.totalorder %s4897_s23, 2 }
   0x6   : > { %s4962_s28 = scalar_select %p21_p0, %s4893_s22, %s23_s27  }
   0x7   : > { %p32_p3 = por %p31_p2, %p30_p1  ;;  %202 = sbr.rel (%p3930_p4) target bundleno = 96 (0x60), region = 36 }
   0xc   : > { %205 = sbr.rel (!%p32_p3) target bundleno = 96 (0x60), region = 40  ;;  %s207_s29 = sand.u32 (%p32_p3), 1, %s4893_s22  }
   0xd   : > { %s4689_s30 = sshll.u32 (%p32_p3), %s4897_s23, 7  ;;  %s4842_s7 = smul.u32 (%p32_p3), 640, %s207_s29 }
   0xe   : > { %s4970_s10 = scalar_lea.vmem (%p32_p3), %s6792_s0, %s4689_s30 }
   0xf   : > { %v399_v0 = vld [vmem:[%s4970_s10] sm:$0xff] (%p32_p3)  ;;  %v401_v1 = vld [vmem:[%s4970_s10 + $0x8] sm:$0xff] (%p32_p3)  ;;  %v403_v2 = vld [vmem:[%s4970_s10 + $0x10] sm:$0xff] (%p32_p3)  ;;  %s4975_s11 = scalar_lea.vmem (%p32_p3), [#allocation2], %s4842_s7 }
  0x10   : > { %400 = vst [vmem:[%s4975_s11] sm:$0xff] (%p32_p3), %v399_v0  ;;  %v405_v3 = vld [vmem:[%s4970_s10 + $0x18] sm:$0xff] (%p32_p3)  ;;  %v407_v4 = vld [vmem:[%s4970_s10 + $0x20] sm:$0xff] (%p32_p3)  ;;  %v409_v5 = vld [vmem:[%s4970_s10 + $0x28] sm:$0xff] (%p32_p3) }
  0x11   : > { %402 = vst [vmem:[%s4975_s11 + $0x8] sm:$0xff] %v401_v1  ;;  %v411_v6 = vld [vmem:[%s4970_s10 + $0x30] sm:$0xff]  ;;  %v413_v7 = vld [vmem:[%s4970_s10 + $0x38] sm:$0xff]  ;;  %v415_v8 = vld [vmem:[%s4970_s10 + $0x40] sm:$0xff] }
  0x12   : > { %404 = vst [vmem:[%s4975_s11 + $0x10] sm:$0xff] %v403_v2  ;;  %v417_v9 = vld [vmem:[%s4970_s10 + $0x48] sm:$0xff]  ;;  %v419_v10 = vld [vmem:[%s4970_s10 + $0x50] sm:$0xff]  ;;  %v421_v11 = vld [vmem:[%s4970_s10 + $0x58] sm:$0xff] }
  0x13   : > { %406 = vst [vmem:[%s4975_s11 + $0x18] sm:$0xff] %v405_v3  ;;  %v423_v12 = vld [vmem:[%s4970_s10 + $0x60] sm:$0xff]  ;;  %v425_v13 = vld [vmem:[%s4970_s10 + $0x68] sm:$0xff]  ;;  %v427_v14 = vld [vmem:[%s4970_s10 + $0x70] sm:$0xff] }
  0x14   : > { %408 = vst [vmem:[%s4975_s11 + $0x20] sm:$0xff] %v407_v4  ;;  %v429_v15 = vld [vmem:[%s4970_s10 + $0x78] sm:$0xff]  ;;  %v431_v16 = vld [vmem:[%s4970_s10 + $0x100] sm:$0xff]  ;;  %v433_v17 = vld [vmem:[%s4970_s10 + $0x108] sm:$0xff] }
  0x15   : > { %410 = vst [vmem:[%s4975_s11 + $0x28] sm:$0xff] %v409_v5  ;;  %v435_v18 = vld [vmem:[%s4970_s10 + $0x110] sm:$0xff]  ;;  %v437_v19 = vld [vmem:[%s4970_s10 + $0x118] sm:$0xff]  ;;  %v439_v20 = vld [vmem:[%s4970_s10 + $0x120] sm:$0xff] }
  0x16   : > { %412 = vst [vmem:[%s4975_s11 + $0x30] sm:$0xff] %v411_v6  ;;  %v441_v21 = vld [vmem:[%s4970_s10 + $0x128] sm:$0xff]  ;;  %v443_v22 = vld [vmem:[%s4970_s10 + $0x130] sm:$0xff]  ;;  %v445_v23 = vld [vmem:[%s4970_s10 + $0x138] sm:$0xff] }
  0x17   : > { %414 = vst [vmem:[%s4975_s11 + $0x38] sm:$0xff] %v413_v7  ;;  %v447_v24 = vld [vmem:[%s4970_s10 + $0x140] sm:$0xff]  ;;  %v449_v25 = vld [vmem:[%s4970_s10 + $0x148] sm:$0xff]  ;;  %v451_v26 = vld [vmem:[%s4970_s10 + $0x150] sm:$0xff] }
  0x18   : > { %416 = vst [vmem:[%s4975_s11 + $0x40] sm:$0xff] %v415_v8  ;;  %v453_v27 = vld [vmem:[%s4970_s10 + $0x158] sm:$0xff]  ;;  %v455_v28 = vld [vmem:[%s4970_s10 + $0x160] sm:$0xff]  ;;  %v457_v29 = vld [vmem:[%s4970_s10 + $0x168] sm:$0xff] }
  0x19   : > { %418 = vst [vmem:[%s4975_s11 + $0x48] sm:$0xff] %v417_v9  ;;  %v459_v30 = vld [vmem:[%s4970_s10 + $0x170] sm:$0xff]  ;;  %v461_v31 = vld [vmem:[%s4970_s10 + $0x178] sm:$0xff]  ;;  %v463_v32 = vld [vmem:[%s4970_s10 + $0x200] sm:$0xff] }
  0x1a   : > { %420 = vst [vmem:[%s4975_s11 + $0x50] sm:$0xff] %v419_v10  ;;  %v465_v33 = vld [vmem:[%s4970_s10 + $0x208] sm:$0xff]  ;;  %v467_v34 = vld [vmem:[%s4970_s10 + $0x210] sm:$0xff]  ;;  %v469_v35 = vld [vmem:[%s4970_s10 + $0x218] sm:$0xff] }
  0x1b   : > { %422 = vst [vmem:[%s4975_s11 + $0x58] sm:$0xff] %v421_v11  ;;  %v471_v36 = vld [vmem:[%s4970_s10 + $0x220] sm:$0xff]  ;;  %v473_v37 = vld [vmem:[%s4970_s10 + $0x228] sm:$0xff]  ;;  %v475_v38 = vld [vmem:[%s4970_s10 + $0x230] sm:$0xff] }
  0x1c   : > { %424 = vst [vmem:[%s4975_s11 + $0x60] sm:$0xff] %v423_v12  ;;  %v477_v39 = vld [vmem:[%s4970_s10 + $0x238] sm:$0xff]  ;;  %v479_v40 = vld [vmem:[%s4970_s10 + $0x240] sm:$0xff]  ;;  %v481_v41 = vld [vmem:[%s4970_s10 + $0x248] sm:$0xff] }
  0x1d   : > { %426 = vst [vmem:[%s4975_s11 + $0x68] sm:$0xff] %v425_v13  ;;  %v483_v42 = vld [vmem:[%s4970_s10 + $0x250] sm:$0xff]  ;;  %v485_v43 = vld [vmem:[%s4970_s10 + $0x258] sm:$0xff]  ;;  %v487_v44 = vld [vmem:[%s4970_s10 + $0x260] sm:$0xff] }
  0x1e   : > { %428 = vst [vmem:[%s4975_s11 + $0x70] sm:$0xff] %v427_v14  ;;  %v489_v45 = vld [vmem:[%s4970_s10 + $0x268] sm:$0xff]  ;;  %v491_v46 = vld [vmem:[%s4970_s10 + $0x270] sm:$0xff]  ;;  %v493_v47 = vld [vmem:[%s4970_s10 + $0x278] sm:$0xff] }
  0x1f   : > { %430 = vst [vmem:[%s4975_s11 + $0x78] sm:$0xff] %v429_v15  ;;  %v495_v48 = vld [vmem:[%s4970_s10 + $0x300] sm:$0xff]  ;;  %v497_v49 = vld [vmem:[%s4970_s10 + $0x308] sm:$0xff]  ;;  %v499_v50 = vld [vmem:[%s4970_s10 + $0x310] sm:$0xff] }
  0x20   : > { %432 = vst [vmem:[%s4975_s11 + $0x80] sm:$0xff] %v431_v16  ;;  %v501_v51 = vld [vmem:[%s4970_s10 + $0x318] sm:$0xff]  ;;  %v503_v52 = vld [vmem:[%s4970_s10 + $0x320] sm:$0xff]  ;;  %v505_v53 = vld [vmem:[%s4970_s10 + $0x328] sm:$0xff] }
  0x21   : > { %434 = vst [vmem:[%s4975_s11 + $0x88] sm:$0xff] %v433_v17  ;;  %v507_v54 = vld [vmem:[%s4970_s10 + $0x330] sm:$0xff]  ;;  %v509_v55 = vld [vmem:[%s4970_s10 + $0x338] sm:$0xff]  ;;  %v511_v56 = vld [vmem:[%s4970_s10 + $0x340] sm:$0xff] }
  0x22   : > { %436 = vst [vmem:[%s4975_s11 + $0x90] sm:$0xff] %v435_v18  ;;  %v513_v57 = vld [vmem:[%s4970_s10 + $0x348] sm:$0xff]  ;;  %v515_v58 = vld [vmem:[%s4970_s10 + $0x350] sm:$0xff]  ;;  %v517_v59 = vld [vmem:[%s4970_s10 + $0x358] sm:$0xff] }
  0x23   : > { %438 = vst [vmem:[%s4975_s11 + $0x98] sm:$0xff] %v437_v19  ;;  %v519_v60 = vld [vmem:[%s4970_s10 + $0x360] sm:$0xff]  ;;  %v521_v61 = vld [vmem:[%s4970_s10 + $0x368] sm:$0xff]  ;;  %v523_v62 = vld [vmem:[%s4970_s10 + $0x370] sm:$0xff] }
  0x24   : > { %440 = vst [vmem:[%s4975_s11 + $0xa0] sm:$0xff] %v439_v20  ;;  %v525_v63 = vld [vmem:[%s4970_s10 + $0x378] sm:$0xff]  ;;  %v527_v0 = vld [vmem:[%s4970_s10 + $0x400] sm:$0xff]  ;;  %v529_v1 = vld [vmem:[%s4970_s10 + $0x408] sm:$0xff] }
  0x25   : > { %442 = vst [vmem:[%s4975_s11 + $0xa8] sm:$0xff] %v441_v21  ;;  %v531_v2 = vld [vmem:[%s4970_s10 + $0x410] sm:$0xff]  ;;  %v533_v3 = vld [vmem:[%s4970_s10 + $0x418] sm:$0xff]  ;;  %v535_v4 = vld [vmem:[%s4970_s10 + $0x420] sm:$0xff] }
  0x26   : > { %444 = vst [vmem:[%s4975_s11 + $0xb0] sm:$0xff] %v443_v22  ;;  %v537_v5 = vld [vmem:[%s4970_s10 + $0x428] sm:$0xff]  ;;  %v539_v6 = vld [vmem:[%s4970_s10 + $0x430] sm:$0xff]  ;;  %v541_v7 = vld [vmem:[%s4970_s10 + $0x438] sm:$0xff] }
  0x27   : > { %446 = vst [vmem:[%s4975_s11 + $0xb8] sm:$0xff] %v445_v23  ;;  %v543_v8 = vld [vmem:[%s4970_s10 + $0x440] sm:$0xff]  ;;  %v545_v9 = vld [vmem:[%s4970_s10 + $0x448] sm:$0xff]  ;;  %v547_v10 = vld [vmem:[%s4970_s10 + $0x450] sm:$0xff] }
  0x28   : > { %448 = vst [vmem:[%s4975_s11 + $0xc0] sm:$0xff] %v447_v24  ;;  %v549_v11 = vld [vmem:[%s4970_s10 + $0x458] sm:$0xff]  ;;  %v551_v12 = vld [vmem:[%s4970_s10 + $0x460] sm:$0xff]  ;;  %v553_v13 = vld [vmem:[%s4970_s10 + $0x468] sm:$0xff] }
  0x29   : > { %450 = vst [vmem:[%s4975_s11 + $0xc8] sm:$0xff] %v449_v25  ;;  %v555_v14 = vld [vmem:[%s4970_s10 + $0x470] sm:$0xff]  ;;  %v557_v15 = vld [vmem:[%s4970_s10 + $0x478] sm:$0xff] }
  0x2a   : > { %452 = vst [vmem:[%s4975_s11 + $0xd0] sm:$0xff] %v451_v26 }
  0x2b   : > { %454 = vst [vmem:[%s4975_s11 + $0xd8] sm:$0xff] %v453_v27 }
  0x2c   : > { %456 = vst [vmem:[%s4975_s11 + $0xe0] sm:$0xff] %v455_v28 }
  0x2d   : > { %458 = vst [vmem:[%s4975_s11 + $0xe8] sm:$0xff] %v457_v29 }
  0x2e   : > { %460 = vst [vmem:[%s4975_s11 + $0xf0] sm:$0xff] %v459_v30 }
  0x2f   : > { %462 = vst [vmem:[%s4975_s11 + $0xf8] sm:$0xff] %v461_v31 }
  0x30   : > { %464 = vst [vmem:[%s4975_s11 + $0x100] sm:$0xff] %v463_v32 }
  0x31   : > { %466 = vst [vmem:[%s4975_s11 + $0x108] sm:$0xff] %v465_v33 }
  0x32   : > { %468 = vst [vmem:[%s4975_s11 + $0x110] sm:$0xff] %v467_v34 }
  0x33   : > { %470 = vst [vmem:[%s4975_s11 + $0x118] sm:$0xff] %v469_v35 }
  0x34   : > { %472 = vst [vmem:[%s4975_s11 + $0x120] sm:$0xff] %v471_v36 }
  0x35   : > { %474 = vst [vmem:[%s4975_s11 + $0x128] sm:$0xff] %v473_v37 }
  0x36   : > { %476 = vst [vmem:[%s4975_s11 + $0x130] sm:$0xff] %v475_v38 }
  0x37   : > { %478 = vst [vmem:[%s4975_s11 + $0x138] sm:$0xff] %v477_v39 }
  0x38   : > { %480 = vst [vmem:[%s4975_s11 + $0x140] sm:$0xff] %v479_v40 }
  0x39   : > { %482 = vst [vmem:[%s4975_s11 + $0x148] sm:$0xff] %v481_v41 }
  0x3a   : > { %484 = vst [vmem:[%s4975_s11 + $0x150] sm:$0xff] %v483_v42 }
  0x3b   : > { %486 = vst [vmem:[%s4975_s11 + $0x158] sm:$0xff] %v485_v43 }
  0x3c   : > { %488 = vst [vmem:[%s4975_s11 + $0x160] sm:$0xff] %v487_v44 }
  0x3d   : > { %490 = vst [vmem:[%s4975_s11 + $0x168] sm:$0xff] %v489_v45 }
  0x3e   : > { %492 = vst [vmem:[%s4975_s11 + $0x170] sm:$0xff] %v491_v46 }
  0x3f   : > { %494 = vst [vmem:[%s4975_s11 + $0x178] sm:$0xff] %v493_v47 }
  0x40   : > { %496 = vst [vmem:[%s4975_s11 + $0x180] sm:$0xff] %v495_v48 }
  0x41   : > { %498 = vst [vmem:[%s4975_s11 + $0x188] sm:$0xff] %v497_v49 }
  0x42   : > { %500 = vst [vmem:[%s4975_s11 + $0x190] sm:$0xff] %v499_v50 }
  0x43   : > { %502 = vst [vmem:[%s4975_s11 + $0x198] sm:$0xff] %v501_v51 }
  0x44   : > { %504 = vst [vmem:[%s4975_s11 + $0x1a0] sm:$0xff] %v503_v52 }
  0x45   : > { %506 = vst [vmem:[%s4975_s11 + $0x1a8] sm:$0xff] %v505_v53 }
  0x46   : > { %508 = vst [vmem:[%s4975_s11 + $0x1b0] sm:$0xff] %v507_v54 }
  0x47   : > { %510 = vst [vmem:[%s4975_s11 + $0x1b8] sm:$0xff] %v509_v55 }
  0x48   : > { %512 = vst [vmem:[%s4975_s11 + $0x1c0] sm:$0xff] %v511_v56 }
  0x49   : > { %514 = vst [vmem:[%s4975_s11 + $0x1c8] sm:$0xff] %v513_v57 }
  0x4a   : > { %516 = vst [vmem:[%s4975_s11 + $0x1d0] sm:$0xff] %v515_v58 }
  0x4b   : > { %518 = vst [vmem:[%s4975_s11 + $0x1d8] sm:$0xff] %v517_v59 }
  0x4c   : > { %520 = vst [vmem:[%s4975_s11 + $0x1e0] sm:$0xff] %v519_v60 }
  0x4d   : > { %522 = vst [vmem:[%s4975_s11 + $0x1e8] sm:$0xff] %v521_v61 }
  0x4e   : > { %524 = vst [vmem:[%s4975_s11 + $0x1f0] sm:$0xff] %v523_v62 }
  0x4f   : > { %526 = vst [vmem:[%s4975_s11 + $0x1f8] sm:$0xff] %v525_v63 }
  0x50   : > { %528 = vst [vmem:[%s4975_s11 + $0x200] sm:$0xff] %v527_v0 }
  0x51   : > { %530 = vst [vmem:[%s4975_s11 + $0x208] sm:$0xff] %v529_v1 }
  0x52   : > { %532 = vst [vmem:[%s4975_s11 + $0x210] sm:$0xff] %v531_v2 }
  0x53   : > { %534 = vst [vmem:[%s4975_s11 + $0x218] sm:$0xff] %v533_v3 }
  0x54   : > { %536 = vst [vmem:[%s4975_s11 + $0x220] sm:$0xff] %v535_v4 }
  0x55   : > { %538 = vst [vmem:[%s4975_s11 + $0x228] sm:$0xff] %v537_v5 }
  0x56   : > { %540 = vst [vmem:[%s4975_s11 + $0x230] sm:$0xff] %v539_v6 }
  0x57   : > { %542 = vst [vmem:[%s4975_s11 + $0x238] sm:$0xff] %v541_v7 }
  0x58   : > { %544 = vst [vmem:[%s4975_s11 + $0x240] sm:$0xff] %v543_v8 }
  0x59   : > { %546 = vst [vmem:[%s4975_s11 + $0x248] sm:$0xff] %v545_v9 }
  0x5a   : > { %548 = vst [vmem:[%s4975_s11 + $0x250] sm:$0xff] %v547_v10 }
  0x5b   : > { %550 = vst [vmem:[%s4975_s11 + $0x258] sm:$0xff] %v549_v11 }
  0x5c   : > { %552 = vst [vmem:[%s4975_s11 + $0x260] sm:$0xff] %v551_v12 }
  0x5d   : > { %554 = vst [vmem:[%s4975_s11 + $0x268] sm:$0xff] %v553_v13 }
  0x5e   : > { %556 = vst [vmem:[%s4975_s11 + $0x270] sm:$0xff] %v555_v14 }
  0x5f   : > { %558 = vst [vmem:[%s4975_s11 + $0x278] sm:$0xff] %v557_v15 }
  0x60 PF: > { %p3933_p5 = scmp.ge.s32.totalorder %s4897_s23, 1  ;;  %p563_p6 = scmp.lt.s32.totalorder %s4897_s23, 3 }
  0x62   : > { %p564_p7 = pnand %p3933_p5, %p563_p6 }
  0x64   : > { %567 = sbr.rel (%p564_p7) target bundleno = 1212 (0x4bc), region = 78 }
  0x69   : > { %s570_s12 = sand.u32 1, %s4889_s21   ;;  %v4899_v16 = vmov 0   ;;  %v5163_v38 = vld [vmem:[%s6793_s1 + $0x38] sm:$0xff]  ;;  %v5169_v39 = vld [vmem:[%s6793_s1 + $0x30] sm:$0xff]  ;;  %v4695_v43 = vld [vmem:[%s6793_s1 + $0x28] sm:$0xff]  ;;  %v6799_v61 = vlaneseq  ;;  %p599_p8 = scmp.lt.s32.totalorder %s3927_s24, 1 }
  0x6a   : > { %4872 = vset.pattern.permute.xlu2 %v4899_v16  ;;  %4871 = vset.pattern.permute.xlu1 %v4899_v16  ;;  %s4843_s13 = smul.u32 640, %s570_s12  ;;  %v4694_v44 = vld [vmem:[%s6793_s1 + $0x20] sm:$0xff]  ;;  %v4693_v48 = vld [vmem:[%s6793_s1 + $0x18] sm:$0xff]  ;;  %v4692_v51 = vld [vmem:[%s6793_s1 + $0x10] sm:$0xff]  ;;  %v4900_v7 = vmov 1.0|1.0  }
  0x6b   : > { %4870 = vset.pattern.permute.xlu0 %v4899_v16  ;;  %773 = vmatpush.bf16.msra.mxu0 %v5163_v38  ;;  %v4691_v53 = vld [vmem:[%s6793_s1 + $0x8] sm:$0xff]  ;;  %v4690_v54 = vld [vmem:[%s6793_s1] sm:$0xff]  ;;  %v5216_v1 = vand.u32 127, %v6799_v61  ;;  %s6870_s24 = smov (!%p599_p8, %s3927_s24), 1 }
  0x6c   : > { %s5137_s14 = scalar_lea.vmem [#allocation2], %s4843_s13  ;;  %943 = vmatpush.bf16.msra.mxu1 %v5163_v38  ;;  %1113 = vmatpush.bf16.msra.mxu2 %v5163_v38  ;;  %s3934_s17 = sshll.u32 %s6870_s24, 3 }
  0x6d   : > { %v4015_v17 = vld [vmem:[%s5137_s14 + $0x100] sm:$0xff]  ;;  %v4016_v20 = vld [vmem:[%s5137_s14 + $0x108] sm:$0xff]  ;;  %v4017_v23 = vld [vmem:[%s5137_s14 + $0x110] sm:$0xff]  ;;  %1283 = vmatpush.bf16.msra.mxu3 %v5163_v38  ;;  %s602_s20 = scalar_lea.vmem %s6798_s6, %s3934_s17 }
  0x6e   : > { %v3983_v18 = vld [vmem:[%s5137_s14 + $0x80] sm:$0xff]  ;;  %1026 = vperm.xlu0 %4870, %v4015_v17   ;;  %v3984_v21 = vld [vmem:[%s5137_s14 + $0x88] sm:$0xff]  ;;  %v4018_v24 = vld [vmem:[%s5137_s14 + $0x118] sm:$0xff] }
  0x6f   : > { %v621_v19 = vld [vmem:[%s5137_s14] sm:$0xff]  ;;  %856 = vperm.xlu1 %4871, %v3983_v18   ;;  %v622_v22 = vld [vmem:[%s5137_s14 + $0x8] sm:$0xff]  ;;  %v3985_v27 = vld [vmem:[%s5137_s14 + $0x90] sm:$0xff]  ;;  %774 = vmatpush.bf16.msra.mxu0 %v5169_v39 }
  0x70   : > { %638 = vperm.xlu2 %4872, %v621_v19   ;;  %v4047_v25 = vld [vmem:[%s5137_s14 + $0x180] sm:$0xff]  ;;  %v4048_v26 = vld [vmem:[%s5137_s14 + $0x188] sm:$0xff]  ;;  %v3986_v28 = vld [vmem:[%s5137_s14 + $0x98] sm:$0xff]  ;;  %944 = vmatpush.bf16.msra.mxu1 %v5169_v39 }
  0x71   : > { %v624_v29 = vld [vmem:[%s5137_s14 + $0x18] sm:$0xff]  ;;  %v623_v30 = vld [vmem:[%s5137_s14 + $0x10] sm:$0xff]  ;;  %v4019_v31 = vld [vmem:[%s5137_s14 + $0x120] sm:$0xff]  ;;  %1114 = vmatpush.bf16.msra.mxu2 %v5169_v39  ;;  %1284 = vmatpush.bf16.msra.mxu3 %v5169_v39 }
  0x72   : > { %v4049_v32 = vld [vmem:[%s5137_s14 + $0x190] sm:$0xff]  ;;  %v4020_v33 = vld [vmem:[%s5137_s14 + $0x128] sm:$0xff]  ;;  %v4050_v34 = vld [vmem:[%s5137_s14 + $0x198] sm:$0xff] }
  0x73   : > { %v3988_v35 = vld [vmem:[%s5137_s14 + $0xa8] sm:$0xff]  ;;  %v3987_v36 = vld [vmem:[%s5137_s14 + $0xa0] sm:$0xff]  ;;  %v4021_v40 = vld [vmem:[%s5137_s14 + $0x130] sm:$0xff]  ;;  %775 = vmatpush.bf16.msra.mxu0 %v4695_v43 }
  0x74   : > { %v625_v37 = vld [vmem:[%s5137_s14 + $0x20] sm:$0xff]  ;;  %v626_v41 = vld [vmem:[%s5137_s14 + $0x28] sm:$0xff]  ;;  %v4022_v42 = vld [vmem:[%s5137_s14 + $0x138] sm:$0xff]  ;;  %945 = vmatpush.bf16.msra.mxu1 %v4695_v43 }
  0x75   : > { %v4052_v45 = vld [vmem:[%s5137_s14 + $0x1a8] sm:$0xff]  ;;  %v4051_v46 = vld [vmem:[%s5137_s14 + $0x1a0] sm:$0xff]  ;;  %1115 = vmatpush.bf16.msra.mxu2 %v4695_v43  ;;  %v3989_v47 = vld [vmem:[%s5137_s14 + $0xb0] sm:$0xff]  ;;  %1285 = vmatpush.bf16.msra.mxu3 %v4695_v43 }
  0x76   : > { %1029 = vperm.xlu0 %4870, %v4016_v20   ;;  %v627_v49 = vld [vmem:[%s5137_s14 + $0x30] sm:$0xff]  ;;  %v3990_v50 = vld [vmem:[%s5137_s14 + $0xb8] sm:$0xff]  ;;  %v4024_v55 = vld [vmem:[%s5137_s14 + $0x148] sm:$0xff] }
  0x77   : > { %859 = vperm.xlu1 %4871, %v3984_v21   ;;  %776 = vmatpush.bf16.msra.mxu0 %v4694_v44  ;;  %v628_v52 = vld [vmem:[%s5137_s14 + $0x38] sm:$0xff]  ;;  %v4023_v56 = vld [vmem:[%s5137_s14 + $0x140] sm:$0xff]  ;;  %v4053_v57 = vld [vmem:[%s5137_s14 + $0x1b0] sm:$0xff] }
  0x78   : > { %641 = vperm.xlu2 %4872, %v622_v22   ;;  %946 = vmatpush.bf16.msra.mxu1 %v4694_v44  ;;  %v3991_v58 = vld [vmem:[%s5137_s14 + $0xc0] sm:$0xff]  ;;  %v4054_v59 = vld [vmem:[%s5137_s14 + $0x1b8] sm:$0xff]  ;;  %v3992_v60 = vld [vmem:[%s5137_s14 + $0xc8] sm:$0xff] }
  0x79   : > { %1116 = vmatpush.bf16.msra.mxu2 %v4694_v44  ;;  %1286 = vmatpush.bf16.msra.mxu3 %v4694_v44  ;;  %v630_v63 = vld [vmem:[%s5137_s14 + $0x48] sm:$0xff]  ;;  %v629_v0 = vld [vmem:[%s5137_s14 + $0x40] sm:$0xff]  ;;  %v4025_v2 = vld [vmem:[%s5137_s14 + $0x150] sm:$0xff] }
  0x7a   : > { %v4055_v4 = vld [vmem:[%s5137_s14 + $0x1c0] sm:$0xff]  ;;  %v4026_v5 = vld [vmem:[%s5137_s14 + $0x158] sm:$0xff]  ;;  %v4056_v6 = vld [vmem:[%s5137_s14 + $0x1c8] sm:$0xff] }
  0x7b   : > { %777 = vmatpush.bf16.msra.mxu0 %v4693_v48  ;;  %v3994_v9 = vld [vmem:[%s5137_s14 + $0xd8] sm:$0xff]  ;;  %v3993_v10 = vld [vmem:[%s5137_s14 + $0xd0] sm:$0xff]  ;;  %v4027_v15 = vld [vmem:[%s5137_s14 + $0x160] sm:$0xff] }
  0x7c   : > { %947 = vmatpush.bf16.msra.mxu1 %v4693_v48  ;;  %v631_v11 = vld [vmem:[%s5137_s14 + $0x50] sm:$0xff]  ;;  %v632_v16 = vld [vmem:[%s5137_s14 + $0x58] sm:$0xff]  ;;  %v4028_v17 = vld [vmem:[%s5137_s14 + $0x168] sm:$0xff] }
  0x7d   : > { %1117 = vmatpush.bf16.msra.mxu2 %v4693_v48  ;;  %1287 = vmatpush.bf16.msra.mxu3 %v4693_v48  ;;  %v4058_v21 = vld [vmem:[%s5137_s14 + $0x1d8] sm:$0xff]  ;;  %v4057_v22 = vld [vmem:[%s5137_s14 + $0x1d0] sm:$0xff] }
  0x7e   : > { %1032 = vperm.xlu0 %4870, %v4017_v23   ;;  %v3995_v23 = vld [vmem:[%s5137_s14 + $0xe0] sm:$0xff] }
  0x7f   : > { %1035 = vperm.xlu1 %4871, %v4018_v24   ;;  %778 = vmatpush.bf16.msra.mxu0 %v4692_v51 }
  0x80   : > { %1196 = vperm.xlu2 %4872, %v4047_v25   ;;  %948 = vmatpush.bf16.msra.mxu1 %v4692_v51 }
  0x81   : > { %1118 = vmatpush.bf16.msra.mxu2 %v4692_v51  ;;  %1288 = vmatpush.bf16.msra.mxu3 %v4692_v51 }
  0x83   : > { %779 = vmatpush.bf16.msra.mxu0 %v4691_v53 }
  0x84   : > { %949 = vmatpush.bf16.msra.mxu1 %v4691_v53 }
  0x85   : > { %1119 = vmatpush.bf16.msra.mxu2 %v4691_v53  ;;  %1289 = vmatpush.bf16.msra.mxu3 %v4691_v53 }
  0x86   : > { %1199 = vperm.xlu0 %4870, %v4048_v26  }
  0x87   : > { %862 = vperm.xlu1 %4871, %v3985_v27   ;;  %780 = vmatpush.bf16.msra.mxu0 %v4690_v54  ;;  %v633_v27 = vld [vmem:[%s5137_s14 + $0x60] sm:$0xff] }
  0x88   : > { %865 = vperm.xlu2 %4872, %v3986_v28   ;;  %950 = vmatpush.bf16.msra.mxu1 %v4690_v54  ;;  %v3996_v28 = vld [vmem:[%s5137_s14 + $0xe8] sm:$0xff] }
  0x89   : > { %1120 = vmatpush.bf16.msra.mxu2 %v4690_v54  ;;  %1290 = vmatpush.bf16.msra.mxu3 %v4690_v54 }
  0x8b   : > { %1453 = vmatpush.bf16.msrb.mxu0 %v5163_v38  ;;  %v4389_v38 = vld [vmem:[%s6794_s2 + $0x228] sm:$0xf] }
  0x8e   : > { %644 = vperm.xlu0 %4870, %v623_v30  }
  0x8f   : > { %647 = vperm.xlu1 %4871, %v624_v29   ;;  %1454 = vmatpush.bf16.msrb.mxu0 %v5169_v39  ;;  %v634_v29 = vld [vmem:[%s5137_s14 + $0x68] sm:$0xff] }
  0x90   : > { %1038 = vperm.xlu2 %4872, %v4019_v31  }
  0x93   : > { %1455 = vmatpush.bf16.msrb.mxu0 %v4695_v43  ;;  %v4720_v43 = vld [vmem:[%s6794_s2 + $0xb0] sm:$0xf0] }
  0x96   : > { %1041 = vperm.xlu0 %4870, %v4020_v33   ;;  %v4030_v33 = vld [vmem:[%s5137_s14 + $0x178] sm:$0xff] }
  0x97   : > { %1202 = vperm.xlu1 %4871, %v4049_v32   ;;  %1456 = vmatpush.bf16.msrb.mxu0 %v4694_v44 }
  0x98   : > { %1205 = vperm.xlu2 %4872, %v4050_v34   ;;  %v4029_v34 = vld [vmem:[%s5137_s14 + $0x170] sm:$0xff] }
  0x9b   : > { %1457 = vmatpush.bf16.msrb.mxu0 %v4693_v48  ;;  %v3997_v48 = vld [vmem:[%s5137_s14 + $0xf0] sm:$0xff] }
  0x9e   : > { %868 = vperm.xlu0 %4870, %v3987_v36   ;;  %v4293_v36 = vld [vmem:[%s6794_s2 + $0x168] sm:$0xf] }
  0x9f   : > { %871 = vperm.xlu1 %4871, %v3988_v35   ;;  %1458 = vmatpush.bf16.msrb.mxu0 %v4692_v51  ;;  %v4059_v35 = vld [vmem:[%s5137_s14 + $0x1e0] sm:$0xff] }
  0xa0   : > { %650 = vperm.xlu2 %4872, %v625_v37   ;;  %v4744_v37 = vld [vmem:[%s6794_s2 + $0x170] sm:$0xf0] }
  0xa1   : > { %v4294_v39 = vor.u32 %v4744_v37, %v4293_v36  ;;  %v4089_v36 = vld [vmem:[%s5137_s14 + $0x250] sm:$0xff]  ;;  %v4257_v37 = vld [vmem:[%s6794_s2 + $0x120] sm:$0xf] }
  0xa3   : > { %1459 = vmatpush.bf16.msrb.mxu0 %v4691_v53  ;;  %2615 = vmatpush.bf16.msrb.mxu2 %v4294_v39  ;;  %v4353_v39 = vld [vmem:[%s6794_s2 + $0x1e0] sm:$0xf] }
  0xa6   : > { %653 = vperm.xlu0 %4870, %v626_v41  }
  0xa7   : > { %1044 = vperm.xlu1 %4871, %v4021_v40   ;;  %1460 = vmatpush.bf16.msrb.mxu0 %v4690_v54  ;;  %v4768_v40 = vld [vmem:[%s6794_s2 + $0x230] sm:$0xf0]  ;;  %v636_v54 = vld [vmem:[%s5137_s14 + $0x78] sm:$0xff] }
  0xa8   : > { %1047 = vperm.xlu2 %4872, %v4022_v42   ;;  %v4390_v41 = vor.u32 %v4768_v40, %v4389_v38  ;;  %v4197_v42 = vld [vmem:[%s6794_s2 + $0xa8] sm:$0xf]  ;;  %v4735_v38 = vld [vmem:[%s6794_s2 + $0x128] sm:$0xf0] }
  0xa9   : > { %v4258_v40 = vor.u32 %v4735_v38, %v4257_v37  ;;  %v4702_v37 = vld [vmem:[%s6794_s2 + $0x20] sm:$0xf0] }
  0xaa   : > { %2664 = vmatpush.bf16.msrb.mxu3 %v4390_v41  ;;  %v4759_v41 = vld [vmem:[%s6794_s2 + $0x1e8] sm:$0xf0] }
  0xae   : > { %1208 = vperm.xlu0 %4870, %v4051_v46   ;;  %v4198_v46 = vor.u32 %v4720_v43, %v4197_v42  ;;  %v4161_v42 = vld [vmem:[%s6794_s2 + $0x60] sm:$0xf]  ;;  %v4711_v43 = vld [vmem:[%s6794_s2 + $0x68] sm:$0xf0] }
  0xaf   : > { %1211 = vperm.xlu1 %4871, %v4052_v45  }
  0xb0   : > { %874 = vperm.xlu2 %4872, %v3989_v47   ;;  %2566 = vmatpush.bf16.msrb.mxu1 %v4198_v46 }
  0xb6   : > { %877 = vperm.xlu0 %4870, %v3990_v50   ;;  %v3998_v50 = vld [vmem:[%s5137_s14 + $0xf8] sm:$0xff] }
  0xb7   : > { %656 = vperm.xlu1 %4871, %v627_v49   ;;  %v4060_v49 = vld [vmem:[%s5137_s14 + $0x1e8] sm:$0xff] }
  0xb8   : > { %659 = vperm.xlu2 %4872, %v628_v52  }
  0xbe   : > { %1050 = vperm.xlu0 %4870, %v4023_v56   ;;  %v4061_v56 = vld [vmem:[%s5137_s14 + $0x1f0] sm:$0xff] }
  0xbf   : > { %1053 = vperm.xlu1 %4871, %v4024_v55   ;;  %v635_v55 = vld [vmem:[%s5137_s14 + $0x70] sm:$0xff] }
  0xc0   : > { %1214 = vperm.xlu2 %4872, %v4053_v57   ;;  %v4281_v57 = vld [vmem:[%s6794_s2 + $0x150] sm:$0xf] }
  0xc6   : > { %1217 = vperm.xlu0 %4870, %v4054_v59   ;;  %v4377_v59 = vld [vmem:[%s6794_s2 + $0x210] sm:$0xf] }
  0xc7   : > { %880 = vperm.xlu1 %4871, %v3991_v58   ;;  %v4741_v58 = vld [vmem:[%s6794_s2 + $0x158] sm:$0xf0] }
  0xc8   : > { %883 = vperm.xlu2 %4872, %v3992_v60   ;;  %v4282_v60 = vor.u32 %v4741_v58, %v4281_v57  ;;  %v4245_v57 = vld [vmem:[%s6794_s2 + $0x108] sm:$0xf]  ;;  %v4732_v58 = vld [vmem:[%s6794_s2 + $0x110] sm:$0xf0] }
  0xca   : > { %v639_v62 = vpop.permute.xlu2 %638  ;;  %2616 = vmatpush.bf16.msrb.mxu2 %v4282_v60  ;;  %v4246_v60 = vor.u32 %v4732_v58, %v4245_v57 }
  0xcb   : > { %vm685_vm0 = vcmp.eq.s32.totalorder %v639_v62, %v5216_v1  ;;  %v4765_v62 = vld [vmem:[%s6794_s2 + $0x218] sm:$0xf0] }
  0xce   : > { %662 = vperm.xlu0 %4870, %v629_v0   ;;  %v4185_v0 = vld [vmem:[%s6794_s2 + $0x90] sm:$0xf] }
  0xcf   : > { %665 = vperm.xlu1 %4871, %v630_v63   ;;  %v4378_v63 = vor.u32 %v4765_v62, %v4377_v59  ;;  %v4341_v59 = vld [vmem:[%s6794_s2 + $0x1c8] sm:$0xf]  ;;  %v4756_v62 = vld [vmem:[%s6794_s2 + $0x1d0] sm:$0xf0] }
  0xd0   : > { %1056 = vperm.xlu2 %4872, %v4025_v2   ;;  %v4717_v2 = vld [vmem:[%s6794_s2 + $0x98] sm:$0xf0] }
  0xd1   : > { %2665 = vmatpush.bf16.msrb.mxu3 %v4378_v63  ;;  %v4149_v63 = vld [vmem:[%s6794_s2 + $0x48] sm:$0xf] }
  0xd2   : > { %v642_v3 = vpop.permute.xlu2 %641 }
  0xd3   : > { %vm686_vm1 = vcmp.eq.s32.totalorder %v642_v3, %v5216_v1 }
  0xd4   : > { %vm3967_vm2 = vmpackc.low %vm686_vm1, %vm685_vm0 }
  0xd5   : > { %3968 = vmatmul.msk.bf16.vlgmr.msra.gmra.mxu0 %vm3967_vm2, %v4900_v7 }
  0xd6   : > { %1059 = vperm.xlu0 %4870, %v4026_v5   ;;  %v4186_v5 = vor.u32 %v4717_v2, %v4185_v0  ;;  %v4708_v0 = vld [vmem:[%s6794_s2 + $0x50] sm:$0xf0]  ;;  %v4342_v2 = vor.u32 %v4756_v62, %v4341_v59 }
  0xd7   : > { %1220 = vperm.xlu1 %4871, %v4055_v4  }
  0xd8   : > { %1223 = vperm.xlu2 %4872, %v4056_v6   ;;  %2567 = vmatpush.bf16.msrb.mxu1 %v4186_v5 }
  0xda   : > { %v1197_v8 = vpop.permute.xlu2 %1196 }
  0xdb   : > { %vm1243_vm11 = vcmp.eq.s32.totalorder %v1197_v8, %v5216_v1  ;;  %v4079_v8 = vld [vmem:[%s5137_s14 + $0x200] sm:$0xff] }
  0xde   : > { %886 = vperm.xlu0 %4870, %v3993_v10   ;;  %v4080_v10 = vld [vmem:[%s5137_s14 + $0x208] sm:$0xff] }
  0xdf   : > { %889 = vperm.xlu1 %4871, %v3994_v9   ;;  %v4062_v9 = vld [vmem:[%s5137_s14 + $0x1f8] sm:$0xff] }
  0xe0   : > { %668 = vperm.xlu2 %4872, %v631_v11   ;;  %v1027_v12 = vpop.permute.xlu0 %1026 }
  0xe1   : > { %v857_v13 = vpop.permute.xlu1 %856  ;;  %vm1073_vm3 = vcmp.eq.s32.totalorder %v1027_v12, %v5216_v1 }
  0xe2   : > { %v866_v14 = vpop.permute.xlu2 %865  ;;  %vm903_vm6 = vcmp.eq.s32.totalorder %v857_v13, %v5216_v1  ;;  %v4082_v13 = vld [vmem:[%s5137_s14 + $0x218] sm:$0xff] }
  0xe3   : > { %vm906_vm15 = vcmp.eq.s32.totalorder %v866_v14, %v5216_v1 }
  0xe6   : > { %671 = vperm.xlu0 %4870, %v632_v16   ;;  %v4083_v16 = vld [vmem:[%s5137_s14 + $0x220] sm:$0xff] }
  0xe7   : > { %1062 = vperm.xlu1 %4871, %v4027_v15   ;;  %v4081_v15 = vld [vmem:[%s5137_s14 + $0x210] sm:$0xff] }
  0xe8   : > { %1065 = vperm.xlu2 %4872, %v4028_v17   ;;  %v1030_v18 = vpop.permute.xlu0 %1029  ;;  %v4269_v17 = vld [vmem:[%s6794_s2 + $0x138] sm:$0xf] }
  0xe9   : > { %v860_v19 = vpop.permute.xlu1 %859  ;;  %vm1074_vm4 = vcmp.eq.s32.totalorder %v1030_v18, %v5216_v1  ;;  %v4738_v18 = vld [vmem:[%s6794_s2 + $0x140] sm:$0xf0] }
  0xea   : > { %vm904_vm5 = vcmp.eq.s32.totalorder %v860_v19, %v5216_v1  ;;  %v5234_v20 = vpop.permute.xlu2 %1038  ;;  %vm4031_vm7 = vmpackc.low %vm1074_vm4, %vm1073_vm3  ;;  %v4365_v19 = vld [vmem:[%s6794_s2 + $0x1f8] sm:$0xf] }
  0xeb   : > { %vm3999_vm8 = vmpackc.low %vm904_vm5, %vm903_vm6  ;;  %4032 = vmatmul.msk.bf16.vlgmr.msra.gmra.mxu2 %vm4031_vm7, %v4900_v7 }
  0xec   : > { %4000 = vmatmul.msk.bf16.vlgmr.msra.gmra.mxu1 %vm3999_vm8, %v4900_v7  ;;  %vm1077_vm8 = vcmp.eq.s32.totalorder %v5234_v20, %v5216_v1  ;;  %v4270_v20 = vor.u32 %v4738_v18, %v4269_v17 }
  0xee   : > { %1226 = vperm.xlu0 %4870, %v4057_v22   ;;  %2617 = vmatpush.bf16.msrb.mxu2 %v4270_v20  ;;  %v4705_v20 = vld [vmem:[%s6794_s2 + $0x38] sm:$0xf0] }
  0xef   : > { %1229 = vperm.xlu1 %4871, %v4058_v21   ;;  %v4762_v21 = vld [vmem:[%s6794_s2 + $0x200] sm:$0xf0] }
  0xf0   : > { %892 = vperm.xlu2 %4872, %v3995_v23   ;;  %v1033_v24 = vpop.permute.xlu0 %1032  ;;  %v4366_v22 = vor.u32 %v4762_v21, %v4365_v19  ;;  %v4173_v23 = vld [vmem:[%s6794_s2 + $0x78] sm:$0xf]  ;;  %v4137_v19 = vld [vmem:[%s6794_s2 + $0x30] sm:$0xf] }
  0xf1   : > { %v1036_v25 = vpop.permute.xlu1 %1035  ;;  %vm1075_vm9 = vcmp.eq.s32.totalorder %v1033_v24, %v5216_v1  ;;  %v4714_v24 = vld [vmem:[%s6794_s2 + $0x80] sm:$0xf0]  ;;  %v4138_v21 = vor.u32 %v4705_v20, %v4137_v19  ;;  %v4816_v19 = vld [vmem:[%s6794_s2 + $0x3b0] sm:$0xf0] }
  0xf2   : > { %v1206_v26 = vpop.permute.xlu2 %1205  ;;  %vm1076_vm10 = vcmp.eq.s32.totalorder %v1036_v25, %v5216_v1  ;;  %v4174_v25 = vor.u32 %v4714_v24, %v4173_v23  ;;  %2666 = vmatpush.bf16.msrb.mxu3 %v4366_v22  ;;  %2618 = vmatpush.bf16.msrb.mxu2 %v4258_v40  ;;  %v4113_v40 = vld [vmem:[%s6794_s2] sm:$0xf] }
  0xf3   : > { %vm4033_vm12 = vmpackc.low %vm1076_vm10, %vm1075_vm9  ;;  %vm1246_vm5 = vcmp.eq.s32.totalorder %v1206_v26, %v5216_v1 }
  0xf4   : > { %2568 = vmatpush.bf16.msrb.mxu1 %v4174_v25  ;;  %v4221_v25 = vld [vmem:[%s6794_s2 + $0xd8] sm:$0xf] }
  0xf6   : > { %895 = vperm.xlu0 %4870, %v3996_v28   ;;  %v4085_v28 = vld [vmem:[%s5137_s14 + $0x230] sm:$0xff]  ;;  %2619 = vmatpush.bf16.msrb.mxu2 %v4246_v60 }
  0xf7   : > { %674 = vperm.xlu1 %4871, %v633_v27  }
  0xf8   : > { %677 = vperm.xlu2 %4872, %v634_v29   ;;  %v1200_v30 = vpop.permute.xlu0 %1199  ;;  %v4084_v29 = vld [vmem:[%s5137_s14 + $0x228] sm:$0xff] }
  0xf9   : > { %v863_v31 = vpop.permute.xlu1 %862  ;;  %vm1244_vm13 = vcmp.eq.s32.totalorder %v1200_v30, %v5216_v1  ;;  %v4086_v30 = vld [vmem:[%s5137_s14 + $0x238] sm:$0xff] }
  0xfa   : > { %vm905_vm14 = vcmp.eq.s32.totalorder %v863_v31, %v5216_v1  ;;  %v5250_v32 = vpop.permute.xlu2 %650  ;;  %vm4063_vm0 = vmpackc.low %vm1244_vm13, %vm1243_vm11 }
  0xfb   : > { %vm4001_vm1 = vmpackc.low %vm906_vm15, %vm905_vm14  ;;  %4034 = vmatmul.msk.bf16.gmra.mxu2 %vm4033_vm12, %v4900_v7  ;;  %4064 = vmatmul.msk.bf16.vlgmr.msra.gmra.mxu3 %vm4063_vm0, %v4900_v7 }
  0xfc   : > { %4002 = vmatmul.msk.bf16.gmra.mxu1 %vm4001_vm1, %v4900_v7  ;;  %vm689_vm1 = vcmp.eq.s32.totalorder %v5250_v32, %v5216_v1 }
  0xfe   : > { %1068 = vperm.xlu0 %4870, %v4029_v34   ;;  %v4088_v34 = vld [vmem:[%s5137_s14 + $0x248] sm:$0xff] }
  0xff   : > { %1071 = vperm.xlu1 %4871, %v4030_v33  }
 0x100   : > { %1232 = vperm.xlu2 %4872, %v4059_v35   ;;  %v645_v45 = vpop.permute.xlu0 %644  ;;  %v4087_v35 = vld [vmem:[%s5137_s14 + $0x240] sm:$0xff] }
 0x101   : > { %v648_v44 = vpop.permute.xlu1 %647  ;;  %vm687_vm3 = vcmp.eq.s32.totalorder %v645_v45, %v5216_v1  ;;  %v4162_v45 = vor.u32 %v4711_v43, %v4161_v42 }
 0x102   : > { %vm688_vm2 = vcmp.eq.s32.totalorder %v648_v44, %v5216_v1  ;;  %v1048_v47 = vpop.permute.xlu2 %1047  ;;  %v4354_v44 = vor.u32 %v4759_v41, %v4353_v39  ;;  %v4699_v41 = vld [vmem:[%s6794_s2 + $0x8] sm:$0xf0] }
 0x103   : > { %vm3969_vm4 = vmpackc.low %vm688_vm2, %vm687_vm3  ;;  %vm1080_vm14 = vcmp.eq.s32.totalorder %v1048_v47, %v5216_v1  ;;  %2569 = vmatpush.bf16.msrb.mxu1 %v4162_v45 }
 0x104   : > { %3970 = vmatmul.msk.bf16.gmra.mxu0 %vm3969_vm4, %v4900_v7  ;;  %2667 = vmatpush.bf16.msrb.mxu3 %v4354_v44  ;;  %v4114_v44 = vor.u32 %v4699_v41, %v4113_v40  ;;  %v4283_v40 = vld [vmem:[%s6794_s2 + $0x15c] sm:$0xf0] }
 0x106   : > { %1235 = vperm.xlu0 %4870, %v4060_v49   ;;  %v4091_v49 = vld [vmem:[%s5137_s14 + $0x260] sm:$0xff] }
 0x107   : > { %898 = vperm.xlu1 %4871, %v3997_v48  }
 0x108   : > { %901 = vperm.xlu2 %4872, %v3998_v50   ;;  %v1042_v52 = vpop.permute.xlu0 %1041  ;;  %v4090_v50 = vld [vmem:[%s5137_s14 + $0x258] sm:$0xff]  ;;  %2668 = vmatpush.bf16.msrb.mxu3 %v4342_v2  ;;  %v4485_v2 = vld [vmem:[%s6794_s2 + $0x2e8] sm:$0xf] }
 0x109   : > { %v1203_v51 = vpop.permute.xlu1 %1202  ;;  %vm1078_vm7 = vcmp.eq.s32.totalorder %v1042_v52, %v5216_v1 }
 0x10a   : > { %vm1245_vm6 = vcmp.eq.s32.totalorder %v1203_v51, %v5216_v1  ;;  %v5286_v53 = vpop.permute.xlu2 %874  ;;  %vm4035_vm10 = vmpackc.low %vm1078_vm7, %vm1077_vm8  ;;  %v4092_v51 = vld [vmem:[%s5137_s14 + $0x268] sm:$0xff] }
 0x10b   : > { %vm4065_vm9 = vmpackc.low %vm1246_vm5, %vm1245_vm6  ;;  %4036 = vmatmul.msk.bf16.gmra.mxu2 %vm4035_vm10, %v4900_v7  ;;  %vm909_vm10 = vcmp.eq.s32.totalorder %v5286_v53, %v5216_v1 }
 0x10c   : > { %4066 = vmatmul.msk.bf16.gmra.mxu3 %vm4065_vm9, %v4900_v7 }
 0x10e   : > { %680 = vperm.xlu0 %4870, %v635_v55   ;;  %v4094_v55 = vld [vmem:[%s5137_s14 + $0x278] sm:$0xff] }
 0x10f   : > { %683 = vperm.xlu1 %4871, %v636_v54  }
 0x110   : > { %1238 = vperm.xlu2 %4872, %v4061_v56   ;;  %v869_v4 = vpop.permute.xlu0 %868  ;;  %v4093_v56 = vld [vmem:[%s5137_s14 + $0x270] sm:$0xff] }
 0x111   : > { %v872_v3 = vpop.permute.xlu1 %871  ;;  %vm907_vm12 = vcmp.eq.s32.totalorder %v869_v4, %v5216_v1 }
 0x112   : > { %vm908_vm11 = vcmp.eq.s32.totalorder %v872_v3, %v5216_v1  ;;  %v660_v6 = vpop.permute.xlu2 %659  ;;  %v4150_v3 = vor.u32 %v4708_v0, %v4149_v63  ;;  %v4719_v63 = vld [vmem:[%s6794_s2 + $0xac] sm:$0xf]  ;;  %v4199_v0 = vld [vmem:[%s6794_s2 + $0xb4] sm:$0xf0] }
 0x113   : > { %vm4003_vm13 = vmpackc.low %vm908_vm11, %vm907_vm12  ;;  %vm692_vm7 = vcmp.eq.s32.totalorder %v660_v6, %v5216_v1 }
 0x114   : > { %4004 = vmatmul.msk.bf16.gmra.mxu1 %vm4003_vm13, %v4900_v7 }
 0x115   : > { %2570 = vmatpush.bf16.msrb.mxu1 %v4150_v3 }
 0x116   : > { %1241 = vperm.xlu0 %4870, %v4062_v9  }
 0x117   : > { %1366 = vperm.xlu1 %4871, %v4079_v8  }
 0x118   : > { %1369 = vperm.xlu2 %4872, %v4080_v10   ;;  %v654_v12 = vpop.permute.xlu0 %653  ;;  %v4233_v10 = vld [vmem:[%s6794_s2 + $0xf0] sm:$0xf] }
 0x119   : > { %v1045_v11 = vpop.permute.xlu1 %1044  ;;  %vm690_vm0 = vcmp.eq.s32.totalorder %v654_v12, %v5216_v1  ;;  %v4329_v12 = vld [vmem:[%s6794_s2 + $0x1b0] sm:$0xf]  ;;  %2571 = vmatpush.bf16.msrb.mxu1 %v4138_v21 }
 0x11a   : > { %vm1079_vm15 = vcmp.eq.s32.totalorder %v1045_v11, %v5216_v1  ;;  %vm3971_vm3 = vmpackc.low %vm690_vm0, %vm689_vm1  ;;  %v5325_v14 = vpop.permute.xlu2 %1214  ;;  %v4729_v11 = vld [vmem:[%s6794_s2 + $0xf8] sm:$0xf0] }
 0x11b   : > { %vm4037_vm2 = vmpackc.low %vm1080_vm14, %vm1079_vm15  ;;  %3972 = vmatmul.msk.bf16.gmra.mxu0 %vm3971_vm3, %v4900_v7  ;;  %vm1249_vm3 = vcmp.eq.s32.totalorder %v5325_v14, %v5216_v1  ;;  %v4234_v14 = vor.u32 %v4729_v11, %v4233_v10 }
 0x11c   : > { %4038 = vmatmul.msk.bf16.gmra.mxu2 %vm4037_vm2, %v4900_v7 }
 0x11d   : > { %2620 = vmatpush.bf16.msrb.mxu2 %v4234_v14 }
 0x11e   : > { %1372 = vperm.xlu0 %4870, %v4081_v15   ;;  %v4753_v15 = vld [vmem:[%s6794_s2 + $0x1b8] sm:$0xf0] }
 0x11f   : > { %1375 = vperm.xlu1 %4871, %v4082_v13  }
 0x120   : > { %1378 = vperm.xlu2 %4872, %v4083_v16   ;;  %v1209_v27 = vpop.permute.xlu0 %1208  ;;  %v4330_v16 = vor.u32 %v4753_v15, %v4329_v12 }
 0x121   : > { %v1212_v26 = vpop.permute.xlu1 %1211  ;;  %vm1247_vm5 = vcmp.eq.s32.totalorder %v1209_v27, %v5216_v1 }
 0x122   : > { %vm1248_vm4 = vcmp.eq.s32.totalorder %v1212_v26, %v5216_v1  ;;  %v884_v31 = vpop.permute.xlu2 %883  ;;  %2669 = vmatpush.bf16.msrb.mxu3 %v4330_v16  ;;  %v4726_v26 = vld [vmem:[%s6794_s2 + $0xe0] sm:$0xf0] }
 0x123   : > { %vm4067_vm6 = vmpackc.low %vm1248_vm4, %vm1247_vm5  ;;  %vm912_vm0 = vcmp.eq.s32.totalorder %v884_v31, %v5216_v1  ;;  %v4222_v27 = vor.u32 %v4726_v26, %v4221_v25  ;;  %v4209_v31 = vld [vmem:[%s6794_s2 + $0xc0] sm:$0xf] }
 0x124   : > { %4068 = vmatmul.msk.bf16.gmra.mxu3 %vm4067_vm6, %v4900_v7 }
 0x125   : > { %2621 = vmatpush.bf16.msrb.mxu2 %v4222_v27 }
 0x126   : > { %1381 = vperm.xlu0 %4870, %v4084_v29   ;;  %v4750_v29 = vld [vmem:[%s6794_s2 + $0x1a0] sm:$0xf0] }
 0x127   : > { %1384 = vperm.xlu1 %4871, %v4085_v28   ;;  %v4317_v28 = vld [vmem:[%s6794_s2 + $0x198] sm:$0xf] }
 0x128   : > { %1387 = vperm.xlu2 %4872, %v4086_v30   ;;  %v878_v33 = vpop.permute.xlu0 %877  ;;  %v4318_v30 = vor.u32 %v4750_v29, %v4317_v28 }
 0x129   : > { %v657_v32 = vpop.permute.xlu1 %656  ;;  %vm910_vm9 = vcmp.eq.s32.totalorder %v878_v33, %v5216_v1 }
 0x12a   : > { %vm691_vm8 = vcmp.eq.s32.totalorder %v657_v32, %v5216_v1  ;;  %vm4005_vm12 = vmpackc.low %vm910_vm9, %vm909_vm10  ;;  %v1057_v46 = vpop.permute.xlu2 %1056  ;;  %v4723_v32 = vld [vmem:[%s6794_s2 + $0xc8] sm:$0xf0]  ;;  %2670 = vmatpush.bf16.msrb.mxu3 %v4318_v30 }
 0x12b   : > { %vm3973_vm11 = vmpackc.low %vm692_vm7, %vm691_vm8  ;;  %4006 = vmatmul.msk.bf16.gmra.mxu1 %vm4005_vm12, %v4900_v7  ;;  %vm1083_vm12 = vcmp.eq.s32.totalorder %v1057_v46, %v5216_v1  ;;  %v4210_v33 = vor.u32 %v4723_v32, %v4209_v31 }
 0x12c   : > { %3974 = vmatmul.msk.bf16.gmra.mxu0 %vm3973_vm11, %v4900_v7 }
 0x12d   : > { %2622 = vmatpush.bf16.msrb.mxu2 %v4210_v33  ;;  %v4716_v33 = vld [vmem:[%s6794_s2 + $0x94] sm:$0xf] }
 0x12e   : > { %1390 = vperm.xlu0 %4870, %v4087_v35  }
 0x12f   : > { %1393 = vperm.xlu1 %4871, %v4088_v34  }
 0x130   : > { %1396 = vperm.xlu2 %4872, %v4089_v36   ;;  %v1051_v48 = vpop.permute.xlu0 %1050  ;;  %v4125_v36 = vld [vmem:[%s6794_s2 + $0x18] sm:$0xf] }
 0x131   : > { %v1054_v47 = vpop.permute.xlu1 %1053  ;;  %vm1081_vm14 = vcmp.eq.s32.totalorder %v1051_v48, %v5216_v1  ;;  %v4126_v39 = vor.u32 %v4702_v37, %v4125_v36  ;;  %v4747_v48 = vld [vmem:[%s6794_s2 + $0x188] sm:$0xf0] }
 0x132   : > { %vm1082_vm13 = vcmp.eq.s32.totalorder %v1054_v47, %v5216_v1  ;;  %v1224_v54 = vpop.permute.xlu2 %1223  ;;  %v4305_v47 = vld [vmem:[%s6794_s2 + $0x180] sm:$0xf] }
 0x133   : > { %vm4039_vm15 = vmpackc.low %vm1082_vm13, %vm1081_vm14  ;;  %vm1252_vm9 = vcmp.eq.s32.totalorder %v1224_v54, %v5216_v1  ;;  %2572 = vmatpush.bf16.msrb.mxu1 %v4126_v39  ;;  %v4740_v39 = vld [vmem:[%s6794_s2 + $0x154] sm:$0xf] }
 0x134   : > { %4040 = vmatmul.msk.bf16.gmra.mxu2 %vm4039_vm15, %v4900_v7 }
 0x136   : > { %1399 = vperm.xlu0 %4870, %v4090_v50  }
 0x137   : > { %1402 = vperm.xlu1 %4871, %v4091_v49   ;;  %2573 = vmatpush.bf16.msrb.mxu1 %v4114_v44  ;;  %v4306_v49 = vor.u32 %v4747_v48, %v4305_v47  ;;  %v4286_v44 = vor.u32 %v4740_v39, %v4283_v40 }
 0x138   : > { %1405 = vperm.xlu2 %4872, %v4092_v51   ;;  %v1218_v53 = vpop.permute.xlu0 %1217 }
 0x139   : > { %v881_v52 = vpop.permute.xlu1 %880  ;;  %vm1250_vm2 = vcmp.eq.s32.totalorder %v1218_v53, %v5216_v1  ;;  %2671 = vmatpush.bf16.msrb.mxu3 %v4306_v49 }
 0x13a   : > { %vm911_vm1 = vcmp.eq.s32.totalorder %v881_v52, %v5216_v1  ;;  %vm4069_vm5 = vmpackc.low %vm1250_vm2, %vm1249_vm3  ;;  %v669_v6 = vpop.permute.xlu2 %668 }
 0x13b   : > { %vm4007_vm4 = vmpackc.low %vm912_vm0, %vm911_vm1  ;;  %4070 = vmatmul.msk.bf16.gmra.mxu3 %vm4069_vm5, %v4900_v7  ;;  %vm695_vm5 = vcmp.eq.s32.totalorder %v669_v6, %v5216_v1  ;;  %v4792_v6 = vld [vmem:[%s6794_s2 + $0x2f0] sm:$0xf0] }
 0x13c   : > { %4008 = vmatmul.msk.bf16.gmra.mxu1 %vm4007_vm4, %v4900_v7  ;;  %v4486_v10 = vor.u32 %v4792_v6, %v4485_v2 }
 0x13e   : > { %1408 = vperm.xlu0 %4870, %v4093_v56   ;;  %2713 = vmatpush.bf16.msra.mxu0 %v4486_v10  ;;  %v4713_v10 = vld [vmem:[%s6794_s2 + $0x7c] sm:$0xf] }
 0x13f   : > { %1411 = vperm.xlu1 %4871, %v4094_v55  }
 0x140   : > { %v663_v5 = vpop.permute.xlu0 %662 }
 0x141   : > { %v666_v4 = vpop.permute.xlu1 %665  ;;  %vm693_vm7 = vcmp.eq.s32.totalorder %v663_v5, %v5216_v1  ;;  %v4202_v5 = vor.u32 %v4719_v63, %v4199_v0 }
 0x142   : > { %vm694_vm6 = vcmp.eq.s32.totalorder %v666_v4, %v5216_v1  ;;  %v1066_v13 = vpop.permute.xlu2 %1065 }
 0x143   : > { %vm3975_vm8 = vmpackc.low %vm694_vm6, %vm693_vm7  ;;  %vm1086_vm2 = vcmp.eq.s32.totalorder %v1066_v13, %v5216_v1  ;;  %2811 = vmatpush.bf16.msra.mxu2 %v4202_v5 }
 0x144   : > { %3976 = vmatmul.msk.bf16.gmra.mxu0 %vm3975_vm8, %v4900_v7 }
 0x148   : > { %v1060_v9 = vpop.permute.xlu0 %1059 }
 0x149   : > { %v1221_v8 = vpop.permute.xlu1 %1220  ;;  %vm1084_vm11 = vcmp.eq.s32.totalorder %v1060_v9, %v5216_v1  ;;  %v4295_v9 = vld [vmem:[%s6794_s2 + $0x174] sm:$0xf0] }
 0x14a   : > { %vm1251_vm10 = vcmp.eq.s32.totalorder %v1221_v8, %v5216_v1  ;;  %vm4041_vm14 = vmpackc.low %vm1084_vm11, %vm1083_vm12  ;;  %v893_v22 = vpop.permute.xlu2 %892  ;;  %v4743_v8 = vld [vmem:[%s6794_s2 + $0x16c] sm:$0xf] }
 0x14b   : > { %vm4071_vm13 = vmpackc.low %vm1252_vm9, %vm1251_vm10  ;;  %4042 = vmatmul.msk.bf16.gmra.mxu2 %vm4041_vm14, %v4900_v7  ;;  %vm915_vm14 = vcmp.eq.s32.totalorder %v893_v22, %v5216_v1  ;;  %v4298_v11 = vor.u32 %v4743_v8, %v4295_v9 }
 0x14c   : > { %4072 = vmatmul.msk.bf16.gmra.mxu3 %vm4071_vm13, %v4900_v7 }
 0x14d   : > { %2860 = vmatpush.bf16.msra.mxu3 %v4298_v11  ;;  %v4175_v11 = vld [vmem:[%s6794_s2 + $0x84] sm:$0xf0] }
 0x150   : > { %v887_v18 = vpop.permute.xlu0 %886 }
 0x151   : > { %v890_v17 = vpop.permute.xlu1 %889  ;;  %vm913_vm0 = vcmp.eq.s32.totalorder %v887_v18, %v5216_v1  ;;  %v4581_v18 = vld [vmem:[%s6794_s2 + $0x3a8] sm:$0xf]  ;;  %2861 = vmatpush.bf16.msra.mxu3 %v4286_v44 }
 0x152   : > { %vm914_vm15 = vcmp.eq.s32.totalorder %v890_v17, %v5216_v1  ;;  %v678_v38 = vpop.permute.xlu2 %677  ;;  %v782_v54 = vpop.f32.mrf.mxu0  ;;  %v4582_v20 = vor.u32 %v4816_v19, %v4581_v18  ;;  %v4271_v18 = vld [vmem:[%s6794_s2 + $0x144] sm:$0xf0] }
 0x153   : > { %vm4009_vm1 = vmpackc.low %vm914_vm15, %vm913_vm0  ;;  %vm698_vm11 = vcmp.eq.s32.totalorder %v678_v38, %v5216_v1  ;;  %v822_v16 = vpack.c.bf16 %v782_v54, %v782_v54  ;;  %v4789_v38 = vld [vmem:[%s6794_s2 + $0x2d8] sm:$0xf0] }
 0x154   : > { %4010 = vmatmul.msk.bf16.gmra.mxu1 %vm4009_vm1, %v4900_v7 }
 0x155   : > { %2762 = vmatpush.bf16.msra.mxu1 %v4582_v20 }
 0x158   : > { %v672_v24 = vpop.permute.xlu0 %671 }
 0x159   : > { %v1063_v23 = vpop.permute.xlu1 %1062  ;;  %vm696_vm4 = vcmp.eq.s32.totalorder %v672_v24, %v5216_v1  ;;  %v1534_v24 = vunpack.c.l.b16 %v822_v16  ;;  %v4786_v16 = vld [vmem:[%s6794_s2 + $0x2c0] sm:$0xf0] }
 0x15a   : > { %vm1085_vm3 = vcmp.eq.s32.totalorder %v1063_v23, %v5216_v1  ;;  %vm3977_vm7 = vmpackc.low %vm696_vm4, %vm695_vm5  ;;  %v1233_v46 = vpop.permute.xlu2 %1232  ;;  %v784_v3 = vpop.f32.mrf.mxu0 }
 0x15b   : > { %vm4043_vm6 = vmpackc.low %vm1086_vm2, %vm1085_vm3  ;;  %3978 = vmatmul.msk.bf16.gmra.mxu0 %vm3977_vm7, %v4900_v7  ;;  %vm1255_vm7 = vcmp.eq.s32.totalorder %v1233_v46, %v5216_v1  ;;  %v823_v17 = vpack.c.bf16 %v784_v3, %v784_v3 }
 0x15c   : > { %4044 = vmatmul.msk.bf16.gmra.mxu2 %vm4043_vm6, %v4900_v7 }
 0x15d   : > { %v1535_v25 = vunpack.c.l.b16 %v823_v17  ;;  %v4737_v17 = vld [vmem:[%s6794_s2 + $0x13c] sm:$0xf] }
 0x15e   : > { %v4274_v20 = vor.u32 %v4737_v17, %v4271_v18 }
 0x15f   : > { %v5546_v30 = vpack.c.b16 %v1535_v25, %v1534_v24 }
 0x160   : > { %v1227_v35 = vpop.permute.xlu0 %1226  ;;  %2862 = vmatpush.bf16.msra.mxu3 %v4274_v20 }
 0x161   : > { %v1230_v34 = vpop.permute.xlu1 %1229  ;;  %vm1253_vm9 = vcmp.eq.s32.totalorder %v1227_v35, %v5216_v1  ;;  %v4473_v35 = vld [vmem:[%s6794_s2 + $0x2d0] sm:$0xf] }
 0x162   : > { %vm1254_vm8 = vcmp.eq.s32.totalorder %v1230_v34, %v5216_v1  ;;  %v902_v55 = vpop.permute.xlu2 %901  ;;  %v4187_v34 = vld [vmem:[%s6794_s2 + $0x9c] sm:$0xf0] }
 0x163   : > { %vm4073_vm10 = vmpackc.low %vm1254_vm8, %vm1253_vm9  ;;  %vm918_vm4 = vcmp.eq.s32.totalorder %v902_v55, %v5216_v1  ;;  %v4190_v37 = vor.u32 %v4716_v33, %v4187_v34 }
 0x164   : > { %4074 = vmatmul.msk.bf16.gmra.mxu3 %vm4073_vm10, %v4900_v7 }
 0x165   : > { %2812 = vmatpush.bf16.msra.mxu2 %v4190_v37 }
 0x168   : > { %v896_v43 = vpop.permute.xlu0 %895 }
 0x169   : > { %v675_v42 = vpop.permute.xlu1 %674  ;;  %v952_v45 = vpop.f32.mrf.mxu1  ;;  %vm916_vm13 = vcmp.eq.s32.totalorder %v896_v43, %v5216_v1  ;;  %v4474_v43 = vor.u32 %v4789_v38, %v4473_v35 }
 0x16a   : > { %vm697_vm12 = vcmp.eq.s32.totalorder %v675_v42, %v5216_v1  ;;  %vm4011_vm0 = vmpackc.low %vm916_vm13, %vm915_vm14  ;;  %v992_v60 = vpack.c.bf16 %v952_v45, %v952_v45  ;;  %v1239_v21 = vpop.permute.xlu2 %1238 }
 0x16b   : > { %vm3979_vm15 = vmpackc.low %vm698_vm11, %vm697_vm12  ;;  %4012 = vmatmul.msk.bf16.gmra.mxu1 %vm4011_vm0, %v4900_v7  ;;  %vm1257_vm14 = vcmp.eq.s32.totalorder %v1239_v21, %v5216_v1  ;;  %2714 = vmatpush.bf16.msra.mxu0 %v4474_v43 }
 0x16c   : > { %3980 = vmatmul.msk.bf16.gmra.mxu0 %vm3979_vm15, %v4900_v7  ;;  %v1582_v12 = vunpack.c.l.b16 %v992_v60 }
 0x16e   : > { %v5497_v50 = vpop.f32.mrf.mxu2 }
 0x170   : > { %v1069_v52 = vpop.permute.xlu0 %1068 }
 0x171   : > { %v1072_v51 = vpop.permute.xlu1 %1071  ;;  %vm1087_vm2 = vcmp.eq.s32.totalorder %v1069_v52, %v5216_v1  ;;  %v954_v53 = vpop.f32.mrf.mxu1  ;;  %v4813_v52 = vld [vmem:[%s6794_s2 + $0x398] sm:$0xf0] }
 0x172   : > { %vm1088_vm1 = vcmp.eq.s32.totalorder %v1072_v51, %v5216_v1  ;;  %v993_v58 = vpack.c.bf16 %v954_v53, %v954_v53  ;;  %v1370_v41 = vpop.permute.xlu2 %1369  ;;  %v4569_v51 = vld [vmem:[%s6794_s2 + $0x390] sm:$0xf] }
 0x173   : > { %vm4045_vm3 = vmpackc.low %vm1088_vm1, %vm1087_vm2  ;;  %vm1414_vm1 = vcmp.eq.s32.totalorder %v1370_v41, %v5216_v1  ;;  %v4570_v55 = vor.u32 %v4813_v52, %v4569_v51  ;;  %v4783_v52 = vld [vmem:[%s6794_s2 + $0x2a8] sm:$0xf0] }
 0x174   : > { %4046 = vmatmul.msk.bf16.gmra.mxu2 %vm4045_vm3, %v4900_v7  ;;  %v1583_v4 = vunpack.c.l.b16 %v993_v58 }
 0x175   : > { %2763 = vmatpush.bf16.msra.mxu1 %v4570_v55 }
 0x176   : > { %v5506_v59 = vpop.f32.mrf.mxu2  ;;  %v5530_v15 = vpack.c.b16 %v1583_v4, %v1582_v12  ;;  %v4461_v12 = vld [vmem:[%s6794_s2 + $0x2b8] sm:$0xf] }
 0x177   : > { %v1163_v53 = vpack.c.bf16 %v5506_v59, %v5506_v59  ;;  %v4462_v19 = vor.u32 %v4786_v16, %v4461_v12 }
 0x178   : > { %v1236_v57 = vpop.permute.xlu0 %1235  ;;  %6827 = vst [vmem:[#allocation3_spill] sm:$0xff] %v5530_v15 }
 0x179   : > { %v899_v56 = vpop.permute.xlu1 %898  ;;  %vm1256_vm6 = vcmp.eq.s32.totalorder %v1236_v57, %v5216_v1  ;;  %v957_v62 = vpop.f32.mrf.mxu1  ;;  %v1631_v58 = vunpack.c.l.b16 %v1163_v53  ;;  %2715 = vmatpush.bf16.msra.mxu0 %v4462_v19  ;;  %v4734_v53 = vld [vmem:[%s6794_s2 + $0x124] sm:$0xf] }
 0x17a   : > { %vm917_vm5 = vcmp.eq.s32.totalorder %v899_v56, %v5216_v1  ;;  %vm4075_vm9 = vmpackc.low %vm1256_vm6, %vm1255_vm7  ;;  %v994_v31 = vpack.c.bf16 %v957_v62, %v957_v62  ;;  %v1162_v56 = vpack.c.bf16 %v5497_v50, %v5497_v50  ;;  %v1379_v55 = vpop.permute.xlu2 %1378 }
 0x17b   : > { %vm4013_vm8 = vmpackc.low %vm918_vm4, %vm917_vm5  ;;  %4076 = vmatmul.msk.bf16.gmra.mxu3 %vm4075_vm9, %v4900_v7  ;;  %vm1417_vm7 = vcmp.eq.s32.totalorder %v1379_v55, %v5216_v1 }
 0x17c   : > { %4014 = vmatmul.msk.bf16.gmra.mxu1 %vm4013_vm8, %v4900_v7  ;;  %v1584_v45 = vunpack.c.l.b16 %v994_v31  ;;  %v1630_v62 = vunpack.c.l.b16 %v1162_v56  ;;  %v4810_v31 = vld [vmem:[%s6794_s2 + $0x380] sm:$0xf0] }
 0x17e   : > { %v5540_v22 = vpop.f32.mrf.mxu2  ;;  %v5542_v27 = vpop.f32.mrf.mxu3  ;;  %v5592_v5 = vpack.c.b16 %v1631_v58, %v1630_v62 }
 0x17f   : > { %v1164_v33 = vpack.c.bf16 %v5540_v22, %v5540_v22  ;;  %v4710_v22 = vld [vmem:[%s6794_s2 + $0x64] sm:$0xf] }
 0x180   : > { %v681_v14 = vpop.permute.xlu0 %680 }
 0x181   : > { %v684_v13 = vpop.permute.xlu1 %683  ;;  %vm699_vm11 = vcmp.eq.s32.totalorder %v681_v14, %v5216_v1  ;;  %v787_v23 = vpop.f32.mrf.mxu0  ;;  %v4178_v14 = vor.u32 %v4713_v10, %v4175_v11  ;;  %v1632_v38 = vunpack.c.l.b16 %v1164_v33  ;;  %v4780_v33 = vld [vmem:[%s6794_s2 + $0x290] sm:$0xf0] }
 0x182   : > { %vm700_vm10 = vcmp.eq.s32.totalorder %v684_v13, %v5216_v1  ;;  %v959_v26 = vpop.f32.mrf.mxu1  ;;  %v824_v57 = vpack.c.bf16 %v787_v23, %v787_v23 }
 0x183   : > { %vm3981_vm12 = vmpackc.low %vm700_vm10, %vm699_vm11  ;;  %v995_v29 = vpack.c.bf16 %v959_v26, %v959_v26  ;;  %2813 = vmatpush.bf16.msra.mxu2 %v4178_v14 }
 0x184   : > { %3982 = vmatmul.msk.bf16.gmra.mxu0 %vm3981_vm12, %v4900_v7  ;;  %2623 = vmatmul.bf16.vlgmr.msrb.gmra.mxu2 %v5530_v15  ;;  %v1536_v63 = vunpack.c.l.b16 %v824_v57 }
 0x185   : > { %v1585_v36 = vunpack.c.l.b16 %v995_v29  ;;  %v4557_v29 = vld [vmem:[%s6794_s2 + $0x378] sm:$0xf] }
 0x186   : > { %v5568_v42 = vpop.f32.mrf.mxu2  ;;  %v5572_v47 = vpop.f32.mrf.mxu3 }
 0x187   : > { %v5574_v49 = vpack.c.b16 %v1585_v36, %v1584_v45  ;;  %v1165_v25 = vpack.c.bf16 %v5568_v42, %v5568_v42 }
 0x188   : > { %v1242_v28 = vpop.permute.xlu0 %1241 }
 0x189   : > { %vm1258_vm13 = vcmp.eq.s32.totalorder %v1242_v28, %v5216_v1  ;;  %v1367_v32 = vpop.permute.xlu1 %1366  ;;  %v789_v46 = vpop.f32.mrf.mxu0  ;;  %6828 = vst [vmem:[#allocation4_spill] sm:$0xff] %v5574_v49  ;;  %v1633_v35 = vunpack.c.l.b16 %v1165_v25 }
 0x18a   : > { %vm4077_vm15 = vmpackc.low %vm1258_vm13, %vm1257_vm14  ;;  %vm1413_vm0 = vcmp.eq.s32.totalorder %v1367_v32, %v5216_v1  ;;  %v825_v54 = vpack.c.bf16 %v789_v46, %v789_v46  ;;  %v4558_v32 = vor.u32 %v4810_v31, %v4557_v29  ;;  %v4163_v46 = vld [vmem:[%s6794_s2 + $0x6c] sm:$0xf0]  ;;  %v4151_v29 = vld [vmem:[%s6794_s2 + $0x54] sm:$0xf0] }
 0x18b   : > { %4078 = vmatmul.msk.bf16.gmra.mxu3 %vm4077_vm15, %v4900_v7  ;;  %vm4095_vm2 = vmpackc.low %vm1414_vm1, %vm1413_vm0  ;;  %v5636_v43 = vpack.c.b16 %v1633_v35, %v1632_v38  ;;  %v4166_v51 = vor.u32 %v4710_v22, %v4163_v46  ;;  %v4437_v31 = vld [vmem:[%s6794_s2 + $0x288] sm:$0xf]  ;;  %v4247_v35 = vld [vmem:[%s6794_s2 + $0x114] sm:$0xf0] }
 0x18c   : > { %2574 = vmatmul.bf16.vlgmr.msrb.gmra.mxu1 %v5546_v30  ;;  %v1537_v60 = vunpack.c.l.b16 %v825_v54  ;;  %v4259_v54 = vld [vmem:[%s6794_s2 + $0x12c] sm:$0xf0] }
 0x18d   : > { %2764 = vmatpush.bf16.msra.mxu1 %v4558_v32  ;;  %v4262_v58 = vor.u32 %v4734_v53, %v4259_v54  ;;  %2814 = vmatpush.bf16.msra.mxu2 %v4166_v51  ;;  %v4804_v53 = vld [vmem:[%s6794_s2 + $0x350] sm:$0xf0] }
 0x18e   : > { %v5588_v0 = vpop.f32.mrf.mxu2  ;;  %v5590_v4 = vpack.c.b16 %v1537_v60, %v1536_v63 }
 0x18f   : > { %v5594_v6 = vpop.f32.mrf.mxu3  ;;  %2863 = vmatpush.bf16.msra.mxu3 %v4262_v58  ;;  %v1166_v10 = vpack.c.bf16 %v5588_v0, %v5588_v0 }
 0x190   : > { %v1373_v50 = vpop.permute.xlu0 %1372 }
 0x191   : > { %v962_v48 = vpop.f32.mrf.mxu1  ;;  %v1376_v9 = vpop.permute.xlu1 %1375  ;;  %vm1415_vm4 = vcmp.eq.s32.totalorder %v1373_v50, %v5216_v1  ;;  %v1634_v19 = vunpack.c.l.b16 %v1166_v10 }
 0x192   : > { %v996_v8 = vpack.c.bf16 %v962_v48, %v962_v48  ;;  %vm1416_vm3 = vcmp.eq.s32.totalorder %v1376_v9, %v5216_v1  ;;  %v4449_v48 = vld [vmem:[%s6794_s2 + $0x2a0] sm:$0xf]  ;;  %v4807_v9 = vld [vmem:[%s6794_s2 + $0x368] sm:$0xf0] }
 0x193   : > { %vm4097_vm5 = vmpackc.low %vm1416_vm3, %vm1415_vm4  ;;  %v4450_v57 = vor.u32 %v4783_v52, %v4449_v48  ;;  %v4533_v52 = vld [vmem:[%s6794_s2 + $0x348] sm:$0xf] }
 0x194   : > { %4096 = vmatmul.msk.bf16.vlgmr.msrb.gmra.mxu0 %vm4095_vm2, %v4900_v7  ;;  %2628 = vmatmul.bf16.gmra.mxu2 %v5574_v49  ;;  %v1586_v21 = vunpack.c.l.b16 %v996_v8  ;;  %v4545_v8 = vld [vmem:[%s6794_s2 + $0x360] sm:$0xf]  ;;  %v4534_v54 = vor.u32 %v4804_v53, %v4533_v52 }
 0x195   : > { %2716 = vmatpush.bf16.msra.mxu0 %v4450_v57  ;;  %v4546_v50 = vor.u32 %v4807_v9, %v4545_v8 }
 0x196   : > { %v1134_v26 = vpop.f32.mrf.mxu2 }
 0x197   : > { %v5632_v36 = vpop.f32.mrf.mxu3  ;;  %2765 = vmatpush.bf16.msra.mxu1 %v4546_v50 }
 0x198   : > { %v792_v2 = vpop.f32.mrf.mxu0  ;;  %v1382_v44 = vpop.permute.xlu0 %1381 }
 0x199   : > { %v964_v59 = vpop.f32.mrf.mxu1  ;;  %v826_v34 = vpack.c.bf16 %v792_v2, %v792_v2  ;;  %vm1418_vm6 = vcmp.eq.s32.totalorder %v1382_v44, %v5216_v1  ;;  %v1167_v2 = vpack.c.bf16 %v1134_v26, %v1134_v26  ;;  %v1385_v0 = vpop.permute.xlu1 %1384 }
 0x19a   : > { %v997_v3 = vpack.c.bf16 %v964_v59, %v964_v59  ;;  %vm4099_vm8 = vmpackc.low %vm1418_vm6, %vm1417_vm7  ;;  %vm1419_vm9 = vcmp.eq.s32.totalorder %v1385_v0, %v5216_v1  ;;  %v4235_v0 = vld [vmem:[%s6794_s2 + $0xfc] sm:$0xf0] }
 0x19b   : > { %2672 = vmatmul.bf16.vlgmr.msrb.gmra.mxu3 %v5592_v5  ;;  %v1538_v39 = vunpack.c.l.b16 %v826_v34  ;;  %v1635_v14 = vunpack.c.l.b16 %v1167_v2  ;;  %v4731_v34 = vld [vmem:[%s6794_s2 + $0x10c] sm:$0xf]  ;;  %2766 = vmatpush.bf16.msra.mxu1 %v4534_v54 }
 0x19c   : > { %2579 = vmatmul.bf16.gmra.mxu1 %v5590_v4  ;;  %v1587_v13 = vunpack.c.l.b16 %v997_v3 }
 0x19d   : > { %v5680_v26 = vpack.c.b16 %v1635_v14, %v1634_v19  ;;  %v4139_v14 = vld [vmem:[%s6794_s2 + $0x3c] sm:$0xf0] }
 0x19e   : > { %v5618_v24 = vpack.c.b16 %v1587_v13, %v1586_v21 }
 0x19f   : > { %v5638_v45 = vpop.f32.mrf.mxu2 }
 0x1a0   : > { %v794_v23 = vpop.f32.mrf.mxu0  ;;  %6829 = vst [vmem:[#allocation5_spill] sm:$0xff] %v5618_v24  ;;  %v1168_v55 = vpack.c.bf16 %v5638_v45, %v5638_v45 }
 0x1a1   : > { %v827_v28 = vpack.c.bf16 %v794_v23, %v794_v23  ;;  %v1394_v45 = vpop.permute.xlu1 %1393 }
 0x1a2   : > { %v1636_v2 = vunpack.c.l.b16 %v1168_v55  ;;  %vm1422_vm12 = vcmp.eq.s32.totalorder %v1394_v45, %v5216_v1 }
 0x1a3   : > { %v1539_v37 = vunpack.c.l.b16 %v827_v28  ;;  %v4707_v28 = vld [vmem:[%s6794_s2 + $0x4c] sm:$0xf] }
 0x1a4   : > { %4098 = vmatmul.msk.bf16.gmra.mxu0 %vm4097_vm5, %v4900_v7  ;;  %2633 = vmatmul.bf16.gmra.mxu2 %v5618_v24  ;;  %v4154_v32 = vor.u32 %v4707_v28, %v4151_v29 }
 0x1a5   : > { %v5634_v42 = vpack.c.b16 %v1539_v37, %v1538_v39  ;;  %v1388_v37 = vpop.permute.xlu2 %1387  ;;  %v4438_v39 = vor.u32 %v4780_v33, %v4437_v31  ;;  %v4521_v33 = vld [vmem:[%s6794_s2 + $0x330] sm:$0xf] }
 0x1a6   : > { %2815 = vmatpush.bf16.msra.mxu2 %v4154_v32  ;;  %vm1420_vm10 = vcmp.eq.s32.totalorder %v1388_v37, %v5216_v1 }
 0x1a7   : > { %v5660_v56 = vpop.f32.mrf.mxu3  ;;  %v1139_v16 = vpop.f32.mrf.mxu2  ;;  %2717 = vmatpush.bf16.msra.mxu0 %v4438_v39  ;;  %vm4101_vm11 = vmpackc.low %vm1420_vm10, %vm1419_vm9  ;;  %vm3582_vm9 = vcmask 1041409   ;;  %vm3584_vm10 = vcmask 1042434  }
 0x1a8   : > { %v967_v41 = vpop.f32.mrf.mxu1  ;;  %v1169_v48 = vpack.c.bf16 %v1139_v16, %v1139_v16  ;;  %v4425_v16 = vld [vmem:[%s6794_s2 + $0x270] sm:$0xf] }
 0x1a9   : > { %v797_v40 = vpop.f32.mrf.mxu0  ;;  %v998_v60 = vpack.c.bf16 %v967_v41, %v967_v41 }
 0x1aa   : > { %v828_v11 = vpack.c.bf16 %v797_v40, %v797_v40  ;;  %v4250_v40 = vor.u32 %v4731_v34, %v4247_v35  ;;  %v4801_v34 = vld [vmem:[%s6794_s2 + $0x338] sm:$0xf0] }
 0x1ab   : > { %2677 = vmatmul.bf16.gmra.mxu3 %v5636_v43  ;;  %v1588_v12 = vunpack.c.l.b16 %v998_v60  ;;  %v1637_v60 = vunpack.c.l.b16 %v1169_v48  ;;  %v4522_v37 = vor.u32 %v4801_v34, %v4521_v33 }
 0x1ac   : > { %2584 = vmatmul.bf16.gmra.mxu1 %v5634_v42  ;;  %v1540_v20 = vunpack.c.l.b16 %v828_v11  ;;  %2864 = vmatpush.bf16.msra.mxu3 %v4250_v40 }
 0x1ad   : > { %v5722_v50 = vpack.c.b16 %v1637_v60, %v1636_v2  ;;  %2767 = vmatpush.bf16.msra.mxu1 %v4522_v37  ;;  %v4127_v60 = vld [vmem:[%s6794_s2 + $0x24] sm:$0xf0] }
 0x1af   : > { %v5675_v21 = vpop.f32.mrf.mxu3 }
 0x1b0   : > { %v969_v63 = vpop.f32.mrf.mxu1 }
 0x1b1   : > { %v799_v62 = vpop.f32.mrf.mxu0  ;;  %v999_v3 = vpack.c.bf16 %v969_v63, %v969_v63 }
 0x1b2   : > { %v829_v59 = vpack.c.bf16 %v799_v62, %v799_v62 }
 0x1b3   : > { %v1589_v13 = vunpack.c.l.b16 %v999_v3 }
 0x1b4   : > { %4100 = vmatmul.msk.bf16.gmra.mxu0 %vm4099_vm8, %v4900_v7  ;;  %v1541_v17 = vunpack.c.l.b16 %v829_v59 }
 0x1b5   : > { %v5673_v18 = vpack.c.b16 %v1589_v13, %v1588_v12  ;;  %v1391_v12 = vpop.permute.xlu0 %1390  ;;  %v4704_v13 = vld [vmem:[%s6794_s2 + $0x34] sm:$0xf] }
 0x1b6   : > { %v5678_v25 = vpack.c.b16 %v1541_v17, %v1540_v20  ;;  %v4142_v19 = vor.u32 %v4704_v13, %v4139_v14  ;;  %v4777_v20 = vld [vmem:[%s6794_s2 + $0x278] sm:$0xf0]  ;;  %vm1421_vm13 = vcmp.eq.s32.totalorder %v1391_v12, %v5216_v1 }
 0x1b7   : > { %6830 = vst [vmem:[#allocation6_spill] sm:$0xff] %v5673_v18  ;;  %2638 = vmatmul.bf16.gmra.mxu2 %v5673_v18  ;;  %v5702_v38 = vpop.f32.mrf.mxu2  ;;  %v4426_v28 = vor.u32 %v4777_v20, %v4425_v16  ;;  %vm4103_vm14 = vmpackc.low %vm1422_vm12, %vm1421_vm13  ;;  %vm3588_vm12 = vcmask 1044484   ;;  %vm3590_vm13 = vcmask 1045509  }
 0x1b8   : > { %2816 = vmatpush.bf16.msra.mxu2 %v4142_v19  ;;  %v1170_v39 = vpack.c.bf16 %v5702_v38, %v5702_v38  ;;  %v4701_v38 = vld [vmem:[%s6794_s2 + $0x1c] sm:$0xf] }
 0x1b9   : > { %v972_v23 = vpop.f32.mrf.mxu1  ;;  %2718 = vmatpush.bf16.msra.mxu0 %v4426_v28 }
 0x1ba   : > { %v1000_v41 = vpack.c.bf16 %v972_v23, %v972_v23  ;;  %v4728_v23 = vld [vmem:[%s6794_s2 + $0xf4] sm:$0xf] }
 0x1bb   : > { %2682 = vmatmul.bf16.gmra.mxu3 %v5680_v26  ;;  %v4238_v29 = vor.u32 %v4728_v23, %v4235_v0  ;;  %v4509_v23 = vld [vmem:[%s6794_s2 + $0x318] sm:$0xf]  ;;  %v4798_v0 = vld [vmem:[%s6794_s2 + $0x320] sm:$0xf0] }
 0x1bc   : > { %2589 = vmatmul.bf16.gmra.mxu1 %v5678_v25  ;;  %v1590_v57 = vunpack.c.l.b16 %v1000_v41  ;;  %v4510_v28 = vor.u32 %v4798_v0, %v4509_v23 }
 0x1bd   : > { %2865 = vmatpush.bf16.msra.mxu3 %v4238_v29 }
 0x1be   : > { %v5705_v44 = vpop.f32.mrf.mxu3  ;;  %2768 = vmatpush.bf16.msra.mxu1 %v4510_v28 }
 0x1bf   : > { %v1144_v59 = vpop.f32.mrf.mxu2 }
 0x1c0   : > { %v1171_v35 = vpack.c.bf16 %v1144_v59, %v1144_v59  ;;  %v4130_v59 = vor.u32 %v4701_v38, %v4127_v60  ;;  %v4771_v38 = vld [vmem:[%s6794_s2 + $0x248] sm:$0xf0]  ;;  %v4722_v60 = vld [vmem:[%s6794_s2 + $0xc4] sm:$0xf] }
 0x1c1   : > { %v802_v22 = vpop.f32.mrf.mxu0  ;;  %v974_v46 = vpop.f32.mrf.mxu1 }
 0x1c2   : > { %v1001_v51 = vpack.c.bf16 %v974_v46, %v974_v46  ;;  %v830_v63 = vpack.c.bf16 %v802_v22, %v802_v22  ;;  %v1639_v41 = vunpack.c.l.b16 %v1171_v35  ;;  %v1638_v46 = vunpack.c.l.b16 %v1170_v39  ;;  %2817 = vmatpush.bf16.msra.mxu2 %v4130_v59 }
 0x1c4   : > { %4102 = vmatmul.msk.bf16.gmra.mxu0 %vm4101_vm11, %v4900_v7  ;;  %v1591_v58 = vunpack.c.l.b16 %v1001_v51  ;;  %v1542_v10 = vunpack.c.l.b16 %v830_v63  ;;  %v5759_v54 = vpack.c.b16 %v1639_v41, %v1638_v46  ;;  %v4413_v63 = vld [vmem:[%s6794_s2 + $0x258] sm:$0xf]  ;;  %vm3586_vm11 = vcmask 1043459  }
 0x1c6   : > { %v5717_v62 = vpack.c.b16 %v1591_v58, %v1590_v57  ;;  %v5720_v9 = vpop.f32.mrf.mxu3  ;;  %v1400_v58 = vpop.permute.xlu0 %1399 }
 0x1c7   : > { %vm1424_vm15 = vcmp.eq.s32.totalorder %v1400_v58, %v5216_v1 }
 0x1c8   : > { %6831 = vst [vmem:[#allocation7_spill] sm:$0xff] %v5717_v62  ;;  %2643 = vmatmul.bf16.gmra.mxu2 %v5717_v62 }
 0x1c9   : > { %v804_v3 = vpop.f32.mrf.mxu0 }
 0x1ca   : > { %v831_v8 = vpack.c.bf16 %v804_v3, %v804_v3  ;;  %v4774_v3 = vld [vmem:[%s6794_s2 + $0x260] sm:$0xf0] }
 0x1cb   : > { %2687 = vmatmul.bf16.gmra.mxu3 %v5722_v50  ;;  %v4414_v12 = vor.u32 %v4774_v3, %v4413_v63  ;;  %v4211_v63 = vld [vmem:[%s6794_s2 + $0xcc] sm:$0xf0] }
 0x1cc   : > { %v1543_v11 = vunpack.c.l.b16 %v831_v8  ;;  %v4725_v8 = vld [vmem:[%s6794_s2 + $0xdc] sm:$0xf] }
 0x1cd   : > { %2719 = vmatpush.bf16.msra.mxu0 %v4414_v12 }
 0x1ce   : > { %v5734_v17 = vpack.c.b16 %v1543_v11, %v1542_v10  ;;  %v1147_v31 = vpop.f32.mrf.mxu2  ;;  %v4223_v10 = vld [vmem:[%s6794_s2 + $0xe4] sm:$0xf0]  ;;  %v1397_v11 = vpop.permute.xlu2 %1396 }
 0x1cf   : > { %v5757_v40 = vpop.f32.mrf.mxu3  ;;  %v4226_v13 = vor.u32 %v4725_v8, %v4223_v10  ;;  %vm1423_vm0 = vcmp.eq.s32.totalorder %v1397_v11, %v5216_v1  ;;  %v1172_v29 = vpack.c.bf16 %v1147_v31, %v1147_v31  ;;  %v4698_v31 = vld [vmem:[%s6794_s2 + $0x4] sm:$0xf]  ;;  %v4214_v10 = vor.u32 %v4722_v60, %v4211_v63  ;;  %v1409_v60 = vpop.permute.xlu0 %1408  ;;  %v4815_v63 = vld [vmem:[%s6794_s2 + $0x3ac] sm:$0xf] }
 0x1d0   : > { %6832 = vst [vmem:[#allocation8_spill] sm:$0xff] %v5734_v17  ;;  %2594 = vmatmul.bf16.gmra.mxu1 %v5734_v17  ;;  %vm4105_vm1 = vmpackc.low %vm1424_vm15, %vm1423_vm0  ;;  %vm1427_vm6 = vcmp.eq.s32.totalorder %v1409_v60, %v5216_v1  ;;  %vm3594_vm15 = vcmask 1047559  }
 0x1d1   : > { %v977_v32 = vpop.f32.mrf.mxu1  ;;  %2866 = vmatpush.bf16.msra.mxu3 %v4226_v13  ;;  %v1640_v41 = vunpack.c.l.b16 %v1172_v29  ;;  %v4497_v29 = vld [vmem:[%s6794_s2 + $0x300] sm:$0xf] }
 0x1d2   : > { %v1002_v22 = vpack.c.bf16 %v977_v32, %v977_v32 }
 0x1d4   : > { %4104 = vmatmul.msk.bf16.gmra.mxu0 %vm4103_vm14, %v4900_v7  ;;  %v1592_v55 = vunpack.c.l.b16 %v1002_v22  ;;  %vm3592_vm14 = vcmask 1046534  }
 0x1d5   : > { %2867 = vmatpush.bf16.msra.mxu3 %v4214_v10 }
 0x1d6   : > { %v1149_v53 = vpop.f32.mrf.mxu2 }
 0x1d7   : > { %v5782_v45 = vpop.f32.mrf.mxu3  ;;  %v1173_v19 = vpack.c.bf16 %v1149_v53, %v1149_v53  ;;  %v4401_v53 = vld [vmem:[%s6794_s2 + $0x240] sm:$0xf] }
 0x1d8   : > { %v807_v51 = vpop.f32.mrf.mxu0  ;;  %v4402_v8 = vor.u32 %v4771_v38, %v4401_v53 }
 0x1d9   : > { %v979_v48 = vpop.f32.mrf.mxu1  ;;  %v832_v14 = vpack.c.bf16 %v807_v51, %v807_v51  ;;  %v1641_v35 = vunpack.c.l.b16 %v1173_v19  ;;  %v1403_v51 = vpop.permute.xlu1 %1402 }
 0x1da   : > { %v1003_v52 = vpack.c.bf16 %v979_v48, %v979_v48  ;;  %vm1425_vm2 = vcmp.eq.s32.totalorder %v1403_v51, %v5216_v1  ;;  %2720 = vmatpush.bf16.msra.mxu0 %v4402_v8 }
 0x1db   : > { %2692 = vmatmul.bf16.gmra.mxu3 %v5759_v54  ;;  %v1544_v32 = vunpack.c.l.b16 %v832_v14  ;;  %v5797_v48 = vpack.c.b16 %v1641_v35, %v1640_v41 }
 0x1dc   : > { %v1593_v57 = vunpack.c.l.b16 %v1003_v52  ;;  %v4115_v52 = vld [vmem:[%s6794_s2 + $0xc] sm:$0xf0] }
 0x1dd   : > { %6835 = vst [vmem:[#allocation11_spill] sm:$0xff] %v5797_v48  ;;  %v4118_v58 = vor.u32 %v4698_v31, %v4115_v52 }
 0x1de   : > { %v5771_v2 = vpack.c.b16 %v1593_v57, %v1592_v55  ;;  %v1406_v55 = vpop.permute.xlu2 %1405 }
 0x1df   : > { %v1152_v33 = vpop.f32.mrf.mxu2  ;;  %2818 = vmatpush.bf16.msra.mxu2 %v4118_v58  ;;  %vm1426_vm3 = vcmp.eq.s32.totalorder %v1406_v55, %v5216_v1 }
 0x1e0   : > { %6833 = vst [vmem:[#allocation9_spill] sm:$0xff] %v5771_v2  ;;  %2648 = vmatmul.bf16.gmra.mxu2 %v5771_v2  ;;  %v809_v16 = vpop.f32.mrf.mxu0  ;;  %vm4107_vm4 = vmpackc.low %vm1426_vm3, %vm1425_vm2 }
 0x1e1   : > { %v833_v20 = vpack.c.bf16 %v809_v16, %v809_v16  ;;  %v1412_v38 = vpop.permute.xlu1 %1411 }
 0x1e2   : > { %vm1428_vm5 = vcmp.eq.s32.totalorder %v1412_v38, %v5216_v1 }
 0x1e3   : > { %v1545_v34 = vunpack.c.l.b16 %v833_v20  ;;  %vm4109_vm7 = vmpackc.low %vm1428_vm5, %vm1427_vm6 }
 0x1e4   : > { %4106 = vmatmul.msk.bf16.gmra.mxu0 %vm4105_vm1, %v4900_v7 }
 0x1e5   : > { %v5794_v39 = vpack.c.b16 %v1545_v34, %v1544_v32  ;;  %v4795_v32 = vld [vmem:[%s6794_s2 + $0x308] sm:$0xf0]  ;;  %v1174_v34 = vpack.c.bf16 %v1152_v33, %v1152_v33 }
 0x1e6   : > { %v4498_v35 = vor.u32 %v4795_v32, %v4497_v29 }
 0x1e7   : > { %v1317_v37 = vpop.f32.mrf.mxu3  ;;  %6834 = vst [vmem:[#allocation10_spill] sm:$0xff] %v5794_v39  ;;  %2599 = vmatmul.bf16.gmra.mxu1 %v5794_v39  ;;  %v1154_v59 = vpop.f32.mrf.mxu2 }
 0x1e8   : > { %v982_v46 = vpop.f32.mrf.mxu1  ;;  %v1342_v57 = vpack.c.bf16 %v1317_v37, %v1317_v37  ;;  %v1175_v23 = vpack.c.bf16 %v1154_v59, %v1154_v59  ;;  %2769 = vmatpush.bf16.msra.mxu1 %v4498_v35  ;;  %v4583_v59 = vld [vmem:[%s6794_s2 + $0x3b4] sm:$0xf0]  ;;  %v5868_v35 = vld [vmem:[%s6795_s3] sm:$0x7] }
 0x1e9   : > { %v812_v22 = vpop.f32.mrf.mxu0  ;;  %v1004_v13 = vpack.c.bf16 %v982_v46, %v982_v46  ;;  %v4586_v10 = vor.u32 %v4815_v63, %v4583_v59  ;;  %v5873_v38 = vperm.slane %v5868_v35, 0 }
 0x1ea   : > { %v834_v12 = vpack.c.bf16 %v812_v22, %v812_v22  ;;  %v1688_v14 = vunpack.c.l.b16 %v1342_v57  ;;  %v1643_v31 = vunpack.c.l.b16 %v1175_v23  ;;  %v1642_v57 = vunpack.c.l.b16 %v1174_v34 }
 0x1eb   : > { %2697 = vmatmul.bf16.gmra.mxu3 %v5797_v48  ;;  %v1594_v22 = vunpack.c.l.b16 %v1004_v13  ;;  %v4721_v13 = vld [vmem:[%s6794_s2 + $0xb8] sm:$0xf0]  ;;  %3007 = vmatpush.bf16.msrb.mxu2 %v4586_v10 }
 0x1ec   : > { %v1546_v41 = vunpack.c.l.b16 %v834_v12  ;;  %v5835_v58 = vpack.c.b16 %v1643_v31, %v1642_v57  ;;  %v4205_v12 = vld [vmem:[%s6794_s2 + $0xb0] sm:$0xf] }
 0x1ee   : > { %6839 = vst [vmem:[#allocation15_spill] sm:$0xff] %v5835_v58 }
 0x1ef   : > { %v1319_v3 = vpop.f32.mrf.mxu3 }
 0x1f0   : > { %v1343_v11 = vpack.c.bf16 %v1319_v3, %v1319_v3  ;;  %v984_v20 = vpop.f32.mrf.mxu1  ;;  %v4767_v3 = vld [vmem:[%s6794_s2 + $0x22c] sm:$0xf] }
 0x1f1   : > { %v814_v19 = vpop.f32.mrf.mxu0  ;;  %v1005_v28 = vpack.c.bf16 %v984_v20, %v984_v20 }
 0x1f2   : > { %v1689_v16 = vunpack.c.l.b16 %v1343_v11  ;;  %v835_v0 = vpack.c.bf16 %v814_v19, %v814_v19  ;;  %v4391_v11 = vld [vmem:[%s6794_s2 + $0x234] sm:$0xf0]  ;;  %v4206_v19 = vor.u32 %v4721_v13, %v4205_v12 }
 0x1f3   : > { %v1595_v51 = vunpack.c.l.b16 %v1005_v28  ;;  %v4487_v28 = vld [vmem:[%s6794_s2 + $0x2f4] sm:$0xf0] }
 0x1f4   : > { %4108 = vmatmul.msk.bf16.gmra.mxu0 %vm4107_vm4, %v4900_v7  ;;  %v5827_v37 = vpack.c.b16 %v1689_v16, %v1688_v14  ;;  %v1547_v46 = vunpack.c.l.b16 %v835_v0  ;;  %v4394_v16 = vor.u32 %v4767_v3, %v4391_v11  ;;  %v4791_v0 = vld [vmem:[%s6794_s2 + $0x2ec] sm:$0xf]  ;;  %3056 = vmatpush.bf16.msrb.mxu3 %v4206_v19 }
 0x1f5   : > { %v5831_v55 = vpack.c.b16 %v1595_v51, %v1594_v22  ;;  %v4490_v32 = vor.u32 %v4791_v0, %v4487_v28  ;;  %v4571_v0 = vld [vmem:[%s6794_s2 + $0x39c] sm:$0xf0]  ;;  %v4764_v28 = vld [vmem:[%s6794_s2 + $0x214] sm:$0xf] }
 0x1f6   : > { %6836 = vst [vmem:[#allocation12_spill] sm:$0xff] %v5827_v37  ;;  %v5829_v53 = vpack.c.b16 %v1547_v46, %v1546_v41  ;;  %2909 = vmatpush.bf16.msrb.mxu0 %v4394_v16  ;;  %v1332_v16 = vpack.c.bf16 %v5542_v27, %v5542_v27 }
 0x1f7   : > { %v1157_v52 = vpop.f32.mrf.mxu2  ;;  %6838 = vst [vmem:[#allocation14_spill] sm:$0xff] %v5831_v55  ;;  %2653 = vmatmul.bf16.gmra.mxu2 %v5831_v55  ;;  %2958 = vmatpush.bf16.msrb.mxu1 %v4490_v32 }
 0x1f8   : > { %6837 = vst [vmem:[#allocation13_spill] sm:$0xff] %v5829_v53  ;;  %2604 = vmatmul.bf16.gmra.mxu1 %v5829_v53  ;;  %v1176_v41 = vpack.c.bf16 %v1157_v52, %v1157_v52  ;;  %v1333_v52 = vpack.c.bf16 %v5572_v47, %v5572_v47  ;;  %v4812_v47 = vld [vmem:[%s6794_s2 + $0x394] sm:$0xf] }
 0x1f9   : > { %v987_v33 = vpop.f32.mrf.mxu1 }
 0x1fa   : > { %v1006_v20 = vpack.c.bf16 %v987_v33, %v987_v33  ;;  %v1679_v27 = vunpack.c.l.b16 %v1333_v52 }
 0x1fb   : > { %2702 = vmatmul.bf16.gmra.mxu3 %v5835_v58 }
 0x1fc   : > { %v1596_v22 = vunpack.c.l.b16 %v1006_v20 }
 0x1fe   : > { %v1322_v14 = vpop.f32.mrf.mxu3 }
 0x1ff   : > { %v1159_v8 = vpop.f32.mrf.mxu2  ;;  %v1344_v31 = vpack.c.bf16 %v1322_v14, %v1322_v14 }
 0x200   : > { %v1177_v1 = vpack.c.bf16 %v1159_v8, %v1159_v8 }
 0x201   : > { %v817_v23 = vpop.f32.mrf.mxu0  ;;  %v989_v29 = vpop.f32.mrf.mxu1  ;;  %v1690_v11 = vunpack.c.l.b16 %v1344_v31 }
 0x202   : > { %v1007_v34 = vpack.c.bf16 %v989_v29, %v989_v29  ;;  %v1645_v51 = vunpack.c.l.b16 %v1177_v1  ;;  %v836_v60 = vpack.c.bf16 %v817_v23, %v817_v23  ;;  %v4574_v1 = vor.u32 %v4812_v47, %v4571_v0 }
 0x204   : > { %4110 = vmatmul.msk.bf16.gmra.mxu0 %vm4109_vm7, %v4900_v7  ;;  %v1597_v46 = vunpack.c.l.b16 %v1007_v34  ;;  %v1644_v7 = vunpack.c.l.b16 %v1176_v41  ;;  %v1548_v19 = vunpack.c.l.b16 %v836_v60  ;;  %v4379_v34 = vld [vmem:[%s6794_s2 + $0x21c] sm:$0xf0]  ;;  %v4193_v41 = vld [vmem:[%s6794_s2 + $0x98] sm:$0xf]  ;;  %3008 = vmatpush.bf16.msrb.mxu2 %v4574_v1 }
 0x206   : > { %v5870_v33 = vpack.c.b16 %v1597_v46, %v1596_v22  ;;  %v1324_v63 = vpop.f32.mrf.mxu3  ;;  %v5879_v14 = vpack.c.b16 %v1645_v51, %v1644_v7  ;;  %v4718_v22 = vld [vmem:[%s6794_s2 + $0xa0] sm:$0xf0]  ;;  %v4382_v51 = vor.u32 %v4764_v28, %v4379_v34  ;;  %v4788_v7 = vld [vmem:[%s6794_s2 + $0x2d4] sm:$0xf]  ;;  %v1334_v34 = vpack.c.bf16 %v5594_v6, %v5594_v6 }
 0x207   : > { %v2624_v57 = vpop.f32.mrf.mxu2  ;;  %v1345_v59 = vpack.c.bf16 %v1324_v63, %v1324_v63  ;;  %v4194_v31 = vor.u32 %v4718_v22, %v4193_v41 }
 0x208   : > { %6840 = vst [vmem:[#allocation16_spill] sm:$0xff] %v5870_v33  ;;  %2658 = vmatmul.bf16.gmra.mxu2 %v5870_v33  ;;  %2910 = vmatpush.bf16.msrb.mxu0 %v4382_v51 }
 0x209   : > { %v819_v3 = vpop.f32.mrf.mxu0  ;;  %v2575_v10 = vpop.f32.mrf.mxu1  ;;  %v1691_v12 = vunpack.c.l.b16 %v1345_v59  ;;  %6841 = vst [vmem:[#allocation17_spill] sm:$0xff] %v5879_v14  ;;  %3057 = vmatpush.bf16.msrb.mxu3 %v4194_v31  ;;  %v4475_v59 = vld [vmem:[%s6794_s2 + $0x2dc] sm:$0xf0]  ;;  %v4809_v31 = vld [vmem:[%s6794_s2 + $0x37c] sm:$0xf] }
 0x20a   : > { %v837_v8 = vpack.c.bf16 %v819_v3, %v819_v3  ;;  %v2576_v13 = vadd.f32 %v2575_v10, %v5873_v38 }
 0x20b   : > { %2707 = vmatmul.bf16.gmra.mxu3 %v5879_v14  ;;  %v5895_v29 = vpack.c.b16 %v1691_v12, %v1690_v11  ;;  %v4776_v14 = vld [vmem:[%s6794_s2 + $0x274] sm:$0xf] }
 0x20c   : > { %v1549_v20 = vunpack.c.l.b16 %v837_v8  ;;  %v5884_v23 = vadd.f32 %v2624_v57, %v2576_v13  ;;  %v1678_v57 = vunpack.c.l.b16 %v1332_v16  ;;  %v4478_v8 = vor.u32 %v4788_v7, %v4475_v59  ;;  %v4367_v59 = vld [vmem:[%s6794_s2 + $0x204] sm:$0xf0] }
 0x20d   : > { %6842 = vst [vmem:[#allocation18_spill] sm:$0xff] %v5895_v29 }
 0x20e   : > { %v5897_v32 = vpack.c.b16 %v1549_v20, %v1548_v19  ;;  %v1327_v60 = vpop.f32.mrf.mxu3  ;;  %v5917_v3 = vpack.c.b16 %v1679_v27, %v1678_v57  ;;  %2959 = vmatpush.bf16.msrb.mxu1 %v4478_v8  ;;  %v1335_v20 = vpack.c.bf16 %v5632_v36, %v5632_v36  ;;  %v4559_v36 = vld [vmem:[%s6794_s2 + $0x384] sm:$0xf0]  ;;  %v4761_v57 = vld [vmem:[%s6794_s2 + $0x1fc] sm:$0xf]  ;;  %v4181_v8 = vld [vmem:[%s6794_s2 + $0x80] sm:$0xf] }
 0x20f   : > { %v5908_v46 = vpop.f32.mrf.mxu2  ;;  %v1346_v10 = vpack.c.bf16 %v1327_v60, %v1327_v60  ;;  %v4562_v7 = vor.u32 %v4809_v31, %v4559_v36  ;;  %v1337_v31 = vpack.c.bf16 %v5675_v21, %v5675_v21  ;;  %v4547_v21 = vld [vmem:[%s6794_s2 + $0x36c] sm:$0xf0] }
 0x210   : > { %2609 = vmatmul.bf16.gmra.mxu1 %v5897_v32  ;;  %v1681_v6 = vunpack.c.l.b16 %v1335_v20 }
 0x211   : > { %v1462_v63 = vpop.f32.mrf.mxu0  ;;  %v5919_v52 = vpop.f32.mrf.mxu1  ;;  %v1692_v28 = vunpack.c.l.b16 %v1346_v10  ;;  %v4715_v10 = vld [vmem:[%s6794_s2 + $0x88] sm:$0xf0]  ;;  %3009 = vmatpush.bf16.msrb.mxu2 %v4562_v7 }
 0x212   : > { %v1502_v12 = vpack.c.bf16 %v1462_v63, %v1462_v63 }
 0x214   : > { %2721 = vmatmul.bf16.vlgmr.msra.gmra.mxu0 %v5917_v3  ;;  %v1726_v41 = vunpack.c.l.b16 %v1502_v12  ;;  %v4182_v12 = vor.u32 %v4715_v10, %v4181_v8 }
 0x216   : > { %v1329_v13 = vpop.f32.mrf.mxu3  ;;  %3058 = vmatpush.bf16.msrb.mxu3 %v4182_v12  ;;  %v4806_v12 = vld [vmem:[%s6794_s2 + $0x364] sm:$0xf] }
 0x217   : > { %v2629_v11 = vpop.f32.mrf.mxu2  ;;  %v1347_v16 = vpack.c.bf16 %v1329_v13, %v1329_v13  ;;  %v1680_v13 = vunpack.c.l.b16 %v1334_v34 }
 0x218   : > { %2819 = vmatmul.bf16.vlgmr.msra.gmra.mxu2 %v5546_v30 }
 0x219   : > { %v1464_v19 = vpop.f32.mrf.mxu0  ;;  %v2580_v0 = vpop.f32.mrf.mxu1  ;;  %v1693_v27 = vunpack.c.l.b16 %v1347_v16 }
 0x21a   : > { %v1503_v47 = vpack.c.bf16 %v1464_v19, %v1464_v19  ;;  %v2581_v1 = vadd.f32 %v2580_v0, %v5873_v38  ;;  %v4785_v0 = vld [vmem:[%s6794_s2 + $0x2bc] sm:$0xf] }
 0x21b   : > { %2868 = vmatmul.bf16.vlgmr.msra.gmra.mxu3 %v5530_v15  ;;  %v5938_v60 = vpack.c.b16 %v1693_v27, %v1692_v28  ;;  %v4463_v28 = vld [vmem:[%s6794_s2 + $0x2c4] sm:$0xf0] }
 0x21c   : > { %v1727_v22 = vunpack.c.l.b16 %v1503_v47  ;;  %v2630_v51 = vadd.f32 %v2629_v11, %v2581_v1  ;;  %v4370_v11 = vor.u32 %v4761_v57, %v4367_v59  ;;  %v5965_v1 = vpack.c.b16 %v1681_v6, %v1680_v13 }
 0x21d   : > { %v4466_v34 = vor.u32 %v4785_v0, %v4463_v28  ;;  %v1336_v6 = vpack.c.bf16 %v5660_v56, %v5660_v56  ;;  %v1683_v13 = vunpack.c.l.b16 %v1337_v31  ;;  %v4758_v56 = vld [vmem:[%s6794_s2 + $0x1e4] sm:$0xf]  ;;  %v4355_v0 = vld [vmem:[%s6794_s2 + $0x1ec] sm:$0xf0]  ;;  %v4169_v28 = vld [vmem:[%s6794_s2 + $0x68] sm:$0xf] }
 0x21e   : > { %v5940_v63 = vpack.c.b16 %v1727_v22, %v1726_v41  ;;  %v2673_v19 = vpop.f32.mrf.mxu3  ;;  %2911 = vmatpush.bf16.msrb.mxu0 %v4370_v11 }
 0x21f   : > { %v5951_v16 = vpop.f32.mrf.mxu2  ;;  %v5955_v20 = vadd.f32 %v2673_v19, %v5884_v23  ;;  %2960 = vmatpush.bf16.msrb.mxu1 %v4466_v34  ;;  %v4358_v34 = vor.u32 %v4758_v56, %v4355_v0  ;;  %v1339_v0 = vpack.c.bf16 %v5720_v9, %v5720_v9  ;;  %v4535_v9 = vld [vmem:[%s6794_s2 + $0x354] sm:$0xf0] }
 0x220   : > { %2770 = vmatmul.bf16.vlgmr.msra.gmra.mxu1 %v5940_v63 }
 0x221   : > { %v1467_v47 = vpop.f32.mrf.mxu0  ;;  %v5963_v27 = vpop.f32.mrf.mxu1 }
 0x222   : > { %v1504_v23 = vpack.c.bf16 %v1467_v47, %v1467_v47  ;;  %v4550_v47 = vor.u32 %v4806_v12, %v4547_v21  ;;  %2912 = vmatpush.bf16.msrb.mxu0 %v4358_v34 }
 0x224   : > { %2726 = vmatmul.bf16.gmra.mxu0 %v5965_v1  ;;  %v1728_v8 = vunpack.c.l.b16 %v1504_v23  ;;  %v4712_v23 = vld [vmem:[%s6794_s2 + $0x70] sm:$0xf0]  ;;  %3010 = vmatpush.bf16.msrb.mxu2 %v4550_v47 }
 0x226   : > { %v5968_v41 = vpop.f32.mrf.mxu3 }
 0x227   : > { %v2634_v36 = vpop.f32.mrf.mxu2 }
 0x228   : > { %2824 = vmatmul.bf16.gmra.mxu2 %v5590_v4 }
 0x229   : > { %v1469_v22 = vpop.f32.mrf.mxu0  ;;  %v2585_v7 = vpop.f32.mrf.mxu1 }
 0x22a   : > { %v1505_v57 = vpack.c.bf16 %v1469_v22, %v1469_v22  ;;  %v2586_v59 = vadd.f32 %v2585_v7, %v5873_v38  ;;  %v1682_v22 = vunpack.c.l.b16 %v1336_v6 }
 0x22b   : > { %2873 = vmatmul.bf16.gmra.mxu3 %v5574_v49 }
 0x22c   : > { %v1729_v10 = vunpack.c.l.b16 %v1505_v57  ;;  %v2635_v11 = vadd.f32 %v2634_v36, %v2586_v59  ;;  %v4170_v36 = vor.u32 %v4712_v23, %v4169_v28  ;;  %v4782_v59 = vld [vmem:[%s6794_s2 + $0x2a4] sm:$0xf]  ;;  %v6008_v6 = vpack.c.b16 %v1683_v13, %v1682_v22 }
 0x22d   : > { %v1338_v23 = vpack.c.bf16 %v5705_v44, %v5705_v44 }
 0x22e   : > { %v5983_v19 = vpack.c.b16 %v1729_v10, %v1728_v8  ;;  %v2678_v31 = vpop.f32.mrf.mxu3  ;;  %v4451_v8 = vld [vmem:[%s6794_s2 + $0x2ac] sm:$0xf0]  ;;  %3059 = vmatpush.bf16.msrb.mxu3 %v4170_v36 }
 0x22f   : > { %v5998_v57 = vadd.f32 %v2678_v31, %v2630_v51  ;;  %v4454_v12 = vor.u32 %v4782_v59, %v4451_v8  ;;  %v6010_v21 = vpop.f32.mrf.mxu2  ;;  %v4755_v8 = vld [vmem:[%s6794_s2 + $0x1cc] sm:$0xf]  ;;  %v1684_v61 = vunpack.c.l.b16 %v1338_v23 }
 0x230   : > { %2775 = vmatmul.bf16.gmra.mxu1 %v5983_v19 }
 0x231   : > { %v1472_v7 = vpop.f32.mrf.mxu0  ;;  %v6006_v10 = vpop.f32.mrf.mxu1  ;;  %2961 = vmatpush.bf16.msrb.mxu1 %v4454_v12  ;;  %v1685_v12 = vunpack.c.l.b16 %v1339_v0 }
 0x232   : > { %v1506_v51 = vpack.c.bf16 %v1472_v7, %v1472_v7  ;;  %v4803_v7 = vld [vmem:[%s6794_s2 + $0x34c] sm:$0xf] }
 0x234   : > { %2731 = vmatmul.bf16.gmra.mxu0 %v6008_v6  ;;  %v1730_v22 = vunpack.c.l.b16 %v1506_v51  ;;  %v4538_v51 = vor.u32 %v4803_v7, %v4535_v9  ;;  %v4439_v7 = vld [vmem:[%s6794_s2 + $0x294] sm:$0xf0]  ;;  %v6051_v9 = vpack.c.b16 %v1685_v12, %v1684_v61  ;;  %v1340_v61 = vpack.c.bf16 %v5757_v40, %v5757_v40 }
 0x236   : > { %v6013_v47 = vpop.f32.mrf.mxu3  ;;  %3011 = vmatpush.bf16.msrb.mxu2 %v4538_v51  ;;  %v1686_v49 = vunpack.c.l.b16 %v1340_v61  ;;  %v4427_v61 = vld [vmem:[%s6794_s2 + $0x27c] sm:$0xf0] }
 0x238   : > { %2829 = vmatmul.bf16.gmra.mxu2 %v5634_v42 }
 0x239   : > { %v1474_v56 = vpop.f32.mrf.mxu0  ;;  %v2590_v34 = vpop.f32.mrf.mxu1 }
 0x23a   : > { %v1507_v28 = vpack.c.bf16 %v1474_v56, %v1474_v56  ;;  %v2591_v13 = vadd.f32 %v2590_v34, %v5873_v38  ;;  %v2639_v36 = vpop.f32.mrf.mxu2  ;;  %v4343_v56 = vld [vmem:[%s6794_s2 + $0x1d4] sm:$0xf0]  ;;  %v4709_v34 = vld [vmem:[%s6794_s2 + $0x58] sm:$0xf0] }
 0x23b   : > { %2878 = vmatmul.bf16.gmra.mxu3 %v5618_v24 }
 0x23c   : > { %v1731_v31 = vunpack.c.l.b16 %v1507_v28  ;;  %v2640_v59 = vadd.f32 %v2639_v36, %v2591_v13  ;;  %v4157_v28 = vld [vmem:[%s6794_s2 + $0x50] sm:$0xf]  ;;  %v4346_v13 = vor.u32 %v4755_v8, %v4343_v56 }
 0x23d   : > { %v4158_v36 = vor.u32 %v4709_v34, %v4157_v28  ;;  %v1341_v28 = vpack.c.bf16 %v5782_v45, %v5782_v45 }
 0x23e   : > { %v6031_v44 = vpack.c.b16 %v1731_v31, %v1730_v22  ;;  %v2683_v24 = vpop.f32.mrf.mxu3  ;;  %2913 = vmatpush.bf16.msrb.mxu0 %v4346_v13  ;;  %v4779_v31 = vld [vmem:[%s6794_s2 + $0x28c] sm:$0xf] }
 0x23f   : > { %v6043_v0 = vadd.f32 %v2683_v24, %v2635_v11  ;;  %3060 = vmatpush.bf16.msrb.mxu3 %v4158_v36  ;;  %v4442_v23 = vor.u32 %v4779_v31, %v4439_v7  ;;  %v4523_v31 = vld [vmem:[%s6794_s2 + $0x33c] sm:$0xf0]  ;;  %v1687_v7 = vunpack.c.l.b16 %v1341_v28 }
 0x240   : > { %2780 = vmatmul.bf16.gmra.mxu1 %v6031_v44 }
 0x241   : > { %v1477_v22 = vpop.f32.mrf.mxu0  ;;  %2962 = vmatpush.bf16.msrb.mxu1 %v4442_v23  ;;  %v6054_v8 = vpop.f32.mrf.mxu1  ;;  %v6096_v58 = vpack.c.b16 %v1687_v7, %v1686_v49  ;;  %v4797_v49 = vld [vmem:[%s6794_s2 + $0x31c] sm:$0xf] }
 0x242   : > { %v6056_v24 = vpop.f32.mrf.mxu2  ;;  %v1508_v11 = vpack.c.bf16 %v1477_v22, %v1477_v22  ;;  %v4800_v22 = vld [vmem:[%s6794_s2 + $0x334] sm:$0xf] }
 0x243   : > { %6843 = vst [vmem:[#allocation19_spill] sm:$0xff] %v6096_v58 }
 0x244   : > { %2736 = vmatmul.bf16.gmra.mxu0 %v6051_v9  ;;  %v1732_v12 = vunpack.c.l.b16 %v1508_v11  ;;  %v4752_v11 = vld [vmem:[%s6794_s2 + $0x1b4] sm:$0xf] }
 0x246   : > { %v6058_v51 = vpop.f32.mrf.mxu3 }
 0x248   : > { %2834 = vmatmul.bf16.gmra.mxu2 %v5678_v25 }
 0x249   : > { %v1479_v56 = vpop.f32.mrf.mxu0 }
 0x24a   : > { %v1509_v34 = vpack.c.bf16 %v1479_v56, %v1479_v56  ;;  %v4526_v56 = vor.u32 %v4800_v22, %v4523_v31 }
 0x24b   : > { %2883 = vmatmul.bf16.gmra.mxu3 %v5673_v18  ;;  %v2644_v40 = vpop.f32.mrf.mxu2  ;;  %v4145_v18 = vld [vmem:[%s6794_s2 + $0x38] sm:$0xf] }
 0x24c   : > { %v1733_v13 = vunpack.c.l.b16 %v1509_v34  ;;  %v4331_v34 = vld [vmem:[%s6794_s2 + $0x1bc] sm:$0xf0]  ;;  %3012 = vmatpush.bf16.msrb.mxu2 %v4526_v56 }
 0x24d   : > { %v2595_v36 = vpop.f32.mrf.mxu1 }
 0x24e   : > { %v2596_v45 = vadd.f32 %v2595_v36, %v5873_v38  ;;  %v6073_v23 = vpack.c.b16 %v1733_v13, %v1732_v12  ;;  %v2688_v28 = vpop.f32.mrf.mxu3  ;;  %v4334_v13 = vor.u32 %v4752_v11, %v4331_v34  ;;  %v4706_v36 = vld [vmem:[%s6794_s2 + $0x40] sm:$0xf0] }
 0x24f   : > { %v6088_v22 = vadd.f32 %v2688_v28, %v2640_v59  ;;  %v4146_v15 = vor.u32 %v4706_v36, %v4145_v18  ;;  %v4319_v36 = vld [vmem:[%s6794_s2 + $0x1a4] sm:$0xf0] }
 0x250   : > { %2785 = vmatmul.bf16.gmra.mxu1 %v6073_v23  ;;  %v2645_v12 = vadd.f32 %v2644_v40, %v2596_v45  ;;  %2914 = vmatpush.bf16.msrb.mxu0 %v4334_v13  ;;  %v4430_v45 = vor.u32 %v4776_v14, %v4427_v61  ;;  %v4749_v13 = vld [vmem:[%s6794_s2 + $0x19c] sm:$0xf] }
 0x251   : > { %v1482_v31 = vpop.f32.mrf.mxu0  ;;  %3061 = vmatpush.bf16.msrb.mxu3 %v4146_v15  ;;  %v4511_v15 = vld [vmem:[%s6794_s2 + $0x324] sm:$0xf0] }
 0x252   : > { %2963 = vmatpush.bf16.msrb.mxu1 %v4430_v45  ;;  %v1510_v59 = vpack.c.bf16 %v1482_v31, %v1482_v31  ;;  %v4514_v28 = vor.u32 %v4797_v49, %v4511_v15  ;;  %v4133_v31 = vld [vmem:[%s6794_s2 + $0x20] sm:$0xf]  ;;  %v4773_v49 = vld [vmem:[%s6794_s2 + $0x25c] sm:$0xf]  ;;  %v4415_v15 = vld [vmem:[%s6794_s2 + $0x264] sm:$0xf0] }
 0x253   : > { %v6122_v61 = vpop.f32.mrf.mxu2 }
 0x254   : > { %2741 = vmatmul.bf16.gmra.mxu0 %v6096_v58  ;;  %v1734_v11 = vunpack.c.l.b16 %v1510_v59  ;;  %3013 = vmatpush.bf16.msrb.mxu2 %v4514_v28  ;;  %v4322_v59 = vor.u32 %v4749_v13, %v4319_v36 }
 0x255   : > { %v6109_v14 = vpop.f32.mrf.mxu1 }
 0x256   : > { %v6099_v56 = vpop.f32.mrf.mxu3  ;;  %2915 = vmatpush.bf16.msrb.mxu0 %v4322_v59  ;;  %v4499_v59 = vld [vmem:[%s6794_s2 + $0x30c] sm:$0xf0] }
 0x258   : > { %2839 = vmatmul.bf16.gmra.mxu2 %v5734_v17 }
 0x259   : > { %v1484_v18 = vpop.f32.mrf.mxu0 }
 0x25a   : > { %v1511_v40 = vpack.c.bf16 %v1484_v18, %v1484_v18  ;;  %v4703_v18 = vld [vmem:[%s6794_s2 + $0x28] sm:$0xf0] }
 0x25b   : > { %2888 = vmatmul.bf16.gmra.mxu3 %v5717_v62  ;;  %v4418_v62 = vor.u32 %v4773_v49, %v4415_v15  ;;  %v4746_v15 = vld [vmem:[%s6794_s2 + $0x184] sm:$0xf] }
 0x25c   : > { %v1735_v34 = vunpack.c.l.b16 %v1511_v40 }
 0x25d   : > { %2964 = vmatpush.bf16.msrb.mxu1 %v4418_v62  ;;  %v4794_v62 = vld [vmem:[%s6794_s2 + $0x304] sm:$0xf] }
 0x25e   : > { %v6111_v7 = vpack.c.b16 %v1735_v34, %v1734_v11  ;;  %v2693_v45 = vpop.f32.mrf.mxu3  ;;  %v4134_v34 = vor.u32 %v4703_v18, %v4133_v31  ;;  %v4502_v49 = vor.u32 %v4794_v62, %v4499_v59  ;;  %v4770_v62 = vld [vmem:[%s6794_s2 + $0x244] sm:$0xf]  ;;  %v4403_v59 = vld [vmem:[%s6794_s2 + $0x24c] sm:$0xf0] }
 0x25f   : > { %v6128_v40 = vadd.f32 %v2693_v45, %v2645_v12 }
 0x260   : > { %2790 = vmatmul.bf16.gmra.mxu1 %v6111_v7  ;;  %3062 = vmatpush.bf16.msrb.mxu3 %v4134_v34 }
 0x261   : > { %v1487_v11 = vpop.f32.mrf.mxu0  ;;  %3014 = vmatpush.bf16.msrb.mxu2 %v4502_v49 }
 0x262   : > { %v1512_v13 = vpack.c.bf16 %v1487_v11, %v1487_v11 }
 0x263   : > { %v2649_v36 = vpop.f32.mrf.mxu2 }
 0x264   : > { %2746 = vmatmul.bf16.gmra.mxu0 %v5827_v37  ;;  %v2600_v28 = vpop.f32.mrf.mxu1  ;;  %v1736_v58 = vunpack.c.l.b16 %v1512_v13  ;;  %v4700_v13 = vld [vmem:[%s6794_s2 + $0x10] sm:$0xf0] }
 0x265   : > { %v2601_v12 = vadd.f32 %v2600_v28, %v5873_v38  ;;  %v4121_v28 = vld [vmem:[%s6794_s2 + $0x8] sm:$0xf] }
 0x266   : > { %v6138_v31 = vpop.f32.mrf.mxu3 }
 0x267   : > { %v2650_v18 = vadd.f32 %v2649_v36, %v2601_v12 }
 0x268   : > { %2844 = vmatmul.bf16.gmra.mxu2 %v5794_v39 }
 0x269   : > { %v1489_v45 = vpop.f32.mrf.mxu0 }
 0x26a   : > { %v1513_v48 = vpack.c.bf16 %v1489_v45, %v1489_v45 }
 0x26b   : > { %2893 = vmatmul.bf16.gmra.mxu3 %v5771_v2  ;;  %v2651_v2 = vpop.f32.mrf.mxu2 }
 0x26c   : > { %v1737_v17 = vunpack.c.l.b16 %v1513_v48  ;;  %v2602_v11 = vpop.f32.mrf.mxu1  ;;  %v4307_v48 = vld [vmem:[%s6794_s2 + $0x18c] sm:$0xf0] }
 0x26d   : > { %v4310_v12 = vor.u32 %v4746_v15, %v4307_v48  ;;  %v2603_v15 = vadd.f32 %v2602_v11, %v5873_v38  ;;  %v4406_v48 = vor.u32 %v4770_v62, %v4403_v59 }
 0x26e   : > { %v6148_v34 = vpack.c.b16 %v1737_v17, %v1736_v58  ;;  %v2698_v17 = vpop.f32.mrf.mxu3  ;;  %v4122_v58 = vor.u32 %v4700_v13, %v4121_v28 }
 0x26f   : > { %v6163_v36 = vadd.f32 %v2698_v17, %v2650_v18  ;;  %2916 = vmatpush.bf16.msrb.mxu0 %v4310_v12  ;;  %2965 = vmatpush.bf16.msrb.mxu1 %v4406_v48  ;;  %v2652_v18 = vadd.f32 %v2651_v2, %v2603_v15  ;;  %v4493_v2 = vld [vmem:[%s6794_s2 + $0x2f0] sm:$0xf] }
 0x270   : > { %6844 = vst [vmem:[#allocation20_spill] sm:$0xff] %v6148_v34  ;;  %2795 = vmatmul.bf16.gmra.mxu1 %v6148_v34  ;;  %3063 = vmatpush.bf16.msrb.mxu3 %v4122_v58 }
 0x271   : > { %v1492_v45 = vpop.f32.mrf.mxu0 }
 0x272   : > { %v1514_v49 = vpack.c.bf16 %v1492_v45, %v1492_v45  ;;  %v4793_v45 = vld [vmem:[%s6794_s2 + $0x2f8] sm:$0xf0] }
 0x273   : > { %v4494_v15 = vor.u32 %v4793_v45, %v4493_v2 }
 0x274   : > { %2751 = vmatmul.bf16.gmra.mxu0 %v5895_v29  ;;  %v1738_v39 = vunpack.c.l.b16 %v1514_v49  ;;  %v4589_v49 = vld [vmem:[%s6794_s2 + $0x3b0] sm:$0xf] }
 0x275   : > { %v2605_v28 = vpop.f32.mrf.mxu1  ;;  %3203 = vmatpush.bf16.msra.mxu2 %v4494_v15 }
 0x276   : > { %v2700_v12 = vpop.f32.mrf.mxu3  ;;  %v2606_v37 = vadd.f32 %v2605_v28, %v5873_v38 }
 0x277   : > { %v6173_v13 = vadd.f32 %v2700_v12, %v2652_v18  ;;  %v4745_v18 = vld [vmem:[%s6794_s2 + $0x178] sm:$0xf0] }
 0x278   : > { %2849 = vmatmul.bf16.gmra.mxu2 %v5829_v53  ;;  %v4817_v12 = vld [vmem:[%s6794_s2 + $0x3b8] sm:$0xf0] }
 0x279   : > { %v1494_v17 = vpop.f32.mrf.mxu0  ;;  %v4590_v2 = vor.u32 %v4817_v12, %v4589_v49 }
 0x27a   : > { %v1515_v58 = vpack.c.bf16 %v1494_v17, %v1494_v17  ;;  %v2654_v11 = vpop.f32.mrf.mxu2  ;;  %v4397_v17 = vld [vmem:[%s6794_s2 + $0x230] sm:$0xf] }
 0x27b   : > { %v2655_v62 = vadd.f32 %v2654_v11, %v2606_v37  ;;  %2898 = vmatmul.bf16.gmra.mxu3 %v5831_v55  ;;  %v4301_v37 = vld [vmem:[%s6794_s2 + $0x170] sm:$0xf] }
 0x27c   : > { %v1739_v34 = vunpack.c.l.b16 %v1515_v58  ;;  %v4769_v58 = vld [vmem:[%s6794_s2 + $0x238] sm:$0xf0]  ;;  %3252 = vmatpush.bf16.msra.mxu3 %v4590_v2 }
 0x27d   : > { %v2607_v11 = vpop.f32.mrf.mxu1  ;;  %v4398_v45 = vor.u32 %v4769_v58, %v4397_v17 }
 0x27e   : > { %v6184_v59 = vpack.c.b16 %v1739_v34, %v1738_v39  ;;  %v2703_v48 = vpop.f32.mrf.mxu3  ;;  %v4302_v34 = vor.u32 %v4745_v18, %v4301_v37  ;;  %v2608_v15 = vadd.f32 %v2607_v11, %v5873_v38 }
 0x27f   : > { %v6196_v28 = vadd.f32 %v2703_v48, %v2655_v62  ;;  %3154 = vmatpush.bf16.msra.mxu1 %v4398_v45  ;;  %v2578_v45 = vadd.f32 %v5919_v52, %v5873_v38  ;;  %v4790_v52 = vld [vmem:[%s6794_s2 + $0x2e0] sm:$0xf0] }
 0x280   : > { %6845 = vst [vmem:[#allocation21_spill] sm:$0xff] %v6184_v59  ;;  %2800 = vmatmul.bf16.gmra.mxu1 %v6184_v59  ;;  %3105 = vmatpush.bf16.msra.mxu0 %v4302_v34 }
 0x281   : > { %v1497_v39 = vpop.f32.mrf.mxu0 }
 0x282   : > { %v2656_v62 = vpop.f32.mrf.mxu2  ;;  %v1516_v37 = vpack.c.bf16 %v1497_v39, %v1497_v39 }
 0x283   : > { %v2657_v48 = vadd.f32 %v2656_v62, %v2608_v15 }
 0x284   : > { %2756 = vmatmul.bf16.gmra.mxu0 %v5938_v60  ;;  %v1740_v59 = vunpack.c.l.b16 %v1516_v37  ;;  %v4481_v37 = vld [vmem:[%s6794_s2 + $0x2d8] sm:$0xf] }
 0x286   : > { %v2705_v18 = vpop.f32.mrf.mxu3 }
 0x287   : > { %v6209_v55 = vadd.f32 %v2705_v18, %v2657_v48  ;;  %v2627_v48 = vadd.f32 %v5908_v46, %v2578_v45  ;;  %v4742_v46 = vld [vmem:[%s6794_s2 + $0x160] sm:$0xf0]  ;;  %v4385_v45 = vld [vmem:[%s6794_s2 + $0x218] sm:$0xf] }
 0x288   : > { %2854 = vmatmul.bf16.gmra.mxu2 %v5897_v32 }
 0x289   : > { %v1499_v29 = vpop.f32.mrf.mxu0  ;;  %v2676_v18 = vadd.f32 %v5968_v41, %v2627_v48 }
 0x28a   : > { %v1517_v53 = vpack.c.bf16 %v1499_v29, %v1499_v29 }
 0x28b   : > { %v2659_v12 = vpop.f32.mrf.mxu2  ;;  %2903 = vmatmul.bf16.gmra.mxu3 %v5870_v33 }
 0x28c   : > { %v1741_v49 = vunpack.c.l.b16 %v1517_v53 }
 0x28d   : > { %v2610_v34 = vpop.f32.mrf.mxu1 }
 0x28e   : > { %v2611_v17 = vadd.f32 %v2610_v34, %v5873_v38  ;;  %v6214_v58 = vpack.c.b16 %v1741_v49, %v1740_v59  ;;  %v2708_v2 = vpop.f32.mrf.mxu3  ;;  %v4482_v34 = vor.u32 %v4790_v52, %v4481_v37  ;;  %v6254_v37 = vperm.slane %v5868_v35, 1 }
 0x28f   : > { %v2583_v35 = vadd.f32 %v5963_v27, %v5873_v38 }
 0x290   : > { %v2660_v11 = vadd.f32 %v2659_v12, %v2611_v17  ;;  %2805 = vmatmul.bf16.gmra.mxu1 %v6214_v58  ;;  %v4577_v17 = vld [vmem:[%s6794_s2 + $0x398] sm:$0xf]  ;;  %3204 = vmatpush.bf16.msra.mxu2 %v4482_v34 }
 0x291   : > { %v2722_v39 = vpop.f32.mrf.mxu0 }
 0x292   : > { %v6219_v62 = vadd.f32 %v2708_v2, %v2660_v11  ;;  %v2723_v53 = vadd.f32 %v2722_v39, %v5955_v20  ;;  %v4289_v20 = vld [vmem:[%s6794_s2 + $0x158] sm:$0xf]  ;;  %v4814_v11 = vld [vmem:[%s6794_s2 + $0x3a0] sm:$0xf0] }
 0x293   : > { %v2661_v29 = vpop.f32.mrf.mxu2  ;;  %v4290_v39 = vor.u32 %v4742_v46, %v4289_v20  ;;  %v4578_v41 = vor.u32 %v4814_v11, %v4577_v17  ;;  %v6846_v11 = vlaneseq }
 0x294   : > { %2917 = vmatmul.bf16.vlgmr.msrb.gmra.mxu0 %v5592_v5 }
 0x295   : > { %v2612_v15 = vpop.f32.mrf.mxu1  ;;  %3106 = vmatpush.bf16.msra.mxu0 %v4290_v39  ;;  %3253 = vmatpush.bf16.msra.mxu3 %v4578_v41  ;;  %v3350_v33 = vshrl.u32 %v6846_v11, 7  ;;  %v2632_v39 = vadd.f32 %v5951_v16, %v2583_v35  ;;  %v4787_v16 = vld [vmem:[%s6794_s2 + $0x2c8] sm:$0xf0] }
 0x296   : > { %v2613_v59 = vadd.f32 %v2612_v15, %v5873_v38  ;;  %v2710_v12 = vpop.f32.mrf.mxu3  ;;  %v4739_v11 = vld [vmem:[%s6794_s2 + $0x148] sm:$0xf0] }
 0x298   : > { %v2662_v49 = vadd.f32 %v2661_v29, %v2613_v59  ;;  %3015 = vmatmul.bf16.vlgmr.msrb.gmra.mxu2 %v5940_v63  ;;  %v4766_v29 = vld [vmem:[%s6794_s2 + $0x220] sm:$0xf0] }
 0x299   : > { %v2724_v2 = vpop.f32.mrf.mxu0  ;;  %v4386_v59 = vor.u32 %v4766_v29, %v4385_v45  ;;  %v2681_v29 = vadd.f32 %v6013_v47, %v2632_v39  ;;  %v4277_v47 = vld [vmem:[%s6794_s2 + $0x140] sm:$0xf]  ;;  %v4763_v39 = vld [vmem:[%s6794_s2 + $0x208] sm:$0xf0] }
 0x29a   : > { %v6251_v15 = vadd.f32 %v2710_v12, %v2662_v49  ;;  %v2725_v48 = vadd.f32 %v2724_v2, %v2676_v18  ;;  %v6265_v2 = vadd.s32 8, %v3350_v33  ;;  %v4278_v35 = vor.u32 %v4739_v11, %v4277_v47 }
 0x29b   : > { %v2820_v52 = vpop.f32.mrf.mxu2  ;;  %3155 = vmatpush.bf16.msra.mxu1 %v4386_v59  ;;  %3064 = vmatmul.bf16.vlgmr.msrb.gmra.mxu3 %v5546_v30  ;;  %v2588_v47 = vadd.f32 %v6006_v10, %v5873_v38 }
 0x29c   : > { %v2821_v17 = vadd.f32 %v2820_v52, %v6254_v37  ;;  %vm3353_vm8 = vcmp.lt.s32.totalorder %v6265_v2, 14  ;;  %3107 = vmatpush.bf16.msra.mxu0 %v4278_v35  ;;  %vm3427_vm0 = vcmp.lt.s32.totalorder %v6265_v2, 13  ;;  %vm3501_vm1 = vcmp.lt.s32.totalorder %v6265_v2, 12 }
 0x29d   : > { %v2771_v20 = vpop.f32.mrf.mxu1  ;;  %v2637_v11 = vadd.f32 %v6010_v21, %v2588_v47  ;;  %v4784_v21 = vld [vmem:[%s6794_s2 + $0x2b0] sm:$0xf0] }
 0x29e   : > { %v2772_v46 = vadd.f32 %v2771_v20, %v2723_v53  ;;  %v2869_v49 = vpop.f32.mrf.mxu3 }
 0x29f   : > { %v6260_v18 = vadd.f32 %v2869_v49, %v2821_v17  ;;  %v4565_v49 = vld [vmem:[%s6794_s2 + $0x380] sm:$0xf] }
 0x2a0   : > { %2966 = vmatmul.bf16.vlgmr.msrb.gmra.mxu1 %v5917_v3  ;;  %v3301_v59 = vmax.f32 %v2772_v46, 0.0 }
 0x2a1   : > { %v2727_v12 = vpop.f32.mrf.mxu0 }
 0x2a2   : > { %v2728_v34 = vadd.f32 %v2727_v12, %v5998_v57  ;;  %v4469_v57 = vld [vmem:[%s6794_s2 + $0x2c0] sm:$0xf] }
 0x2a3   : > { %v2822_v30 = vpop.f32.mrf.mxu2  ;;  %v4470_v17 = vor.u32 %v4787_v16, %v4469_v57 }
 0x2a4   : > { %2922 = vmatmul.bf16.gmra.mxu0 %v5636_v43  ;;  %v2823_v45 = vadd.f32 %v2822_v30, %v6254_v37  ;;  %v4811_v30 = vld [vmem:[%s6794_s2 + $0x388] sm:$0xf0] }
 0x2a5   : > { %v2773_v53 = vpop.f32.mrf.mxu1  ;;  %3205 = vmatpush.bf16.msra.mxu2 %v4470_v17 }
 0x2a6   : > { %v2774_v41 = vadd.f32 %v2773_v53, %v2725_v48  ;;  %v2871_v27 = vpop.f32.mrf.mxu3  ;;  %v4373_v53 = vld [vmem:[%s6794_s2 + $0x200] sm:$0xf] }
 0x2a7   : > { %v6272_v20 = vadd.f32 %v2871_v27, %v2823_v45  ;;  %v4566_v45 = vor.u32 %v4811_v30, %v4565_v49 }
 0x2a8   : > { %v3304_v52 = vmax.f32 %v2774_v41, 0.0  ;;  %3020 = vmatmul.bf16.gmra.mxu2 %v5983_v19 }
 0x2a9   : > { %v2729_v33 = vpop.f32.mrf.mxu0  ;;  %3254 = vmatpush.bf16.msra.mxu3 %v4566_v45 }
 0x2aa   : > { %v3355_v48 = vsel %vm3353_vm8, %v3304_v52, 0.0  ;;  %v2730_v46 = vadd.f32 %v2729_v33, %v2681_v29  ;;  %v4374_v29 = vor.u32 %v4763_v39, %v4373_v53  ;;  %v2686_v53 = vadd.f32 %v6058_v51, %v2637_v11  ;;  %v4265_v51 = vld [vmem:[%s6794_s2 + $0x128] sm:$0xf] }
 0x2ab   : > { %v3370_v12 = vmax.f32 %v3301_v59, %v3355_v48  ;;  %v2825_v41 = vpop.f32.mrf.mxu2  ;;  %3069 = vmatmul.bf16.gmra.mxu3 %v5590_v4 }
 0x2ac   : > { %3156 = vmatpush.bf16.msra.mxu1 %v4374_v29  ;;  %v2826_v27 = vadd.f32 %v2825_v41, %v6254_v37 }
 0x2ad   : > { %v2776_v59 = vpop.f32.mrf.mxu1  ;;  %v3371_v48 = vrot.slane %v3370_v12, 4 }
 0x2ae   : > { %v2777_v52 = vadd.f32 %v2776_v59, %v2728_v34  ;;  %v2874_v33 = vpop.f32.mrf.mxu3 }
 0x2af   : > { %v6304_v57 = vadd.f32 %v2874_v33, %v2826_v27  ;;  %v3372_v49 = vmax.f32 %v3370_v12, %v3371_v48  ;;  %v4736_v27 = vld [vmem:[%s6794_s2 + $0x130] sm:$0xf0]  ;;  %v4553_v33 = vld [vmem:[%s6794_s2 + $0x368] sm:$0xf] }
 0x2b0   : > { %2971 = vmatmul.bf16.gmra.mxu1 %v5965_v1  ;;  %v3307_v39 = vmax.f32 %v2777_v52, 0.0  ;;  %v4266_v47 = vor.u32 %v4736_v27, %v4265_v51  ;;  %v4808_v48 = vld [vmem:[%s6794_s2 + $0x370] sm:$0xf0]  ;;  %v2593_v27 = vadd.f32 %v6054_v8, %v5873_v38 }
 0x2b1   : > { %v2732_v16 = vpop.f32.mrf.mxu0 }
 0x2b2   : > { %v2733_v17 = vadd.f32 %v2732_v16, %v6043_v0  ;;  %v4457_v0 = vld [vmem:[%s6794_s2 + $0x2a8] sm:$0xf]  ;;  %3108 = vmatpush.bf16.msra.mxu0 %v4266_v47 }
 0x2b3   : > { %v2827_v4 = vpop.f32.mrf.mxu2  ;;  %v4458_v52 = vor.u32 %v4784_v21, %v4457_v0 }
 0x2b4   : > { %2927 = vmatmul.bf16.gmra.mxu0 %v5680_v26  ;;  %v2828_v30 = vadd.f32 %v2827_v4, %v6254_v37  ;;  %v4361_v4 = vld [vmem:[%s6794_s2 + $0x1e8] sm:$0xf] }
 0x2b5   : > { %v2778_v34 = vpop.f32.mrf.mxu1  ;;  %3206 = vmatpush.bf16.msra.mxu2 %v4458_v52 }
 0x2b6   : > { %v2779_v35 = vadd.f32 %v2778_v34, %v2730_v46  ;;  %v2876_v45 = vpop.f32.mrf.mxu3  ;;  %v3373_v46 = vrot.slane %v3372_v49, 2  ;;  %v4760_v34 = vld [vmem:[%s6794_s2 + $0x1f0] sm:$0xf0] }
 0x2b7   : > { %v6313_v29 = vadd.f32 %v2876_v45, %v2828_v30  ;;  %v4362_v30 = vor.u32 %v4760_v34, %v4361_v4 }
 0x2b8   : > { %v3310_v41 = vmax.f32 %v2779_v35, 0.0  ;;  %3025 = vmatmul.bf16.gmra.mxu2 %v6031_v44  ;;  %v4554_v35 = vor.u32 %v4808_v48, %v4553_v33  ;;  %v3374_v45 = vmax.f32 %v3372_v49, %v3373_v46 }
 0x2b9   : > { %v2734_v10 = vpop.f32.mrf.mxu0  ;;  %3157 = vmatpush.bf16.msra.mxu1 %v4362_v30 }
 0x2ba   : > { %v3357_v12 = vsel %vm3353_vm8, %v3310_v41, 0.0  ;;  %v2735_v59 = vadd.f32 %v2734_v10, %v2686_v53  ;;  %3255 = vmatpush.bf16.msra.mxu3 %v4554_v35  ;;  %v3375_v33 = vrot.slane %v3374_v45, 1 }
 0x2bb   : > { %v3377_v16 = vmax.f32 %v3307_v39, %v3357_v12  ;;  %v2830_v11 = vpop.f32.mrf.mxu2  ;;  %3074 = vmatmul.bf16.gmra.mxu3 %v5634_v42 }
 0x2bc   : > { %v2831_v0 = vadd.f32 %v2830_v11, %v6254_v37  ;;  %v3376_v4 = vmax.f32 %v3374_v45, %v3375_v33  ;;  %v4805_v33 = vld [vmem:[%s6794_s2 + $0x358] sm:$0xf0] }
 0x2bd   : > { %v3378_v53 = vrot.slane %v3377_v16, 4  ;;  %v2781_v39 = vpop.f32.mrf.mxu1 }
 0x2be   : > { %v2782_v41 = vadd.f32 %v2781_v39, %v2733_v17  ;;  %v2879_v21 = vpop.f32.mrf.mxu3 }
 0x2bf   : > { %v3379_v10 = vmax.f32 %v3377_v16, %v3378_v53  ;;  %v6345_v12 = vadd.f32 %v2879_v21, %v2831_v0  ;;  %v2642_v16 = vadd.f32 %v6056_v24, %v2593_v27  ;;  %v4445_v24 = vld [vmem:[%s6794_s2 + $0x290] sm:$0xf]  ;;  %v4733_v21 = vld [vmem:[%s6794_s2 + $0x118] sm:$0xf0] }
 0x2c0   : > { %2976 = vmatmul.bf16.gmra.mxu1 %v6008_v6  ;;  %v3313_v8 = vmax.f32 %v2782_v41, 0.0 }
 0x2c1   : > { %v3380_v51 = vrot.slane %v3379_v10, 2  ;;  %v2737_v52 = vpop.f32.mrf.mxu0  ;;  %v2691_v35 = vadd.f32 %v6099_v56, %v2642_v16  ;;  %v4253_v56 = vld [vmem:[%s6794_s2 + $0x110] sm:$0xf] }
 0x2c2   : > { %v2738_v42 = vadd.f32 %v2737_v52, %v6088_v22  ;;  %v4254_v27 = vor.u32 %v4733_v21, %v4253_v56 }
 0x2c3   : > { %v3381_v17 = vmax.f32 %v3379_v10, %v3380_v51  ;;  %v2832_v47 = vpop.f32.mrf.mxu2  ;;  %v4541_v51 = vld [vmem:[%s6794_s2 + $0x350] sm:$0xf] }
 0x2c4   : > { %2932 = vmatmul.bf16.gmra.mxu0 %v5722_v50  ;;  %v2833_v11 = vadd.f32 %v2832_v47, %v6254_v37  ;;  %v4757_v47 = vld [vmem:[%s6794_s2 + $0x1d8] sm:$0xf0] }
 0x2c5   : > { %v3382_v49 = vrot.slane %v3381_v17, 1  ;;  %v2783_v46 = vpop.f32.mrf.mxu1  ;;  %3109 = vmatpush.bf16.msra.mxu0 %v4254_v27 }
 0x2c6   : > { %v2784_v48 = vadd.f32 %v2783_v46, %v2735_v59  ;;  %v2881_v22 = vpop.f32.mrf.mxu3  ;;  %v4781_v59 = vld [vmem:[%s6794_s2 + $0x298] sm:$0xf0]  ;;  %v4542_v46 = vor.u32 %v4805_v33, %v4541_v51 }
 0x2c7   : > { %v3383_v34 = vmax.f32 %v3381_v17, %v3382_v49  ;;  %v6355_v39 = vadd.f32 %v2881_v22, %v2833_v11  ;;  %v4446_v0 = vor.u32 %v4781_v59, %v4445_v24  ;;  %v4349_v17 = vld [vmem:[%s6794_s2 + $0x1d0] sm:$0xf]  ;;  %v2598_v24 = vadd.f32 %v6109_v14, %v5873_v38 }
 0x2c8   : > { %v3316_v30 = vmax.f32 %v2784_v48, 0.0  ;;  %3030 = vmatmul.bf16.gmra.mxu2 %v6073_v23  ;;  %v4350_v16 = vor.u32 %v4757_v47, %v4349_v17  ;;  %3256 = vmatpush.bf16.msra.mxu3 %v4542_v46 }
 0x2c9   : > { %v3583_v53 = vsel %vm3582_vm9, %v3383_v34, %v3376_v4  ;;  %v2739_v10 = vpop.f32.mrf.mxu0  ;;  %3207 = vmatpush.bf16.msra.mxu2 %v4446_v0  ;;  %v2647_v0 = vadd.f32 %v6122_v61, %v2598_v24  ;;  %v4433_v61 = vld [vmem:[%s6794_s2 + $0x278] sm:$0xf] }
 0x2ca   : > { %v3359_v41 = vsel %vm3353_vm8, %v3316_v30, 0.0  ;;  %v2740_v45 = vadd.f32 %v2739_v10, %v2691_v35  ;;  %3158 = vmatpush.bf16.msra.mxu1 %v4350_v16  ;;  %v4730_v16 = vld [vmem:[%s6794_s2 + $0x100] sm:$0xf0] }
 0x2cb   : > { %v3384_v52 = vmax.f32 %v3313_v8, %v3359_v41  ;;  %v2835_v49 = vpop.f32.mrf.mxu2  ;;  %3079 = vmatmul.bf16.gmra.mxu3 %v5678_v25  ;;  %v2696_v27 = vadd.f32 %v6138_v31, %v2647_v0  ;;  %v4241_v31 = vld [vmem:[%s6794_s2 + $0xf8] sm:$0xf] }
 0x2cc   : > { %v2836_v35 = vadd.f32 %v2835_v49, %v6254_v37 }
 0x2cd   : > { %v3385_v48 = vrot.slane %v3384_v52, 4  ;;  %v2786_v4 = vpop.f32.mrf.mxu1 }
 0x2ce   : > { %v2787_v34 = vadd.f32 %v2786_v4, %v2738_v42  ;;  %v2884_v8 = vpop.f32.mrf.mxu3 }
 0x2cf   : > { %v3386_v11 = vmax.f32 %v3384_v52, %v3385_v48  ;;  %v6387_v22 = vadd.f32 %v2884_v8, %v2836_v35  ;;  %v4529_v48 = vld [vmem:[%s6794_s2 + $0x338] sm:$0xf]  ;;  %v4754_v8 = vld [vmem:[%s6794_s2 + $0x1c0] sm:$0xf0] }
 0x2d0   : > { %2981 = vmatmul.bf16.gmra.mxu1 %v6051_v9  ;;  %v3319_v33 = vmax.f32 %v2787_v34, 0.0  ;;  %v4242_v34 = vor.u32 %v4730_v16, %v4241_v31  ;;  %v4337_v35 = vld [vmem:[%s6794_s2 + $0x1b8] sm:$0xf] }
 0x2d1   : > { %v3387_v30 = vrot.slane %v3386_v11, 2  ;;  %v2742_v10 = vpop.f32.mrf.mxu0  ;;  %v4338_v24 = vor.u32 %v4754_v8, %v4337_v35  ;;  %v6850_v8 = vld [vmem:[#allocation20_spill] sm:$0xff] }
 0x2d2   : > { %v2743_v25 = vadd.f32 %v2742_v10, %v6128_v40  ;;  %3110 = vmatpush.bf16.msra.mxu0 %v4242_v34 }
 0x2d3   : > { %v3388_v59 = vmax.f32 %v3386_v11, %v3387_v30  ;;  %v2837_v56 = vpop.f32.mrf.mxu2  ;;  %v4802_v11 = vld [vmem:[%s6794_s2 + $0x340] sm:$0xf0]  ;;  %3159 = vmatpush.bf16.msra.mxu1 %v4338_v24 }
 0x2d4   : > { %2937 = vmatmul.bf16.gmra.mxu0 %v5759_v54  ;;  %v2838_v52 = vadd.f32 %v2837_v56, %v6254_v37  ;;  %v4530_v10 = vor.u32 %v4802_v11, %v4529_v48  ;;  %v6847_v56 = vld [vmem:[#allocation8_spill] sm:$0xff] }
 0x2d5   : > { %v3389_v42 = vrot.slane %v3388_v59, 1  ;;  %v2788_v41 = vpop.f32.mrf.mxu1 }
 0x2d6   : > { %v2789_v21 = vadd.f32 %v2788_v41, %v2740_v45  ;;  %v2886_v38 = vpop.f32.mrf.mxu3  ;;  %v4778_v45 = vld [vmem:[%s6794_s2 + $0x280] sm:$0xf0]  ;;  %3257 = vmatpush.bf16.msra.mxu3 %v4530_v10  ;;  %v4229_v10 = vld [vmem:[%s6794_s2 + $0xe0] sm:$0xf] }
 0x2d7   : > { %v3390_v51 = vmax.f32 %v3388_v59, %v3389_v42  ;;  %v6397_v40 = vadd.f32 %v2886_v38, %v2838_v52  ;;  %v4434_v46 = vor.u32 %v4778_v45, %v4433_v61  ;;  %v6848_v52 = vld [vmem:[#allocation19_spill] sm:$0xff] }
 0x2d8   : > { %v3322_v17 = vmax.f32 %v2789_v21, 0.0  ;;  %3035 = vmatmul.bf16.gmra.mxu2 %v6111_v7  ;;  %v6849_v45 = vld [vmem:[#allocation11_spill] sm:$0xff] }
 0x2d9   : > { %v3585_v14 = vsel %vm3584_vm10, %v3390_v51, %v3583_v53  ;;  %v2744_v47 = vpop.f32.mrf.mxu0  ;;  %3208 = vmatpush.bf16.msra.mxu2 %v4434_v46 }
 0x2da   : > { %v3361_v53 = vsel %vm3353_vm8, %v3322_v17, 0.0  ;;  %v2745_v49 = vadd.f32 %v2744_v47, %v2696_v27 }
 0x2db   : > { %v3391_v4 = vmax.f32 %v3319_v33, %v3361_v53  ;;  %v2840_v30 = vpop.f32.mrf.mxu2  ;;  %3084 = vmatmul.bf16.gmra.mxu3 %v6847_v56  ;;  %v4727_v56 = vld [vmem:[%s6794_s2 + $0xe8] sm:$0xf0] }
 0x2dc   : > { %v2841_v21 = vadd.f32 %v2840_v30, %v6254_v37  ;;  %v4421_v30 = vld [vmem:[%s6794_s2 + $0x260] sm:$0xf] }
 0x2dd   : > { %v3392_v59 = vrot.slane %v3391_v4, 4  ;;  %v2791_v42 = vpop.f32.mrf.mxu1 }
 0x2de   : > { %v2792_v41 = vadd.f32 %v2791_v42, %v2743_v25  ;;  %v2889_v51 = vpop.f32.mrf.mxu3  ;;  %v4517_v42 = vld [vmem:[%s6794_s2 + $0x320] sm:$0xf] }
 0x2df   : > { %v3393_v0 = vmax.f32 %v3391_v4, %v3392_v59  ;;  %v6429_v33 = vadd.f32 %v2889_v51, %v2841_v21  ;;  %v4799_v21 = vld [vmem:[%s6794_s2 + $0x328] sm:$0xf0]  ;;  %v4325_v51 = vld [vmem:[%s6794_s2 + $0x1a0] sm:$0xf] }
 0x2e0   : > { %2986 = vmatmul.bf16.gmra.mxu1 %v6848_v52  ;;  %v3325_v48 = vmax.f32 %v2792_v41, 0.0 }
 0x2e1   : > { %v3394_v27 = vrot.slane %v3393_v0, 2  ;;  %v2747_v17 = vpop.f32.mrf.mxu0 }
 0x2e2   : > { %v2748_v38 = vadd.f32 %v2747_v17, %v6163_v36  ;;  %v4518_v17 = vor.u32 %v4799_v21, %v4517_v42  ;;  %v6853_v42 = vld [vmem:[#allocation15_spill] sm:$0xff] }
 0x2e3   : > { %v3395_v47 = vmax.f32 %v3393_v0, %v3394_v27  ;;  %v2842_v61 = vpop.f32.mrf.mxu2  ;;  %v4230_v0 = vor.u32 %v4727_v56, %v4229_v10 }
 0x2e4   : > { %2942 = vmatmul.bf16.gmra.mxu0 %v6849_v45  ;;  %v2843_v16 = vadd.f32 %v2842_v61, %v6254_v37  ;;  %3258 = vmatpush.bf16.msra.mxu3 %v4518_v17 }
 0x2e5   : > { %v3396_v31 = vrot.slane %v3395_v47, 1  ;;  %v2793_v25 = vpop.f32.mrf.mxu1  ;;  %3111 = vmatpush.bf16.msra.mxu0 %v4230_v0  ;;  %v4772_v0 = vld [vmem:[%s6794_s2 + $0x250] sm:$0xf0] }
 0x2e6   : > { %v2794_v53 = vadd.f32 %v2793_v25, %v2745_v49  ;;  %v2891_v34 = vpop.f32.mrf.mxu3  ;;  %v4775_v49 = vld [vmem:[%s6794_s2 + $0x268] sm:$0xf0] }
 0x2e7   : > { %v3397_v46 = vmax.f32 %v3395_v47, %v3396_v31  ;;  %v6435_v35 = vadd.f32 %v2891_v34, %v2843_v16  ;;  %v4422_v59 = vor.u32 %v4775_v49, %v4421_v30  ;;  %v6851_v31 = vld [vmem:[#allocation10_spill] sm:$0xff]  ;;  %v4217_v34 = vld [vmem:[%s6794_s2 + $0xc8] sm:$0xf] }
 0x2e8   : > { %v3328_v4 = vmax.f32 %v2794_v53, 0.0  ;;  %3040 = vmatmul.bf16.gmra.mxu2 %v6850_v8 }
 0x2e9   : > { %v3587_v11 = vsel %vm3586_vm11, %v3397_v46, %v3585_v14  ;;  %v2749_v36 = vpop.f32.mrf.mxu0  ;;  %3209 = vmatpush.bf16.msra.mxu2 %v4422_v59 }
 0x2ea   : > { %v3363_v14 = vsel %vm3353_vm8, %v3328_v4, 0.0  ;;  %v2750_v24 = vadd.f32 %v2749_v36, %v6173_v13  ;;  %v4751_v13 = vld [vmem:[%s6794_s2 + $0x1a8] sm:$0xf0]  ;;  %v4724_v36 = vld [vmem:[%s6794_s2 + $0xd0] sm:$0xf0] }
 0x2eb   : > { %v3398_v41 = vmax.f32 %v3325_v48, %v3363_v14  ;;  %v2845_v27 = vpop.f32.mrf.mxu2  ;;  %v4326_v47 = vor.u32 %v4751_v13, %v4325_v51  ;;  %3089 = vmatmul.bf16.gmra.mxu3 %v6851_v31  ;;  %v6852_v4 = vld [vmem:[#allocation12_spill] sm:$0xff]  ;;  %v4218_v10 = vor.u32 %v4724_v36, %v4217_v34 }
 0x2ec   : > { %v2846_v16 = vadd.f32 %v2845_v27, %v6254_v37  ;;  %v4313_v31 = vld [vmem:[%s6794_s2 + $0x188] sm:$0xf] }
 0x2ed   : > { %v3399_v61 = vrot.slane %v3398_v41, 4  ;;  %v2796_v25 = vpop.f32.mrf.mxu1  ;;  %3160 = vmatpush.bf16.msra.mxu1 %v4326_v47  ;;  %3112 = vmatpush.bf16.msra.mxu0 %v4218_v10  ;;  %v4505_v47 = vld [vmem:[%s6794_s2 + $0x308] sm:$0xf] }
 0x2ee   : > { %v2797_v53 = vadd.f32 %v2796_v25, %v2748_v38  ;;  %v2894_v48 = vpop.f32.mrf.mxu3 }
 0x2ef   : > { %v3400_v46 = vmax.f32 %v3398_v41, %v3399_v61  ;;  %v6474_v49 = vadd.f32 %v2894_v48, %v2846_v16  ;;  %v4409_v41 = vld [vmem:[%s6794_s2 + $0x248] sm:$0xf]  ;;  %v4796_v61 = vld [vmem:[%s6794_s2 + $0x310] sm:$0xf0] }
 0x2f0   : > { %2991 = vmatmul.bf16.gmra.mxu1 %v6852_v4  ;;  %v4410_v13 = vor.u32 %v4772_v0, %v4409_v41  ;;  %v4506_v16 = vor.u32 %v4796_v61, %v4505_v47  ;;  %v3331_v34 = vmax.f32 %v2797_v53, 0.0 }
 0x2f1   : > { %v3401_v30 = vrot.slane %v3400_v46, 2  ;;  %v2752_v38 = vpop.f32.mrf.mxu0 }
 0x2f2   : > { %v2753_v14 = vadd.f32 %v2752_v38, %v6196_v28  ;;  %3210 = vmatpush.bf16.msra.mxu2 %v4410_v13  ;;  %3259 = vmatpush.bf16.msra.mxu3 %v4506_v16  ;;  %v6857_v16 = vld [vmem:[#allocation17_spill] sm:$0xff] }
 0x2f3   : > { %v3402_v59 = vmax.f32 %v3400_v46, %v3401_v30  ;;  %v2847_v56 = vpop.f32.mrf.mxu2  ;;  %v6854_v30 = vld [vmem:[#allocation21_spill] sm:$0xff] }
 0x2f4   : > { %2947 = vmatmul.bf16.gmra.mxu0 %v6853_v42  ;;  %v2848_v28 = vadd.f32 %v2847_v56, %v6254_v37 }
 0x2f5   : > { %v3403_v21 = vrot.slane %v3402_v59, 1  ;;  %v2798_v51 = vpop.f32.mrf.mxu1 }
 0x2f6   : > { %v2799_v27 = vadd.f32 %v2798_v51, %v2750_v24  ;;  %v2896_v46 = vpop.f32.mrf.mxu3  ;;  %v4748_v24 = vld [vmem:[%s6794_s2 + $0x190] sm:$0xf0] }
 0x2f7   : > { %v3404_v17 = vmax.f32 %v3402_v59, %v3403_v21  ;;  %v6498_v36 = vadd.f32 %v2896_v46, %v2848_v28  ;;  %v4314_v10 = vor.u32 %v4748_v24, %v4313_v31  ;;  %v6855_v51 = vld [vmem:[#allocation13_spill] sm:$0xff]  ;;  %v6856_v28 = vld [vmem:[#allocation18_spill] sm:$0xff] }
 0x2f8   : > { %v3334_v25 = vmax.f32 %v2799_v27, 0.0  ;;  %3045 = vmatmul.bf16.gmra.mxu2 %v6854_v30 }
 0x2f9   : > { %v3589_v48 = vsel %vm3588_vm12, %v3404_v17, %v3587_v11  ;;  %v2754_v38 = vpop.f32.mrf.mxu0  ;;  %3161 = vmatpush.bf16.msra.mxu1 %v4314_v10 }
 0x2fa   : > { %v3365_v59 = vsel %vm3353_vm8, %v3334_v25, 0.0  ;;  %v2755_v56 = vadd.f32 %v2754_v38, %v6209_v55 }
 0x2fb   : > { %v3405_v41 = vmax.f32 %v3331_v34, %v3365_v59  ;;  %v2850_v0 = vpop.f32.mrf.mxu2  ;;  %3094 = vmatmul.bf16.gmra.mxu3 %v6855_v51 }
 0x2fc   : > { %v2851_v27 = vadd.f32 %v2850_v0, %v6254_v37 }
 0x2fd   : > { %v3406_v21 = vrot.slane %v3405_v41, 4  ;;  %v2801_v11 = vpop.f32.mrf.mxu1 }
 0x2fe   : > { %v2802_v53 = vadd.f32 %v2801_v11, %v2753_v14  ;;  %v2899_v17 = vpop.f32.mrf.mxu3 }
 0x2ff   : > { %v3407_v13 = vmax.f32 %v3405_v41, %v3406_v21  ;;  %v6507_v61 = vadd.f32 %v2899_v17, %v2851_v27 }
 0x300   : > { %2996 = vmatmul.bf16.gmra.mxu1 %v6856_v28  ;;  %v3337_v21 = vmax.f32 %v2802_v53, 0.0 }
 0x301   : > { %v3408_v47 = vrot.slane %v3407_v13, 2  ;;  %v2757_v31 = vpop.f32.mrf.mxu0 }
 0x302   : > { %v2758_v55 = vadd.f32 %v2757_v31, %v6219_v62 }
 0x303   : > { %v3409_v25 = vmax.f32 %v3407_v13, %v3408_v47  ;;  %v2852_v46 = vpop.f32.mrf.mxu2 }
 0x304   : > { %2952 = vmatmul.bf16.gmra.mxu0 %v6857_v16  ;;  %v2853_v10 = vadd.f32 %v2852_v46, %v6254_v37 }
 0x305   : > { %v3410_v24 = vrot.slane %v3409_v25, 1  ;;  %v2803_v34 = vpop.f32.mrf.mxu1 }
 0x306   : > { %v2804_v14 = vadd.f32 %v2803_v34, %v2755_v56  ;;  %v2901_v41 = vpop.f32.mrf.mxu3 }
 0x307   : > { %v3411_v38 = vmax.f32 %v3409_v25, %v3410_v24  ;;  %v6513_v51 = vadd.f32 %v2901_v41, %v2853_v10  ;;  %v6858_v10 = vld [vmem:[#allocation3_spill] sm:$0xff] }
 0x308   : > { %v3340_v59 = vmax.f32 %v2804_v14, 0.0  ;;  %3050 = vmatmul.bf16.gmra.mxu2 %v6214_v58 }
 0x309   : > { %v3591_v0 = vsel %vm3590_vm13, %v3411_v38, %v3589_v48  ;;  %v2759_v62 = vpop.f32.mrf.mxu0 }
 0x30a   : > { %v3367_v11 = vsel %vm3353_vm8, %v3340_v59, 0.0  ;;  %v2760_v13 = vadd.f32 %v2759_v62, %v6251_v15 }
 0x30b   : > { %v3412_v27 = vmax.f32 %v3337_v21, %v3367_v11  ;;  %v2855_v56 = vpop.f32.mrf.mxu2  ;;  %3099 = vmatmul.bf16.gmra.mxu3 %v5897_v32 }
 0x30c   : > { %v2856_v48 = vadd.f32 %v2855_v56, %v6254_v37 }
 0x30d   : > { %v3413_v17 = vrot.slane %v3412_v27, 4  ;;  %v2806_v47 = vpop.f32.mrf.mxu1 }
 0x30e   : > { %v2807_v31 = vadd.f32 %v2806_v47, %v2758_v55  ;;  %v2904_v53 = vpop.f32.mrf.mxu3 }
 0x30f   : > { %v3414_v25 = vmax.f32 %v3412_v27, %v3413_v17  ;;  %v6522_v24 = vadd.f32 %v2904_v53, %v2856_v48 }
 0x310   : > { %3001 = vmatmul.bf16.gmra.mxu1 %v5938_v60  ;;  %v3343_v27 = vmax.f32 %v2807_v31, 0.0 }
 0x311   : > { %v3415_v46 = vrot.slane %v3414_v25, 2  ;;  %v2918_v34 = vpop.f32.mrf.mxu0 }
 0x312   : > { %v2919_v14 = vadd.f32 %v2918_v34, %v6260_v18 }
 0x313   : > { %v3416_v15 = vmax.f32 %v3414_v25, %v3415_v46  ;;  %v2857_v38 = vpop.f32.mrf.mxu2 }
 0x314   : > { %3113 = vmatmul.bf16.vlgmr.msra.gmra.mxu0 %v6858_v10  ;;  %v2858_v21 = vadd.f32 %v2857_v38, %v6254_v37 }
 0x315   : > { %v3417_v59 = vrot.slane %v3416_v15, 1  ;;  %v2808_v32 = vpop.f32.mrf.mxu1 }
 0x316   : > { %v2809_v41 = vadd.f32 %v2808_v32, %v2760_v13  ;;  %v2906_v11 = vpop.f32.mrf.mxu3 }
 0x317   : > { %v3418_v55 = vmax.f32 %v3416_v15, %v3417_v59  ;;  %v6527_v56 = vadd.f32 %v2906_v11, %v2858_v21 }
 0x318   : > { %v3346_v62 = vmax.f32 %v2809_v41, 0.0  ;;  %3211 = vmatmul.bf16.vlgmr.msra.gmra.mxu2 %v5917_v3 }
 0x319   : > { %v2920_v17 = vpop.f32.mrf.mxu0  ;;  %v3593_v18 = vsel %vm3592_vm14, %v3418_v55, %v3591_v0 }
 0x31a   : > { %v3369_v47 = vsel %vm3353_vm8, %v3346_v62, 0.0  ;;  %v2921_v25 = vadd.f32 %v2920_v17, %v6272_v20  ;;  %v6859_v20 = vld [vmem:[#allocation4_spill] sm:$0xff] }
 0x31b   : > { %v3419_v13 = vmax.f32 %v3343_v27, %v3369_v47  ;;  %v3016_v48 = vpop.f32.mrf.mxu2  ;;  %3260 = vmatmul.bf16.vlgmr.msra.gmra.mxu3 %v5940_v63 }
 0x31d   : > { %v3420_v53 = vrot.slane %v3419_v13, 4  ;;  %v2967_v37 = vpop.f32.mrf.mxu1 }
 0x31e   : > { %v2968_v46 = vadd.f32 %v2967_v37, %v2919_v14  ;;  %v6535_v15 = vpop.f32.mrf.mxu3 }
 0x31f   : > { %v3421_v31 = vmax.f32 %v3419_v13, %v3420_v53 }
 0x320   : > { %v3017_v34 = vadd.f32 %v3016_v48, %v2968_v46  ;;  %3162 = vmatmul.bf16.vlgmr.msra.gmra.mxu1 %v5592_v5 }
 0x321   : > { %v3422_v3 = vrot.slane %v3421_v31, 2  ;;  %v2923_v0 = vpop.f32.mrf.mxu0 }
 0x322   : > { %v2924_v38 = vadd.f32 %v2923_v0, %v6304_v57  ;;  %v3302_v27 = vmax.f32 %v3017_v34, 0.0 }
 0x323   : > { %v3423_v10 = vmax.f32 %v3421_v31, %v3422_v3  ;;  %v3018_v59 = vpop.f32.mrf.mxu2 }
 0x324   : > { %3118 = vmatmul.bf16.gmra.mxu0 %v6859_v20 }
 0x325   : > { %v3424_v32 = vrot.slane %v3423_v10, 1  ;;  %v2969_v41 = vpop.f32.mrf.mxu1 }
 0x326   : > { %v2970_v55 = vadd.f32 %v2969_v41, %v2921_v25  ;;  %v6540_v21 = vpop.f32.mrf.mxu3 }
 0x327   : > { %v3425_v63 = vmax.f32 %v3423_v10, %v3424_v32 }
 0x328   : > { %v3019_v14 = vadd.f32 %v3018_v59, %v2970_v55  ;;  %3216 = vmatmul.bf16.gmra.mxu2 %v5965_v1 }
 0x329   : > { %v2925_v5 = vpop.f32.mrf.mxu0  ;;  %v6545_v62 = vsel %vm3594_vm15, %v3425_v63, %v3593_v18 }
 0x32a   : > { %v3305_v57 = vmax.f32 %v3019_v14, 0.0  ;;  %v2926_v11 = vadd.f32 %v2925_v5, %v6313_v29  ;;  %v6860_v29 = vld [vmem:[#allocation5_spill] sm:$0xff] }
 0x32b   : > { %v3021_v47 = vpop.f32.mrf.mxu2  ;;  %3265 = vmatmul.bf16.gmra.mxu3 %v5983_v19 }
 0x32c   : > { %v3429_v17 = vsel %vm3427_vm0, %v3305_v57, 0.0 }
 0x32d   : > { %v3444_v25 = vmax.f32 %v3302_v27, %v3429_v17  ;;  %v2972_v13 = vpop.f32.mrf.mxu1 }
 0x32e   : > { %v2973_v48 = vadd.f32 %v2972_v13, %v2924_v38  ;;  %v6551_v37 = vpop.f32.mrf.mxu3  ;;  %v6861_v13 = vld [vmem:[#allocation6_spill] sm:$0xff] }
 0x32f   : > { %v3445_v31 = vrot.slane %v3444_v25, 4 }
 0x330   : > { %v3022_v53 = vadd.f32 %v3021_v47, %v2973_v48  ;;  %3167 = vmatmul.bf16.gmra.mxu1 %v5636_v43 }
 0x331   : > { %v2928_v1 = vpop.f32.mrf.mxu0  ;;  %v3446_v19 = vmax.f32 %v3444_v25, %v3445_v31 }
 0x332   : > { %v2929_v18 = vadd.f32 %v2928_v1, %v6345_v12  ;;  %v3308_v43 = vmax.f32 %v3022_v53, 0.0 }
 0x333   : > { %v3023_v46 = vpop.f32.mrf.mxu2  ;;  %v3447_v41 = vrot.slane %v3446_v19, 2 }
 0x334   : > { %3123 = vmatmul.bf16.gmra.mxu0 %v6860_v29 }
 0x335   : > { %v2974_v34 = vpop.f32.mrf.mxu1 }
 0x336   : > { %v2975_v3 = vadd.f32 %v2974_v34, %v2926_v11  ;;  %v6556_v10 = vpop.f32.mrf.mxu3 }
 0x338   : > { %v3024_v0 = vadd.f32 %v3023_v46, %v2975_v3  ;;  %3221 = vmatmul.bf16.gmra.mxu2 %v6008_v6  ;;  %v3448_v6 = vmax.f32 %v3446_v19, %v3447_v41 }
 0x339   : > { %v2930_v38 = vpop.f32.mrf.mxu0 }
 0x33a   : > { %v3311_v59 = vmax.f32 %v3024_v0, 0.0  ;;  %v2931_v20 = vadd.f32 %v2930_v38, %v6355_v39  ;;  %v3449_v48 = vrot.slane %v3448_v6, 1 }
 0x33b   : > { %v3026_v32 = vpop.f32.mrf.mxu2  ;;  %3270 = vmatmul.bf16.gmra.mxu3 %v6031_v44 }
 0x33c   : > { %v3431_v12 = vsel %vm3427_vm0, %v3311_v59, 0.0  ;;  %v3450_v31 = vmax.f32 %v3448_v6, %v3449_v48 }
 0x33d   : > { %v3451_v55 = vmax.f32 %v3308_v43, %v3431_v12  ;;  %v2977_v63 = vpop.f32.mrf.mxu1 }
 0x33e   : > { %v2978_v14 = vadd.f32 %v2977_v63, %v2929_v18  ;;  %v6563_v11 = vpop.f32.mrf.mxu3 }
 0x33f   : > { %v3452_v5 = vrot.slane %v3451_v55, 4 }
 0x340   : > { %v3027_v57 = vadd.f32 %v3026_v32, %v2978_v14  ;;  %3172 = vmatmul.bf16.gmra.mxu1 %v5680_v26 }
 0x341   : > { %v3453_v27 = vmax.f32 %v3451_v55, %v3452_v5  ;;  %v2933_v39 = vpop.f32.mrf.mxu0 }
 0x342   : > { %v2934_v17 = vadd.f32 %v2933_v39, %v6387_v22  ;;  %v3314_v19 = vmax.f32 %v3027_v57, 0.0  ;;  %v6862_v57 = vld [vmem:[#allocation7_spill] sm:$0xff] }
 0x343   : > { %v3454_v47 = vrot.slane %v3453_v27, 2  ;;  %v3028_v25 = vpop.f32.mrf.mxu2 }
 0x344   : > { %3128 = vmatmul.bf16.gmra.mxu0 %v6861_v13  ;;  %v4824_v13 = vld [vmem:[%s6796_s4 + $0x30] sm:$0xff] }
 0x345   : > { %v3455_v53 = vmax.f32 %v3453_v27, %v3454_v47  ;;  %v2979_v44 = vpop.f32.mrf.mxu1 }
 0x346   : > { %v2980_v1 = vadd.f32 %v2979_v44, %v2931_v20  ;;  %v6568_v29 = vpop.f32.mrf.mxu3 }
 0x347   : > { %v3456_v18 = vrot.slane %v3455_v53, 1 }
 0x348   : > { %v3029_v46 = vadd.f32 %v3028_v25, %v2980_v1  ;;  %3226 = vmatmul.bf16.gmra.mxu2 %v6051_v9 }
 0x349   : > { %v3457_v34 = vmax.f32 %v3455_v53, %v3456_v18  ;;  %v2935_v26 = vpop.f32.mrf.mxu0 }
 0x34a   : > { %v3317_v3 = vmax.f32 %v3029_v46, 0.0  ;;  %v2936_v22 = vadd.f32 %v2935_v26, %v6397_v40 }
 0x34b   : > { %v3605_v0 = vsel %vm3582_vm9, %v3457_v34, %v3450_v31  ;;  %v3031_v59 = vpop.f32.mrf.mxu2  ;;  %3275 = vmatmul.bf16.gmra.mxu3 %v6073_v23  ;;  %v4825_v23 = vld [vmem:[%s6796_s4 + $0x38] sm:$0xff] }
 0x34c   : > { %v3433_v38 = vsel %vm3427_vm0, %v3317_v3, 0.0  ;;  %3828 = vmatpush.bf16.msrb.mxu0 %v4825_v23 }
 0x34d   : > { %v3458_v20 = vmax.f32 %v3314_v19, %v3433_v38  ;;  %v2982_v43 = vpop.f32.mrf.mxu1 }
 0x34e   : > { %v2983_v12 = vadd.f32 %v2982_v43, %v2934_v17  ;;  %v6576_v55 = vpop.f32.mrf.mxu3 }
 0x34f   : > { %v3459_v32 = vrot.slane %v3458_v20, 4 }
 0x350   : > { %v3032_v41 = vadd.f32 %v3031_v59, %v2983_v12  ;;  %3177 = vmatmul.bf16.gmra.mxu1 %v5722_v50  ;;  %3829 = vmatpush.bf16.msrb.mxu0 %v4824_v13 }
 0x351   : > { %v3460_v9 = vmax.f32 %v3458_v20, %v3459_v32  ;;  %v2938_v40 = vpop.f32.mrf.mxu0  ;;  %v6863_v20 = vld [vmem:[#allocation9_spill] sm:$0xff] }
 0x352   : > { %v2939_v63 = vadd.f32 %v2938_v40, %v6429_v33  ;;  %v3320_v44 = vmax.f32 %v3032_v41, 0.0 }
 0x353   : > { %v3461_v14 = vrot.slane %v3460_v9, 2  ;;  %v3033_v5 = vpop.f32.mrf.mxu2 }
 0x354   : > { %3133 = vmatmul.bf16.gmra.mxu0 %v6862_v57 }
 0x355   : > { %v3462_v6 = vmax.f32 %v3460_v9, %v3461_v14  ;;  %v2984_v27 = vpop.f32.mrf.mxu1 }
 0x356   : > { %v2985_v39 = vadd.f32 %v2984_v27, %v2936_v22  ;;  %v6584_v25 = vpop.f32.mrf.mxu3 }
 0x357   : > { %v3463_v17 = vrot.slane %v3462_v6, 1 }
 0x358   : > { %v3034_v47 = vadd.f32 %v3033_v5, %v2985_v39  ;;  %3231 = vmatmul.bf16.gmra.mxu2 %v6848_v52  ;;  %v4823_v52 = vld [vmem:[%s6796_s4 + $0x28] sm:$0xff]  ;;  %v4820_v5 = vld [vmem:[%s6796_s4 + $0x10] sm:$0xff] }
 0x359   : > { %v3464_v50 = vmax.f32 %v3462_v6, %v3463_v17  ;;  %v2940_v33 = vpop.f32.mrf.mxu0  ;;  %3830 = vmatpush.bf16.msrb.mxu0 %v4823_v52 }
 0x35a   : > { %v3323_v48 = vmax.f32 %v3034_v47, 0.0 }
 0x35b   : > { %v3606_v53 = vsel %vm3584_vm10, %v3464_v50, %v3605_v0  ;;  %v3036_v18 = vpop.f32.mrf.mxu2  ;;  %3280 = vmatmul.bf16.gmra.mxu3 %v6111_v7  ;;  %v4822_v0 = vld [vmem:[%s6796_s4 + $0x20] sm:$0xff]  ;;  %v2941_v7 = vadd.f32 %v2940_v33, %v6435_v35  ;;  %v4833_v33 = vld [vmem:[%s6796_s4 + $0x78] sm:$0xff] }
 0x35c   : > { %v3435_v1 = vsel %vm3427_vm0, %v3323_v48, 0.0  ;;  %3841 = vmatpush.bf16.msrb.mxu1 %v4833_v33 }
 0x35d   : > { %v3465_v46 = vmax.f32 %v3320_v44, %v3435_v1  ;;  %v2987_v31 = vpop.f32.mrf.mxu1  ;;  %3831 = vmatpush.bf16.msrb.mxu0 %v4822_v0 }
 0x35e   : > { %v6597_v26 = vpop.f32.mrf.mxu3  ;;  %v2988_v38 = vadd.f32 %v2987_v31, %v2939_v63 }
 0x35f   : > { %v3466_v34 = vrot.slane %v3465_v46, 4 }
 0x360   : > { %3182 = vmatmul.bf16.gmra.mxu1 %v5759_v54  ;;  %v4821_v54 = vld [vmem:[%s6796_s4 + $0x18] sm:$0xff]  ;;  %v3037_v9 = vadd.f32 %v3036_v18, %v2988_v38 }
 0x361   : > { %v3467_v3 = vmax.f32 %v3465_v46, %v3466_v34  ;;  %v2943_v22 = vpop.f32.mrf.mxu0  ;;  %3832 = vmatpush.bf16.msrb.mxu0 %v4821_v54  ;;  %v4832_v46 = vld [vmem:[%s6796_s4 + $0x70] sm:$0xff]  ;;  %v4830_v54 = vld [vmem:[%s6796_s4 + $0x60] sm:$0xff] }
 0x362   : > { %v3326_v27 = vmax.f32 %v3037_v9, 0.0  ;;  %v2944_v48 = vadd.f32 %v2943_v22, %v6474_v49  ;;  %3842 = vmatpush.bf16.msrb.mxu1 %v4832_v46 }
 0x363   : > { %v3468_v19 = vrot.slane %v3467_v3, 2  ;;  %v3038_v59 = vpop.f32.mrf.mxu2 }
 0x364   : > { %3138 = vmatmul.bf16.gmra.mxu0 %v6863_v20 }
 0x365   : > { %v3469_v43 = vmax.f32 %v3467_v3, %v3468_v19  ;;  %v2989_v12 = vpop.f32.mrf.mxu1  ;;  %3833 = vmatpush.bf16.msrb.mxu0 %v4820_v5  ;;  %v4831_v19 = vld [vmem:[%s6796_s4 + $0x68] sm:$0xff] }
 0x366   : > { %v2990_v32 = vadd.f32 %v2989_v12, %v2941_v7  ;;  %v6608_v14 = vpop.f32.mrf.mxu3  ;;  %3843 = vmatpush.bf16.msrb.mxu1 %v4831_v19 }
 0x367   : > { %v3470_v41 = vrot.slane %v3469_v43, 1 }
 0x368   : > { %v3039_v40 = vadd.f32 %v3038_v59, %v2990_v32  ;;  %3236 = vmatmul.bf16.gmra.mxu2 %v6852_v4  ;;  %v4819_v4 = vld [vmem:[%s6796_s4 + $0x8] sm:$0xff] }
 0x369   : > { %v3471_v63 = vmax.f32 %v3469_v43, %v3470_v41  ;;  %v2945_v35 = vpop.f32.mrf.mxu0  ;;  %3834 = vmatpush.bf16.msrb.mxu0 %v4819_v4 }
 0x36a   : > { %v3329_v57 = vmax.f32 %v3039_v40, 0.0  ;;  %v2946_v31 = vadd.f32 %v2945_v35, %v6498_v36  ;;  %3844 = vmatpush.bf16.msrb.mxu1 %v4830_v54 }
 0x36b   : > { %v3607_v6 = vsel %vm3586_vm11, %v3471_v63, %v3606_v53  ;;  %v3041_v39 = vpop.f32.mrf.mxu2  ;;  %3285 = vmatmul.bf16.gmra.mxu3 %v6850_v8  ;;  %v4818_v8 = vld [vmem:[%s6796_s4] sm:$0xff]  ;;  %v4829_v63 = vld [vmem:[%s6796_s4 + $0x58] sm:$0xff] }
 0x36c   : > { %v3437_v23 = vsel %vm3427_vm0, %v3329_v57, 0.0 }
 0x36d   : > { %v3472_v17 = vmax.f32 %v3326_v27, %v3437_v23  ;;  %v2992_v47 = vpop.f32.mrf.mxu1  ;;  %3835 = vmatpush.bf16.msrb.mxu0 %v4818_v8 }
 0x36e   : > { %v6624_v13 = vpop.f32.mrf.mxu3  ;;  %v2993_v18 = vadd.f32 %v2992_v47, %v2944_v48  ;;  %3845 = vmatpush.bf16.msrb.mxu1 %v4829_v63  ;;  %v6865_v47 = vld [vmem:[#allocation16_spill] sm:$0xff] }
 0x36f   : > { %v3473_v50 = vrot.slane %v3472_v17, 4  ;;  %v4827_v48 = vld [vmem:[%s6796_s4 + $0x48] sm:$0xff] }
 0x370   : > { %3187 = vmatmul.bf16.gmra.mxu1 %v6849_v45  ;;  %v6864_v45 = vld [vmem:[#allocation14_spill] sm:$0xff]  ;;  %v3042_v0 = vadd.f32 %v3041_v39, %v2993_v18 }
 0x371   : > { %v3474_v53 = vmax.f32 %v3472_v17, %v3473_v50  ;;  %v2948_v44 = vpop.f32.mrf.mxu0 }
 0x372   : > { %v3332_v12 = vmax.f32 %v3042_v0, 0.0  ;;  %v2949_v5 = vadd.f32 %v2948_v44, %v6507_v61 }
 0x373   : > { %v3475_v1 = vrot.slane %v3474_v53, 2  ;;  %v3043_v52 = vpop.f32.mrf.mxu2 }
 0x374   : > { %3143 = vmatmul.bf16.gmra.mxu0 %v6864_v45 }
 0x375   : > { %v3476_v49 = vmax.f32 %v3474_v53, %v3475_v1  ;;  %v2994_v34 = vpop.f32.mrf.mxu1 }
 0x376   : > { %v2995_v3 = vadd.f32 %v2994_v34, %v2946_v31  ;;  %v6639_v7 = vpop.f32.mrf.mxu3  ;;  %v4826_v31 = vld [vmem:[%s6796_s4 + $0x40] sm:$0xff] }
 0x377   : > { %v3477_v22 = vrot.slane %v3476_v49, 1 }
 0x378   : > { %v3044_v38 = vadd.f32 %v3043_v52, %v2995_v3  ;;  %3241 = vmatmul.bf16.gmra.mxu2 %v6856_v28  ;;  %v4874_v52 = vld [vmem:[%s6795_s3] sm:$0x7] }
 0x379   : > { %v3478_v59 = vmax.f32 %v3476_v49, %v3477_v22  ;;  %v2950_v36 = vpop.f32.mrf.mxu0  ;;  %v6674_v45 = vperm.slane %v4874_v52, 2 }
 0x37a   : > { %v3335_v20 = vmax.f32 %v3044_v38, 0.0  ;;  %v2951_v39 = vadd.f32 %v2950_v36, %v6513_v51 }
 0x37b   : > { %v3608_v43 = vsel %vm3588_vm12, %v3478_v59, %v3607_v6  ;;  %v3046_v41 = vpop.f32.mrf.mxu2  ;;  %3290 = vmatmul.bf16.gmra.mxu3 %v6854_v30  ;;  %v4828_v30 = vld [vmem:[%s6796_s4 + $0x50] sm:$0xff]  ;;  %v3066_v0 = vadd.f32 %v6535_v15, %v6674_v45 }
 0x37c   : > { %v3439_v32 = vsel %vm3427_vm0, %v3335_v20, 0.0  ;;  %3846 = vmatpush.bf16.msrb.mxu1 %v4828_v30 }
 0x37d   : > { %v3479_v9 = vmax.f32 %v3332_v12, %v3439_v32  ;;  %v2997_v40 = vpop.f32.mrf.mxu1 }
 0x37e   : > { %v6652_v35 = vpop.f32.mrf.mxu3  ;;  %v2998_v23 = vadd.f32 %v2997_v40, %v2949_v5 }
 0x37f   : > { %v3480_v28 = vrot.slane %v3479_v9, 4 }
 0x380   : > { %3192 = vmatmul.bf16.gmra.mxu1 %v6853_v42  ;;  %v3047_v61 = vadd.f32 %v3046_v41, %v2998_v23  ;;  %v4841_v23 = vld [vmem:[%s6796_s4 + $0xb8] sm:$0xff] }
 0x381   : > { %v3481_v57 = vmax.f32 %v3479_v9, %v3480_v28  ;;  %v2953_v6 = vpop.f32.mrf.mxu0  ;;  %3847 = vmatpush.bf16.msrb.mxu1 %v4827_v48  ;;  %3854 = vmatpush.bf16.msrb.mxu2 %v4841_v23 }
 0x382   : > { %v3338_v46 = vmax.f32 %v3047_v61, 0.0  ;;  %v2954_v38 = vadd.f32 %v2953_v6, %v6522_v24 }
 0x383   : > { %v3482_v27 = vrot.slane %v3481_v57, 2  ;;  %v3048_v17 = vpop.f32.mrf.mxu2 }
 0x384   : > { %3148 = vmatmul.bf16.gmra.mxu0 %v6865_v47 }
 0x385   : > { %v3483_v4 = vmax.f32 %v3481_v57, %v3482_v27  ;;  %v2999_v50 = vpop.f32.mrf.mxu1  ;;  %3848 = vmatpush.bf16.msrb.mxu1 %v4826_v31 }
 0x386   : > { %v3000_v42 = vadd.f32 %v2999_v50, %v2951_v39  ;;  %v6664_v44 = vpop.f32.mrf.mxu3  ;;  %v3071_v50 = vadd.f32 %v6551_v37, %v6674_v45 }
 0x387   : > { %v3484_v33 = vrot.slane %v3483_v4, 1 }
 0x388   : > { %v3049_v53 = vadd.f32 %v3048_v17, %v3000_v42  ;;  %3246 = vmatmul.bf16.gmra.mxu2 %v5938_v60 }
 0x389   : > { %v3485_v8 = vmax.f32 %v3483_v4, %v3484_v33  ;;  %v2955_v51 = vpop.f32.mrf.mxu0 }
 0x38a   : > { %v3341_v1 = vmax.f32 %v3049_v53, 0.0  ;;  %v2956_v54 = vadd.f32 %v2955_v51, %v6527_v56 }
 0x38b   : > { %v3609_v18 = vsel %vm3590_vm13, %v3485_v8, %v3608_v43  ;;  %v3051_v60 = vpop.f32.mrf.mxu2  ;;  %3295 = vmatmul.bf16.gmra.mxu3 %v6214_v58  ;;  %v3629_v43 = vpack.c.bf16 %v6545_v62, %v6545_v62 }
 0x38c   : > { %v3441_v49 = vsel %vm3427_vm0, %v3341_v1, 0.0 }
 0x38d   : > { %v3486_v34 = vmax.f32 %v3338_v46, %v3441_v49  ;;  %v3002_v3 = vpop.f32.mrf.mxu1  ;;  %v3073_v49 = vadd.f32 %v6556_v10, %v6674_v45 }
 0x38e   : > { %v6681_v19 = vpop.f32.mrf.mxu3  ;;  %v3003_v58 = vadd.f32 %v3002_v3, %v2954_v38 }
 0x38f   : > { %v3487_v22 = vrot.slane %v3486_v34, 4 }
 0x390   : > { %3197 = vmatmul.bf16.gmra.mxu1 %v6857_v16  ;;  %v3052_v28 = vadd.f32 %v3051_v60, %v3003_v58  ;;  %v3068_v16 = vadd.f32 %v6540_v21, %v6674_v45  ;;  %v4840_v58 = vld [vmem:[%s6796_s4 + $0xb0] sm:$0xff] }
 0x391   : > { %v3488_v59 = vmax.f32 %v3486_v34, %v3487_v22  ;;  %v3114_v36 = vpop.f32.mrf.mxu0  ;;  %3855 = vmatpush.bf16.msrb.mxu2 %v4840_v58 }
 0x392   : > { %v3115_v20 = vadd.f32 %v3114_v36, %v3066_v0  ;;  %v3344_v27 = vmax.f32 %v3052_v28, 0.0 }
 0x393   : > { %v3489_v12 = vrot.slane %v3488_v59, 2  ;;  %v3053_v32 = vpop.f32.mrf.mxu2 }
 0x394   : > { %3836 = vmatmul.bf16.vlgmr.msrb.gmra.mxu0 %v3629_v43 }
 0x395   : > { %v3490_v41 = vmax.f32 %v3488_v59, %v3489_v12  ;;  %v3004_v15 = vpop.f32.mrf.mxu1 }
 0x396   : > { %v3005_v9 = vadd.f32 %v3004_v15, %v2956_v54  ;;  %v6690_v63 = vpop.f32.mrf.mxu3 }
 0x397   : > { %v3491_v40 = vrot.slane %v3490_v41, 1 }
 0x398   : > { %v3054_v24 = vadd.f32 %v3053_v32, %v3005_v9 }
 0x399   : > { %v3492_v5 = vmax.f32 %v3490_v41, %v3491_v40  ;;  %v3116_v57 = vpop.f32.mrf.mxu0  ;;  %v3076_v41 = vadd.f32 %v6563_v11, %v6674_v45 }
 0x39a   : > { %v3347_v62 = vmax.f32 %v3054_v24, 0.0  ;;  %v3117_v6 = vadd.f32 %v3116_v57, %v3068_v16 }
 0x39b   : > { %v3610_v56 = vsel %vm3592_vm14, %v3492_v5, %v3609_v18  ;;  %v3212_v39 = vpop.f32.mrf.mxu2 }
 0x39c   : > { %v3443_v30 = vsel %vm3427_vm0, %v3347_v62, 0.0 }
 0x39d   : > { %v3493_v17 = vmax.f32 %v3344_v27, %v3443_v30  ;;  %v3163_v21 = vpop.f32.mrf.mxu1 }
 0x39e   : > { %v3164_v47 = vadd.f32 %v3163_v21, %v3115_v20  ;;  %v3261_v33 = vpop.f32.mrf.mxu3 }
 0x39f   : > { %v3494_v4 = vrot.slane %v3493_v17, 4 }
 0x3a0   : > { %v3213_v42 = vadd.f32 %v3212_v39, %v3164_v47 }
 0x3a1   : > { %v3495_v61 = vmax.f32 %v3493_v17, %v3494_v4  ;;  %v3119_v48 = vpop.f32.mrf.mxu0 }
 0x3a2   : > { %v3262_v53 = vadd.f32 %v3261_v33, %v3213_v42  ;;  %v3120_v8 = vadd.f32 %v3119_v48, %v3071_v50  ;;  %v4839_v50 = vld [vmem:[%s6796_s4 + $0xa8] sm:$0xff]  ;;  %v3081_v48 = vadd.f32 %v6576_v55, %v6674_v45 }
 0x3a3   : > { %v3496_v51 = vrot.slane %v3495_v61, 2  ;;  %v3214_v1 = vpop.f32.mrf.mxu2  ;;  %3856 = vmatpush.bf16.msrb.mxu2 %v4839_v50 }
 0x3a4   : > { %v3303_v43 = vmax.f32 %v3262_v53, 0.0 }
 0x3a5   : > { %v3497_v18 = vmax.f32 %v3495_v61, %v3496_v51  ;;  %v3165_v46 = vpop.f32.mrf.mxu1 }
 0x3a6   : > { %v3166_v31 = vadd.f32 %v3165_v46, %v3117_v6  ;;  %v3263_v34 = vpop.f32.mrf.mxu3  ;;  %v3078_v6 = vadd.f32 %v6568_v29, %v6674_v45 }
 0x3a7   : > { %v3498_v52 = vrot.slane %v3497_v18, 1 }
 0x3a8   : > { %v3215_v60 = vadd.f32 %v3214_v1, %v3166_v31 }
 0x3a9   : > { %v3499_v3 = vmax.f32 %v3497_v18, %v3498_v52  ;;  %v3121_v22 = vpop.f32.mrf.mxu0 }
 0x3aa   : > { %v3264_v37 = vadd.f32 %v3263_v34, %v3215_v60  ;;  %v3122_v0 = vadd.f32 %v3121_v22, %v3073_v49 }
 0x3ab   : > { %v3611_v38 = vsel %vm3594_vm15, %v3499_v3, %v3610_v56  ;;  %v3217_v36 = vpop.f32.mrf.mxu2 }
 0x3ac   : > { %v3306_v59 = vmax.f32 %v3264_v37, 0.0  ;;  %v3630_v20 = vpack.c.bf16 %v3611_v38, %v3611_v38 }
 0x3ad   : > { %v3168_v12 = vpop.f32.mrf.mxu1 }
 0x3ae   : > { %v3503_v10 = vsel %vm3501_vm1, %v3306_v59, 0.0  ;;  %v3169_v54 = vadd.f32 %v3168_v12, %v3120_v8  ;;  %3849 = vmatmul.bf16.vlgmr.msrb.gmra.mxu1 %v3630_v20  ;;  %v3266_v9 = vpop.f32.mrf.mxu3 }
 0x3af   : > { %v3518_v32 = vmax.f32 %v3303_v43, %v3503_v10 }
 0x3b0   : > { %v3218_v15 = vadd.f32 %v3217_v36, %v3169_v54 }
 0x3b1   : > { %v3124_v40 = vpop.f32.mrf.mxu0  ;;  %v3519_v62 = vrot.slane %v3518_v32, 4 }
 0x3b2   : > { %v3267_v28 = vadd.f32 %v3266_v9, %v3218_v15  ;;  %v3125_v16 = vadd.f32 %v3124_v40, %v3076_v41  ;;  %v4838_v9 = vld [vmem:[%s6796_s4 + $0xa0] sm:$0xff] }
 0x3b3   : > { %v3219_v24 = vpop.f32.mrf.mxu2  ;;  %v3520_v17 = vmax.f32 %v3518_v32, %v3519_v62  ;;  %3857 = vmatpush.bf16.msrb.mxu2 %v4838_v9 }
 0x3b4   : > { %v3309_v47 = vmax.f32 %v3267_v28, 0.0 }
 0x3b5   : > { %v3170_v5 = vpop.f32.mrf.mxu1  ;;  %v3521_v61 = vrot.slane %v3520_v17, 2 }
 0x3b6   : > { %v3171_v57 = vadd.f32 %v3170_v5, %v3122_v0  ;;  %v3268_v56 = vpop.f32.mrf.mxu3  ;;  %v3083_v0 = vadd.f32 %v6584_v25, %v6674_v45 }
 0x3b7   : > { %v3522_v31 = vmax.f32 %v3520_v17, %v3521_v61 }
 0x3b8   : > { %v3220_v27 = vadd.f32 %v3219_v24, %v3171_v57 }
 0x3b9   : > { %v3126_v23 = vpop.f32.mrf.mxu0  ;;  %v3523_v22 = vrot.slane %v3522_v31, 1 }
 0x3ba   : > { %v3269_v30 = vadd.f32 %v3268_v56, %v3220_v27  ;;  %v3127_v39 = vadd.f32 %v3126_v23, %v3078_v6 }
 0x3bb   : > { %v3222_v11 = vpop.f32.mrf.mxu2  ;;  %v3524_v12 = vmax.f32 %v3522_v31, %v3523_v22 }
 0x3bc   : > { %v3312_v21 = vmax.f32 %v3269_v30, 0.0 }
 0x3bd   : > { %v3173_v4 = vpop.f32.mrf.mxu1 }
 0x3be   : > { %v3505_v42 = vsel %vm3501_vm1, %v3312_v21, 0.0  ;;  %v3174_v33 = vadd.f32 %v3173_v4, %v3125_v16  ;;  %v3271_v8 = vpop.f32.mrf.mxu3  ;;  %v3086_v16 = vadd.f32 %v6597_v26, %v6674_v45 }
 0x3bf   : > { %v3525_v29 = vmax.f32 %v3309_v47, %v3505_v42 }
 0x3c0   : > { %v3223_v53 = vadd.f32 %v3222_v11, %v3174_v33 }
 0x3c1   : > { %v3526_v51 = vrot.slane %v3525_v29, 4  ;;  %v3129_v1 = vpop.f32.mrf.mxu0 }
 0x3c2   : > { %v3272_v18 = vadd.f32 %v3271_v8, %v3223_v53  ;;  %v3130_v46 = vadd.f32 %v3129_v1, %v3081_v48  ;;  %v4837_v8 = vld [vmem:[%s6796_s4 + $0x98] sm:$0xff] }
 0x3c3   : > { %v3527_v52 = vmax.f32 %v3525_v29, %v3526_v51  ;;  %v3224_v49 = vpop.f32.mrf.mxu2  ;;  %3858 = vmatpush.bf16.msrb.mxu2 %v4837_v8 }
 0x3c4   : > { %v3315_v41 = vmax.f32 %v3272_v18, 0.0 }
 0x3c5   : > { %v3528_v60 = vrot.slane %v3527_v52, 2  ;;  %v3175_v34 = vpop.f32.mrf.mxu1 }
 0x3c6   : > { %v3176_v3 = vadd.f32 %v3175_v34, %v3127_v39  ;;  %v3273_v59 = vpop.f32.mrf.mxu3 }
 0x3c7   : > { %v3529_v37 = vmax.f32 %v3527_v52, %v3528_v60 }
 0x3c8   : > { %v3225_v38 = vadd.f32 %v3224_v49, %v3176_v3  ;;  %v3088_v49 = vadd.f32 %v6608_v14, %v6674_v45  ;;  %v3091_v14 = vadd.f32 %v6624_v13, %v6674_v45  ;;  %v3093_v13 = vadd.f32 %v6639_v7, %v6674_v45 }
 0x3c9   : > { %v3530_v55 = vrot.slane %v3529_v37, 1  ;;  %v3131_v36 = vpop.f32.mrf.mxu0 }
 0x3ca   : > { %v3274_v20 = vadd.f32 %v3273_v59, %v3225_v38  ;;  %v3132_v43 = vadd.f32 %v3131_v36, %v3083_v0 }
 0x3cb   : > { %v3531_v58 = vmax.f32 %v3529_v37, %v3530_v55  ;;  %v3227_v54 = vpop.f32.mrf.mxu2 }
 0x3cc   : > { %v3318_v10 = vmax.f32 %v3274_v20, 0.0 }
 0x3cd   : > { %v3621_v32 = vsel %vm3582_vm9, %v3531_v58, %v3524_v12  ;;  %v3178_v15 = vpop.f32.mrf.mxu1 }
 0x3ce   : > { %v3507_v25 = vsel %vm3501_vm1, %v3318_v10, 0.0  ;;  %v3179_v40 = vadd.f32 %v3178_v15, %v3130_v46  ;;  %v3276_v5 = vpop.f32.mrf.mxu3 }
 0x3cf   : > { %v3532_v28 = vmax.f32 %v3315_v41, %v3507_v25  ;;  %v4836_v25 = vld [vmem:[%s6796_s4 + $0x90] sm:$0xff] }
 0x3d0   : > { %v3228_v24 = vadd.f32 %v3227_v54, %v3179_v40  ;;  %3859 = vmatpush.bf16.msrb.mxu2 %v4836_v25 }
 0x3d1   : > { %v3533_v57 = vrot.slane %v3532_v28, 4  ;;  %v3134_v62 = vpop.f32.mrf.mxu0 }
 0x3d2   : > { %v3277_v6 = vadd.f32 %v3276_v5, %v3228_v24  ;;  %v3135_v27 = vadd.f32 %v3134_v62, %v3086_v16 }
 0x3d3   : > { %v3534_v56 = vmax.f32 %v3532_v28, %v3533_v57  ;;  %v3229_v23 = vpop.f32.mrf.mxu2 }
 0x3d4   : > { %v3321_v48 = vmax.f32 %v3277_v6, 0.0 }
 0x3d5   : > { %v3535_v30 = vrot.slane %v3534_v56, 2  ;;  %v3180_v39 = vpop.f32.mrf.mxu1 }
 0x3d6   : > { %v3181_v17 = vadd.f32 %v3180_v39, %v3132_v43  ;;  %v3278_v47 = vpop.f32.mrf.mxu3 }
 0x3d7   : > { %v3536_v21 = vmax.f32 %v3534_v56, %v3535_v30 }
 0x3d8   : > { %v3230_v11 = vadd.f32 %v3229_v23, %v3181_v17 }
 0x3d9   : > { %v3537_v4 = vrot.slane %v3536_v21, 1  ;;  %v3136_v50 = vpop.f32.mrf.mxu0 }
 0x3da   : > { %v3279_v42 = vadd.f32 %v3278_v47, %v3230_v11  ;;  %v3137_v34 = vadd.f32 %v3136_v50, %v3088_v49 }
 0x3db   : > { %v3538_v33 = vmax.f32 %v3536_v21, %v3537_v4  ;;  %v3232_v26 = vpop.f32.mrf.mxu2 }
 0x3dc   : > { %v3324_v61 = vmax.f32 %v3279_v42, 0.0 }
 0x3dd   : > { %v3622_v29 = vsel %vm3584_vm10, %v3538_v33, %v3621_v32  ;;  %v3183_v53 = vpop.f32.mrf.mxu1 }
 0x3de   : > { %v3509_v51 = vsel %vm3501_vm1, %v3324_v61, 0.0  ;;  %v3281_v18 = vpop.f32.mrf.mxu3  ;;  %v3184_v31 = vadd.f32 %v3183_v53, %v3135_v27 }
 0x3df   : > { %v3539_v1 = vmax.f32 %v3321_v48, %v3509_v51  ;;  %v3096_v48 = vadd.f32 %v6652_v35, %v6674_v45 }
 0x3e0   : > { %v3233_v37 = vadd.f32 %v3232_v26, %v3184_v31  ;;  %v4835_v26 = vld [vmem:[%s6796_s4 + $0x88] sm:$0xff] }
 0x3e1   : > { %v3540_v46 = vrot.slane %v3539_v1, 4  ;;  %v3139_v52 = vpop.f32.mrf.mxu0  ;;  %3860 = vmatpush.bf16.msrb.mxu2 %v4835_v26 }
 0x3e2   : > { %v3282_v43 = vadd.f32 %v3281_v18, %v3233_v37  ;;  %v3140_v28 = vadd.f32 %v3139_v52, %v3091_v14  ;;  %v3101_v14 = vadd.f32 %v6681_v19, %v6674_v45 }
 0x3e3   : > { %v3541_v60 = vmax.f32 %v3539_v1, %v3540_v46  ;;  %v3234_v3 = vpop.f32.mrf.mxu2 }
 0x3e4   : > { %v3327_v15 = vmax.f32 %v3282_v43, 0.0 }
 0x3e5   : > { %v3542_v22 = vrot.slane %v3541_v60, 2  ;;  %v3185_v0 = vpop.f32.mrf.mxu1 }
 0x3e6   : > { %v3186_v38 = vadd.f32 %v3185_v0, %v3137_v34  ;;  %v3283_v36 = vpop.f32.mrf.mxu3  ;;  %v3098_v34 = vadd.f32 %v6664_v44, %v6674_v45 }
 0x3e7   : > { %v3543_v59 = vmax.f32 %v3541_v60, %v3542_v22 }
 0x3e8   : > { %v3235_v55 = vadd.f32 %v3234_v3, %v3186_v38 }
 0x3e9   : > { %v3544_v20 = vrot.slane %v3543_v59, 1  ;;  %v3141_v12 = vpop.f32.mrf.mxu0 }
 0x3ea   : > { %v3284_v58 = vadd.f32 %v3283_v36, %v3235_v55  ;;  %v3142_v27 = vadd.f32 %v3141_v12, %v3093_v13  ;;  %v3103_v13 = vadd.f32 %v6690_v63, %v6674_v45 }
 0x3eb   : > { %v3545_v10 = vmax.f32 %v3543_v59, %v3544_v20  ;;  %v3237_v32 = vpop.f32.mrf.mxu2 }
 0x3ec   : > { %v3330_v54 = vmax.f32 %v3284_v58, 0.0 }
 0x3ed   : > { %v3623_v41 = vsel %vm3586_vm11, %v3545_v10, %v3622_v29  ;;  %v3188_v9 = vpop.f32.mrf.mxu1 }
 0x3ee   : > { %v3511_v40 = vsel %vm3501_vm1, %v3330_v54, 0.0  ;;  %v3286_v24 = vpop.f32.mrf.mxu3  ;;  %v3189_v57 = vadd.f32 %v3188_v9, %v3140_v28 }
 0x3ef   : > { %v3546_v16 = vmax.f32 %v3327_v15, %v3511_v40 }
 0x3f0   : > { %v3238_v30 = vadd.f32 %v3237_v32, %v3189_v57  ;;  %v4834_v32 = vld [vmem:[%s6796_s4 + $0x80] sm:$0xff] }
 0x3f1   : > { %v3547_v5 = vrot.slane %v3546_v16, 4  ;;  %v3144_v62 = vpop.f32.mrf.mxu0  ;;  %3861 = vmatpush.bf16.msrb.mxu2 %v4834_v32 }
 0x3f2   : > { %v3287_v50 = vadd.f32 %v3286_v24, %v3238_v30  ;;  %v3145_v18 = vadd.f32 %v3144_v62, %v3096_v48 }
 0x3f3   : > { %v3548_v6 = vmax.f32 %v3546_v16, %v3547_v5  ;;  %v3239_v56 = vpop.f32.mrf.mxu2 }
 0x3f4   : > { %v3333_v8 = vmax.f32 %v3287_v50, 0.0 }
 0x3f5   : > { %v3549_v23 = vrot.slane %v3548_v6, 2  ;;  %v3190_v39 = vpop.f32.mrf.mxu1 }
 0x3f6   : > { %v3191_v17 = vadd.f32 %v3190_v39, %v3142_v27  ;;  %v3288_v47 = vpop.f32.mrf.mxu3 }
 0x3f7   : > { %v3550_v21 = vmax.f32 %v3548_v6, %v3549_v23 }
 0x3f8   : > { %v3240_v11 = vadd.f32 %v3239_v56, %v3191_v17 }
 0x3f9   : > { %v3551_v4 = vrot.slane %v3550_v21, 1  ;;  %v3146_v42 = vpop.f32.mrf.mxu0 }
 0x3fa   : > { %v3289_v33 = vadd.f32 %v3288_v47, %v3240_v11  ;;  %v3147_v22 = vadd.f32 %v3146_v42, %v3098_v34 }
 0x3fb   : > { %v3552_v61 = vmax.f32 %v3550_v21, %v3551_v4  ;;  %v3242_v29 = vpop.f32.mrf.mxu2 }
 0x3fc   : > { %v3336_v7 = vmax.f32 %v3289_v33, 0.0 }
 0x3fd   : > { %v3624_v53 = vsel %vm3588_vm12, %v3552_v61, %v3623_v41  ;;  %v3193_v51 = vpop.f32.mrf.mxu1 }
 0x3fe   : > { %v3513_v1 = vsel %vm3501_vm1, %v3336_v7, 0.0  ;;  %v3291_v31 = vpop.f32.mrf.mxu3  ;;  %v3194_v49 = vadd.f32 %v3193_v51, %v3145_v18 }
 0x3ff   : > { %v3553_v46 = vmax.f32 %v3333_v8, %v3513_v1  ;;  %v4873_v8 = vld [vmem:[%s6797_s5] ss:$0 sm:$0xff] }
 0x400   : > { %v3243_v0 = vadd.f32 %v3242_v29, %v3194_v49 }
 0x401   : > { %v3554_v52 = vrot.slane %v3553_v46, 4  ;;  %v3149_v60 = vpop.f32.mrf.mxu0 }
 0x402   : > { %v3292_v12 = vadd.f32 %v3291_v31, %v3243_v0  ;;  %v3150_v28 = vadd.f32 %v3149_v60, %v3101_v14 }
 0x403   : > { %v3555_v3 = vmax.f32 %v3553_v46, %v3554_v52  ;;  %v3244_v35 = vpop.f32.mrf.mxu2 }
 0x404   : > { %v3339_v15 = vmax.f32 %v3292_v12, 0.0 }
 0x405   : > { %v3556_v37 = vrot.slane %v3555_v3, 2  ;;  %v3195_v38 = vpop.f32.mrf.mxu1 }
 0x406   : > { %v3196_v59 = vadd.f32 %v3195_v38, %v3147_v22  ;;  %v3293_v20 = vpop.f32.mrf.mxu3 }
 0x407   : > { %v3557_v55 = vmax.f32 %v3555_v3, %v3556_v37 }
 0x408   : > { %v3245_v36 = vadd.f32 %v3244_v35, %v3196_v59 }
 0x409   : > { %v3558_v43 = vrot.slane %v3557_v55, 1  ;;  %v3151_v58 = vpop.f32.mrf.mxu0 }
 0x40a   : > { %v3294_v10 = vadd.f32 %v3293_v20, %v3245_v36  ;;  %v3152_v19 = vadd.f32 %v3151_v58, %v3103_v13 }
 0x40b   : > { %v3559_v54 = vmax.f32 %v3557_v55, %v3558_v43  ;;  %v3247_v9 = vpop.f32.mrf.mxu2 }
 0x40c   : > { %v3342_v44 = vmax.f32 %v3294_v10, 0.0 }
 0x40d   : > { %v3625_v41 = vsel %vm3590_vm13, %v3559_v54, %v3624_v53  ;;  %v3198_v25 = vpop.f32.mrf.mxu1 }
 0x40e   : > { %v3515_v40 = vsel %vm3501_vm1, %v3342_v44, 0.0  ;;  %v3296_v24 = vpop.f32.mrf.mxu3  ;;  %v3199_v57 = vadd.f32 %v3198_v25, %v3150_v28 }
 0x40f   : > { %v3560_v16 = vmax.f32 %v3339_v15, %v3515_v40 }
 0x410   : > { %v3248_v56 = vadd.f32 %v3247_v9, %v3199_v57 }
 0x411   : > { %v3561_v5 = vrot.slane %v3560_v16, 4  ;;  %v3837_v62 = vpop.f32.mrf.mxu0 }
 0x412   : > { %v3297_v47 = vadd.f32 %v3296_v24, %v3248_v56  ;;  %v3838_v18 = vadd.f32 %v4873_v8, %v3837_v62 }
 0x413   : > { %v3562_v6 = vmax.f32 %v3560_v16, %v3561_v5  ;;  %v3249_v17 = vpop.f32.mrf.mxu2 }
 0x414   : > { %v3345_v26 = vmax.f32 %v3297_v47, 0.0 }
 0x415   : > { %v3563_v27 = vrot.slane %v3562_v6, 2  ;;  %v3200_v23 = vpop.f32.mrf.mxu1 }
 0x416   : > { %v3201_v30 = vadd.f32 %v3200_v23, %v3152_v19  ;;  %v3298_v4 = vpop.f32.mrf.mxu3 }
 0x417   : > { %v3564_v39 = vmax.f32 %v3562_v6, %v3563_v27 }
 0x418   : > { %v3250_v21 = vadd.f32 %v3249_v17, %v3201_v30 }
 0x419   : > { %v3565_v11 = vrot.slane %v3564_v39, 1  ;;  %v3839_v50 = vpop.f32.mrf.mxu0 }
 0x41a   : > { %v3299_v42 = vadd.f32 %v3298_v4, %v3250_v21 }
 0x41b   : > { %v3566_v33 = vmax.f32 %v3564_v39, %v3565_v11 }
 0x41c   : > { %v3348_v61 = vmax.f32 %v3299_v42, 0.0 }
 0x41d   : > { %v3626_v7 = vsel %vm3592_vm14, %v3566_v33, %v3625_v41 }
 0x41e   : > { %v3517_v45 = vsel %vm3501_vm1, %v3348_v61, 0.0 }
 0x41f   : > { %v3567_v63 = vmax.f32 %v3345_v26, %v3517_v45 }
 0x421   : > { %v3568_v29 = vrot.slane %v3567_v63, 4 }
 0x423   : > { %v3569_v48 = vmax.f32 %v3567_v63, %v3568_v29 }
 0x425   : > { %v3570_v53 = vrot.slane %v3569_v48, 2 }
 0x427   : > { %v3571_v51 = vmax.f32 %v3569_v48, %v3570_v53 }
 0x429   : > { %v3572_v1 = vrot.slane %v3571_v51, 1 }
 0x42b   : > { %v3573_v46 = vmax.f32 %v3571_v51, %v3572_v1  ;;  %v3850_v31 = vpop.f32.mrf.mxu1 }
 0x42c   : > { %v3851_v52 = vadd.f32 %v3850_v31, %v3838_v18 }
 0x42d   : > { %v3627_v49 = vsel %vm3594_vm15, %v3573_v46, %v3626_v7 }
 0x42e   : > { %v3631_v2 = vpack.c.bf16 %v3627_v49, %v3627_v49 }
 0x430   : > { %3862 = vmatmul.bf16.vlgmr.msrb.gmra.mxu2 %v3631_v2 }
 0x433   : > { %v3852_v60 = vpop.f32.mrf.mxu1 }
 0x4b3   : > { %v3863_v34 = vpop.f32.mrf.mxu2 }
 0x4b4   : > { %v3864_v3 = vadd.f32 %v3863_v34, %v3851_v52 }
 0x4b6   : > { %3867 = vst [vmem:[%s602_s20] sm:$0xff] %v3864_v3 }
 0x4bb   : > { %v3865_v22 = vpop.f32.mrf.mxu2 }
 0x4bc PF: > { %p13_p9 = scmp.ge.s32.totalorder %s4953_s25, 4   ;;  %s6866_s21 = smov %s4893_s22 }
 0x4bd   : > { %s6867_s22 = smov %s4962_s28  ;;  %s6868_s23 = smov %s4953_s25 }
 0x4be   :  { %15 = sbr.rel (!%p13_p9) target bundleno = 2 (0x2), region = 121 }

</bundles_post_ra>
